<compile_context>
chip_gen: v7x
topology: tpu7x:2x2x1
jax: 0.10.0
libtpu: 0.0.40
codegen_flags: <defaults>
</compile_context>

<pallas_src>
import functools

import numpy as np
import jax
import jax.numpy as jnp
from jax.experimental import pallas as pl
from jax.experimental.pallas import tpu as pltpu

LANES = 128                      # pad conv output channels to a full lane width
TILE_M = 256                     # M-tile for the GEMM grid
VMEM_CAP = 48 * 1024 * 1024      # <= 64 MiB physical VMEM per TC on v7x
VMEM_FLOOR = 16 * 1024 * 1024


def _nbytes(shape, dtype):
    return int(np.prod(shape)) * jnp.dtype(dtype).itemsize


def _vmem_limit(*block_bytes):
    # x2 for double-buffered pipelining, +1 MiB slack for internal scratch.
    need = 2 * sum(int(b) for b in block_bytes) + (1 << 20)
    return int(min(max(need, VMEM_FLOOR), VMEM_CAP))


def _m_tiles(M, tile_m=TILE_M):
    if M <= tile_m:
        return M, 1
    return tile_m, pl.cdiv(M, tile_m)


# --------------------------------------------------------------------------
# Kernels
# --------------------------------------------------------------------------
def _matmul_bias_relu_kernel(x_ref, w_ref, b_ref, o_ref):
    acc = jnp.dot(x_ref[...], w_ref[...], preferred_element_type=jnp.float32)
    acc = jnp.maximum(acc + b_ref[...], 0.0)
    o_ref[...] = acc.astype(o_ref.dtype)


def pallas_matmul_bias_relu(x, w, b, *, out_dtype=jnp.bfloat16):
    """relu(x @ w + b).  x: (M, K) bf16, w: (K, N) bf16, b: (N,) f32."""
    M, K = x.shape
    Kw, N = w.shape
    assert K == Kw and b.shape == (N,)
    bm, gm = _m_tiles(M)
    cost = pl.CostEstimate(
        flops=2 * M * K * N,
        transcendentals=0,
        bytes_accessed=_nbytes((M, K), x.dtype) + _nbytes((K, N), w.dtype)
        + _nbytes((M, N), out_dtype) + _nbytes((N,), jnp.float32),
    )
    vmem = _vmem_limit(_nbytes((bm, K), x.dtype), _nbytes((K, N), w.dtype),
                       _nbytes((bm, N), out_dtype), _nbytes((1, N), jnp.float32))
    return pl.pallas_call(
        _matmul_bias_relu_kernel,
        grid=(gm,),
        in_specs=[
            pl.BlockSpec((bm, K), lambda i: (i, 0)),
            pl.BlockSpec((K, N), lambda i: (0, 0)),      # weights stay resident
            pl.BlockSpec((1, N), lambda i: (0, 0)),
        ],
        out_specs=pl.BlockSpec((bm, N), lambda i: (i, 0)),
        out_shape=jax.ShapeDtypeStruct((M, N), out_dtype),
        compiler_params=pltpu.CompilerParams(
            dimension_semantics=("parallel",), vmem_limit_bytes=vmem),
        cost_estimate=cost,
    )(x, w, b.reshape(1, N))


def _mlp_actor_head_kernel(x_ref, w4_ref, b4_ref, w5_ref, b5_ref, o_ref):
    # hidden = relu(flat @ w4 + b4)
    h = jnp.dot(x_ref[...], w4_ref[...], preferred_element_type=jnp.float32)
    h = jnp.maximum(h + b4_ref[...], 0.0)
    # logits = hidden @ w5 + b5 ; probs = softmax(logits)
    logits = jnp.dot(h.astype(w5_ref.dtype), w5_ref[...],
                     preferred_element_type=jnp.float32) + b5_ref[...]
    m = jnp.max(logits, axis=-1, keepdims=True)
    e = jnp.exp(logits - m)
    inv = pl.reciprocal(jnp.sum(e, axis=-1, keepdims=True), approx=True)
    o_ref[...] = (e * inv).astype(o_ref.dtype)


def pallas_actor_head(flat, w4, b4, w5, b5):
    """softmax(relu(flat @ w4 + b4) @ w5 + b5) fused in one kernel."""
    M, K = flat.shape
    Kh, H = w4.shape
    Hh, N = w5.shape
    assert K == Kh and H == Hh
    bm, gm = _m_tiles(M)
    cost = pl.CostEstimate(
        flops=2 * M * (K * H + H * N),
        transcendentals=M * N,
        bytes_accessed=_nbytes((M, K), flat.dtype) + _nbytes((K, H), w4.dtype)
        + _nbytes((H, N), w5.dtype) + _nbytes((M, N), jnp.float32),
    )
    vmem = _vmem_limit(_nbytes((bm, K), flat.dtype), _nbytes((K, H), w4.dtype),
                       _nbytes((H, N), w5.dtype), _nbytes((bm, H), jnp.float32),
                       _nbytes((bm, N), jnp.float32))
    return pl.pallas_call(
        _mlp_actor_head_kernel,
        grid=(gm,),
        in_specs=[
            pl.BlockSpec((bm, K), lambda i: (i, 0)),
            pl.BlockSpec((K, H), lambda i: (0, 0)),
            pl.BlockSpec((1, H), lambda i: (0, 0)),
            pl.BlockSpec((H, N), lambda i: (0, 0)),
            pl.BlockSpec((1, N), lambda i: (0, 0)),
        ],
        out_specs=pl.BlockSpec((bm, N), lambda i: (i, 0)),
        out_shape=jax.ShapeDtypeStruct((M, N), jnp.float32),
        compiler_params=pltpu.CompilerParams(
            dimension_semantics=("parallel",), vmem_limit_bytes=vmem),
        cost_estimate=cost,
    )(flat, w4, b4.reshape(1, H), w5, b5.reshape(1, N))


# --------------------------------------------------------------------------
# Conv (im2col) glue — NHWC throughout
# --------------------------------------------------------------------------
def _im2col_nhwc(x, kh, kw, stride, cin):
    """x: (B, H, W, C>=cin) -> (B*OH*OW, KH*KW*cin); K ordered (KH, KW, C)."""
    B, H, W, _ = x.shape
    oh = (H - kh) // stride + 1
    ow = (W - kw) // stride + 1
    cols = []
    for i in range(kh):
        for j in range(kw):
            cols.append(
                x[:, i:i + stride * oh:stride, j:j + stride * ow:stride, :cin])
    p = jnp.concatenate(cols, axis=-1)            # (B, OH, OW, KH*KW*cin)
    return p.reshape(B * oh * ow, kh * kw * cin), oh, ow


# TODO(synk): pull patch extraction into the kernel with strided pl.ds loads
# from an NHWC VMEM tile to avoid im2col's kh*kw/stride^2 HBM duplication
# (4x for conv1/conv2, 9x for conv3).
def conv2d_relu_nhwc(x, w, b, kh, kw, stride, cin):
    """x: (B,H,W,C>=cin) bf16; w: (KH*KW*cin, Npad) bf16 -> (B,OH,OW,Npad) bf16."""
    B = x.shape[0]
    patches, oh, ow = _im2col_nhwc(x, kh, kw, stride, cin)
    y = pallas_matmul_bias_relu(patches, w, b, out_dtype=jnp.bfloat16)
    return y.reshape(B, oh, ow, w.shape[1])


# --------------------------------------------------------------------------
# Parameters (orthogonal init matching layer_init(); biases zero)
# --------------------------------------------------------------------------
def _orthogonal(key, shape, gain):
    return jax.nn.initializers.orthogonal(scale=gain)(key, shape, jnp.float32)


def _conv_weight(key, o, c, kh, kw, gain, n_pad):
    """Torch Conv2d weight (O, C, KH, KW), re-laid-out for NHWC im2col.

    Contraction axis permuted (C, KH, KW) -> (KH, KW, C); output channels
    zero-padded to n_pad lanes for lane-dense stores.
    """
    w = _orthogonal(key, (o, c * kh * kw), gain).reshape(o, c, kh, kw)
    w = w.transpose(2, 3, 1, 0).reshape(kh * kw * c, o)          # (K, O)
    if n_pad > o:
        w = jnp.pad(w, ((0, 0), (0, n_pad - o)))
    return w


def init_params(key, n_actions=18):
    ks = jax.random.split(key, 5)
    g = float(np.sqrt(2.0))
    p = {}
    # Conv2d(4, 32, 8, stride=4); 1/255 input scale folded into the weights.
    p["w1"] = (_conv_weight(ks[0], 32, 4, 8, 8, g, LANES) / 255.0).astype(jnp.bfloat16)
    p["b1"] = jnp.zeros((LANES,), jnp.float32)
    # Conv2d(32, 64, 4, stride=2)
    p["w2"] = _conv_weight(ks[1], 64, 32, 4, 4, g, LANES).astype(jnp.bfloat16)
    p["b2"] = jnp.zeros((LANES,), jnp.float32)
    # Conv2d(64, 64, 3, stride=1)
    p["w3"] = _conv_weight(ks[2], 64, 64, 3, 3, g, LANES).astype(jnp.bfloat16)
    p["b3"] = jnp.zeros((LANES,), jnp.float32)
    # Linear(64*7*7, 512): torch's nn.Flatten is (C, H, W); our features are
    # NHWC, so permute the fan-in axis once at init to (H, W, C).
    w4 = _orthogonal(ks[3], (512, 64 * 7 * 7), g).reshape(512, 64, 7, 7)
    p["w4"] = w4.transpose(0, 2, 3, 1).reshape(512, 64 * 7 * 7).T.astype(jnp.bfloat16)
    p["b4"] = jnp.zeros((512,), jnp.float32)
    # actor: Linear(512, n_actions), std=0.01
    p["w5"] = _orthogonal(ks[4], (n_actions, 512), 0.01).T.astype(jnp.bfloat16)
    p["b5"] = jnp.zeros((n_actions,), jnp.float32)
    return p


# --------------------------------------------------------------------------
# Forward pass (== CNNActor.forward -> Categorical(logits).probs)
# --------------------------------------------------------------------------
def cnn_actor_forward(params, x):
    """x: (B, 4, 84, 84) float32 in [0, 255] -> (B, n_actions) action probs."""
    B = x.shape[0]
    h = jnp.transpose(x, (0, 2, 3, 1)).astype(jnp.bfloat16)       # NCHW->NHWC once
    h = conv2d_relu_nhwc(h, params["w1"], params["b1"], 8, 8, 4, cin=4)   # (B,20,20,128)
    h = conv2d_relu_nhwc(h, params["w2"], params["b2"], 4, 4, 2, cin=32)  # (B, 9, 9,128)
    h = conv2d_relu_nhwc(h, params["w3"], params["b3"], 3, 3, 1, cin=64)  # (B, 7, 7,128)
    flat = h[..., :64].reshape(B, 64 * 7 * 7)                      # (H, W, C) order
    return pallas_actor_head(flat, params["w4"], params["b4"],
                             params["w5"], params["b5"])


if __name__ == "__main__":
    key = jax.random.PRNGKey(0)
    kx, kp = jax.random.split(key)
    B, n_actions = 2, 18
    # Input must be (B, 4, 84, 84): Linear(64*7*7, 512) pins the spatial size.
    x = jax.random.uniform(kx, (B, 4, 84, 84), jnp.float32, 0.0, 255.0)
    params = init_params(kp, n_actions=n_actions)

    probs = jax.jit(cnn_actor_forward)(params, x)
    probs = jax.block_until_ready(probs)

    probs_np = np.asarray(probs)
    assert probs_np.shape == (B, n_actions)
    assert np.isfinite(probs_np).all() and (probs_np >= 0.0).all()
    # approx reciprocal in the softmax denominator -> slightly looser tolerance
    assert np.allclose(probs_np.sum(axis=-1), 1.0, atol=1e-2)
    print("KERNEL_OK")
</pallas_src>

<mosaic_0001>
module attributes {stable_mosaic.version = 11 : i64} {
  func.func @_matmul_bias_relu_kernel(%arg0: i32, %arg1: memref<256x256xbf16, #tpu.memory_space<vmem>>, %arg2: memref<256x128xbf16, #tpu.memory_space<vmem>>, %arg3: memref<1x128xf32, #tpu.memory_space<vmem>>, %arg4: memref<256x128xbf16, #tpu.memory_space<vmem>>) attributes {dimension_semantics = [#tpu.dimension_semantics<parallel>], iteration_bounds = array<i64: 4>, scalar_prefetch = 0 : i64, scratch_operands = 0 : i64, tpu.core_type = #tpu.core_type<tc>, window_params = [{transform_indices = @transform_0, window_bounds = array<i64: 256, 256>}, {pipeline_mode = #tpu.pipeline_mode<synchronous>, transform_indices = @transform_1, window_bounds = array<i64: 256, 128>}, {pipeline_mode = #tpu.pipeline_mode<synchronous>, transform_indices = @transform_2, window_bounds = array<i64: 1, 128>}, {transform_indices = @transform_3, window_bounds = array<i64: 256, 128>}]} {
    %c0 = arith.constant 0 : index
    %c0_0 = arith.constant 0 : index
    %0 = vector.load %arg1[%c0, %c0_0] : memref<256x256xbf16, #tpu.memory_space<vmem>>, vector<256x256xbf16>
    %c0_1 = arith.constant 0 : index
    %c0_2 = arith.constant 0 : index
    %1 = vector.load %arg2[%c0_1, %c0_2] : memref<256x128xbf16, #tpu.memory_space<vmem>>, vector<256x128xbf16>
    %cst = arith.constant dense<0.000000e+00> : vector<256x128xf32>
    %2 = tpu.matmul %0, %1, %cst {dimension_numbers = #tpu.dot_dimension_numbers<[1], [0], [0], [1], [0, 0, 1, 1], [], []>} : vector<256x256xbf16>, vector<256x128xbf16>, vector<256x128xf32> -> vector<256x128xf32>
    %c0_3 = arith.constant 0 : index
    %c0_4 = arith.constant 0 : index
    %3 = vector.load %arg3[%c0_3, %c0_4] : memref<1x128xf32, #tpu.memory_space<vmem>>, vector<1x128xf32>
    %4 = vector.broadcast %3 : vector<1x128xf32> to vector<256x128xf32>
    %5 = arith.addf %2, %4 : vector<256x128xf32>
    %cst_5 = arith.constant 0.000000e+00 : f32
    %6 = vector.broadcast %cst_5 : f32 to vector<256x128xf32>
    %7 = arith.maximumf %5, %6 : vector<256x128xf32>
    %8 = arith.truncf %7 : vector<256x128xf32> to vector<256x128xbf16>
    %c0_6 = arith.constant 0 : index
    %c0_7 = arith.constant 0 : index
    %9 = vector.load %arg4[%c0_6, %c0_7] : memref<256x128xbf16, #tpu.memory_space<vmem>>, vector<256x128xbf16>
    tpu.vector_store %arg4[%c0_6, %c0_7], %8 {strides = array<i32>} : memref<256x128xbf16, #tpu.memory_space<vmem>>, vector<256x128xbf16>,
    return
  }
  func.func @transform_0(%arg0: i32) -> (i32, i32) {
    %c0_i32 = arith.constant 0 : i32
    %c0_i32_0 = arith.constant 0 : i32
    return %arg0, %c0_i32 : i32, i32
  }
  func.func @transform_1(%arg0: i32) -> (i32, i32) {
    %c0_i32 = arith.constant 0 : i32
    %c0_i32_0 = arith.constant 0 : i32
    %c0_i32_1 = arith.constant 0 : i32
    return %c0_i32, %c0_i32_0 : i32, i32
  }
  func.func @transform_2(%arg0: i32) -> (i32, i32) {
    %c0_i32 = arith.constant 0 : i32
    %c0_i32_0 = arith.constant 0 : i32
    %c0_i32_1 = arith.constant 0 : i32
    return %c0_i32, %c0_i32_0 : i32, i32
  }
  func.func @transform_3(%arg0: i32) -> (i32, i32) {
    %c0_i32 = arith.constant 0 : i32
    %c0_i32_0 = arith.constant 0 : i32
    return %arg0, %c0_i32 : i32, i32
  }
}

module attributes {stable_mosaic.version = 11 : i64} {
  func.func @_matmul_bias_relu_kernel(%arg0: i32, %arg1: memref<162x512xbf16, #tpu.memory_space<vmem>>, %arg2: memref<512x128xbf16, #tpu.memory_space<vmem>>, %arg3: memref<1x128xf32, #tpu.memory_space<vmem>>, %arg4: memref<162x128xbf16, #tpu.memory_space<vmem>>) attributes {dimension_semantics = [#tpu.dimension_semantics<parallel>], iteration_bounds = array<i64: 1>, scalar_prefetch = 0 : i64, scratch_operands = 0 : i64, tpu.core_type = #tpu.core_type<tc>, window_params = [{transform_indices = @transform_0, window_bounds = array<i64: 162, 512>}, {pipeline_mode = #tpu.pipeline_mode<synchronous>, transform_indices = @transform_1, window_bounds = array<i64: 512, 128>}, {pipeline_mode = #tpu.pipeline_mode<synchronous>, transform_indices = @transform_2, window_bounds = array<i64: 1, 128>}, {transform_indices = @transform_3, window_bounds = array<i64: 162, 128>}]} {
    %c0 = arith.constant 0 : index
    %c0_0 = arith.constant 0 : index
    %0 = vector.load %arg1[%c0, %c0_0] : memref<162x512xbf16, #tpu.memory_space<vmem>>, vector<162x512xbf16>
    %c0_1 = arith.constant 0 : index
    %c0_2 = arith.constant 0 : index
    %1 = vector.load %arg2[%c0_1, %c0_2] : memref<512x128xbf16, #tpu.memory_space<vmem>>, vector<512x128xbf16>
    %cst = arith.constant dense<0.000000e+00> : vector<162x128xf32>
    %2 = tpu.matmul %0, %1, %cst {dimension_numbers = #tpu.dot_dimension_numbers<[1], [0], [0], [1], [0, 0, 1, 1], [], []>} : vector<162x512xbf16>, vector<512x128xbf16>, vector<162x128xf32> -> vector<162x128xf32>
    %c0_3 = arith.constant 0 : index
    %c0_4 = arith.constant 0 : index
    %3 = vector.load %arg3[%c0_3, %c0_4] : memref<1x128xf32, #tpu.memory_space<vmem>>, vector<1x128xf32>
    %4 = vector.broadcast %3 : vector<1x128xf32> to vector<162x128xf32>
    %5 = arith.addf %2, %4 : vector<162x128xf32>
    %cst_5 = arith.constant 0.000000e+00 : f32
    %6 = vector.broadcast %cst_5 : f32 to vector<162x128xf32>
    %7 = arith.maximumf %5, %6 : vector<162x128xf32>
    %8 = arith.truncf %7 : vector<162x128xf32> to vector<162x128xbf16>
    %c0_6 = arith.constant 0 : index
    %c0_7 = arith.constant 0 : index
    %9 = vector.load %arg4[%c0_6, %c0_7] : memref<162x128xbf16, #tpu.memory_space<vmem>>, vector<162x128xbf16>
    tpu.vector_store %arg4[%c0_6, %c0_7], %8 {strides = array<i32>} : memref<162x128xbf16, #tpu.memory_space<vmem>>, vector<162x128xbf16>,
    return
  }
  func.func @transform_0(%arg0: i32) -> (i32, i32) {
    %c0_i32 = arith.constant 0 : i32
    %c0_i32_0 = arith.constant 0 : i32
    return %arg0, %c0_i32 : i32, i32
  }
  func.func @transform_1(%arg0: i32) -> (i32, i32) {
    %c0_i32 = arith.constant 0 : i32
    %c0_i32_0 = arith.constant 0 : i32
    %c0_i32_1 = arith.constant 0 : i32
    return %c0_i32, %c0_i32_0 : i32, i32
  }
  func.func @transform_2(%arg0: i32) -> (i32, i32) {
    %c0_i32 = arith.constant 0 : i32
    %c0_i32_0 = arith.constant 0 : i32
    %c0_i32_1 = arith.constant 0 : i32
    return %c0_i32, %c0_i32_0 : i32, i32
  }
  func.func @transform_3(%arg0: i32) -> (i32, i32) {
    %c0_i32 = arith.constant 0 : i32
    %c0_i32_0 = arith.constant 0 : i32
    return %arg0, %c0_i32 : i32, i32
  }
}

module attributes {stable_mosaic.version = 11 : i64} {
  func.func @_matmul_bias_relu_kernel(%arg0: i32, %arg1: memref<98x576xbf16, #tpu.memory_space<vmem>>, %arg2: memref<576x128xbf16, #tpu.memory_space<vmem>>, %arg3: memref<1x128xf32, #tpu.memory_space<vmem>>, %arg4: memref<98x128xbf16, #tpu.memory_space<vmem>>) attributes {dimension_semantics = [#tpu.dimension_semantics<parallel>], iteration_bounds = array<i64: 1>, scalar_prefetch = 0 : i64, scratch_operands = 0 : i64, tpu.core_type = #tpu.core_type<tc>, window_params = [{transform_indices = @transform_0, window_bounds = array<i64: 98, 576>}, {pipeline_mode = #tpu.pipeline_mode<synchronous>, transform_indices = @transform_1, window_bounds = array<i64: 576, 128>}, {pipeline_mode = #tpu.pipeline_mode<synchronous>, transform_indices = @transform_2, window_bounds = array<i64: 1, 128>}, {transform_indices = @transform_3, window_bounds = array<i64: 98, 128>}]} {
    %c0 = arith.constant 0 : index
    %c0_0 = arith.constant 0 : index
    %0 = vector.load %arg1[%c0, %c0_0] : memref<98x576xbf16, #tpu.memory_space<vmem>>, vector<98x576xbf16>
    %c0_1 = arith.constant 0 : index
    %c0_2 = arith.constant 0 : index
    %1 = vector.load %arg2[%c0_1, %c0_2] : memref<576x128xbf16, #tpu.memory_space<vmem>>, vector<576x128xbf16>
    %cst = arith.constant dense<0.000000e+00> : vector<98x128xf32>
    %2 = tpu.matmul %0, %1, %cst {dimension_numbers = #tpu.dot_dimension_numbers<[1], [0], [0], [1], [0, 0, 1, 1], [], []>} : vector<98x576xbf16>, vector<576x128xbf16>, vector<98x128xf32> -> vector<98x128xf32>
    %c0_3 = arith.constant 0 : index
    %c0_4 = arith.constant 0 : index
    %3 = vector.load %arg3[%c0_3, %c0_4] : memref<1x128xf32, #tpu.memory_space<vmem>>, vector<1x128xf32>
    %4 = vector.broadcast %3 : vector<1x128xf32> to vector<98x128xf32>
    %5 = arith.addf %2, %4 : vector<98x128xf32>
    %cst_5 = arith.constant 0.000000e+00 : f32
    %6 = vector.broadcast %cst_5 : f32 to vector<98x128xf32>
    %7 = arith.maximumf %5, %6 : vector<98x128xf32>
    %8 = arith.truncf %7 : vector<98x128xf32> to vector<98x128xbf16>
    %c0_6 = arith.constant 0 : index
    %c0_7 = arith.constant 0 : index
    %9 = vector.load %arg4[%c0_6, %c0_7] : memref<98x128xbf16, #tpu.memory_space<vmem>>, vector<98x128xbf16>
    tpu.vector_store %arg4[%c0_6, %c0_7], %8 {strides = array<i32>} : memref<98x128xbf16, #tpu.memory_space<vmem>>, vector<98x128xbf16>,
    return
  }
  func.func @transform_0(%arg0: i32) -> (i32, i32) {
    %c0_i32 = arith.constant 0 : i32
    %c0_i32_0 = arith.constant 0 : i32
    return %arg0, %c0_i32 : i32, i32
  }
  func.func @transform_1(%arg0: i32) -> (i32, i32) {
    %c0_i32 = arith.constant 0 : i32
    %c0_i32_0 = arith.constant 0 : i32
    %c0_i32_1 = arith.constant 0 : i32
    return %c0_i32, %c0_i32_0 : i32, i32
  }
  func.func @transform_2(%arg0: i32) -> (i32, i32) {
    %c0_i32 = arith.constant 0 : i32
    %c0_i32_0 = arith.constant 0 : i32
    %c0_i32_1 = arith.constant 0 : i32
    return %c0_i32, %c0_i32_0 : i32, i32
  }
  func.func @transform_3(%arg0: i32) -> (i32, i32) {
    %c0_i32 = arith.constant 0 : i32
    %c0_i32_0 = arith.constant 0 : i32
    return %arg0, %c0_i32 : i32, i32
  }
}

module attributes {stable_mosaic.version = 11 : i64} {
  func.func @_mlp_actor_head_kernel(%arg0: i32, %arg1: memref<2x3136xbf16, #tpu.memory_space<vmem>>, %arg2: memref<3136x512xbf16, #tpu.memory_space<vmem>>, %arg3: memref<1x512xf32, #tpu.memory_space<vmem>>, %arg4: memref<512x18xbf16, #tpu.memory_space<vmem>>, %arg5: memref<1x18xf32, #tpu.memory_space<vmem>>, %arg6: memref<2x18xf32, #tpu.memory_space<vmem>>) attributes {dimension_semantics = [#tpu.dimension_semantics<parallel>], iteration_bounds = array<i64: 1>, scalar_prefetch = 0 : i64, scratch_operands = 0 : i64, tpu.core_type = #tpu.core_type<tc>, window_params = [{transform_indices = @transform_0, window_bounds = array<i64: 2, 3136>}, {pipeline_mode = #tpu.pipeline_mode<synchronous>, transform_indices = @transform_1, window_bounds = array<i64: 3136, 512>}, {pipeline_mode = #tpu.pipeline_mode<synchronous>, transform_indices = @transform_2, window_bounds = array<i64: 1, 512>}, {pipeline_mode = #tpu.pipeline_mode<synchronous>, transform_indices = @transform_3, window_bounds = array<i64: 512, 18>}, {pipeline_mode = #tpu.pipeline_mode<synchronous>, transform_indices = @transform_4, window_bounds = array<i64: 1, 18>}, {transform_indices = @transform_5, window_bounds = array<i64: 2, 18>}]} {
    %c0 = arith.constant 0 : index
    %c0_0 = arith.constant 0 : index
    %0 = vector.load %arg1[%c0, %c0_0] : memref<2x3136xbf16, #tpu.memory_space<vmem>>, vector<2x3136xbf16>
    %c0_1 = arith.constant 0 : index
    %c0_2 = arith.constant 0 : index
    %1 = vector.load %arg2[%c0_1, %c0_2] : memref<3136x512xbf16, #tpu.memory_space<vmem>>, vector<3136x512xbf16>
    %cst = arith.constant dense<0.000000e+00> : vector<2x512xf32>
    %2 = tpu.matmul %0, %1, %cst {dimension_numbers = #tpu.dot_dimension_numbers<[1], [0], [0], [1], [0, 0, 1, 1], [], []>} : vector<2x3136xbf16>, vector<3136x512xbf16>, vector<2x512xf32> -> vector<2x512xf32>
    %c0_3 = arith.constant 0 : index
    %c0_4 = arith.constant 0 : index
    %3 = vector.load %arg3[%c0_3, %c0_4] : memref<1x512xf32, #tpu.memory_space<vmem>>, vector<1x512xf32>
    %4 = vector.broadcast %3 : vector<1x512xf32> to vector<2x512xf32>
    %5 = arith.addf %2, %4 : vector<2x512xf32>
    %cst_5 = arith.constant 0.000000e+00 : f32
    %6 = vector.broadcast %cst_5 : f32 to vector<2x512xf32>
    %7 = arith.maximumf %5, %6 : vector<2x512xf32>
    %8 = arith.truncf %7 : vector<2x512xf32> to vector<2x512xbf16>
    %c0_6 = arith.constant 0 : index
    %c0_7 = arith.constant 0 : index
    %9 = vector.load %arg4[%c0_6, %c0_7] : memref<512x18xbf16, #tpu.memory_space<vmem>>, vector<512x18xbf16>
    %cst_8 = arith.constant dense<0.000000e+00> : vector<2x18xf32>
    %10 = tpu.matmul %8, %9, %cst_8 {dimension_numbers = #tpu.dot_dimension_numbers<[1], [0], [0], [1], [0, 0, 1, 1], [], []>} : vector<2x512xbf16>, vector<512x18xbf16>, vector<2x18xf32> -> vector<2x18xf32>
    %c0_9 = arith.constant 0 : index
    %c0_10 = arith.constant 0 : index
    %11 = vector.load %arg5[%c0_9, %c0_10] : memref<1x18xf32, #tpu.memory_space<vmem>>, vector<1x18xf32>
    %12 = vector.broadcast %11 : vector<1x18xf32> to vector<2x18xf32>
    %13 = arith.addf %10, %12 : vector<2x18xf32>
    %cst_11 = arith.constant dense<0xFF800000> : vector<2xf32>
    %14 = vector.multi_reduction <maximumf>, %13, %cst_11 [1] : vector<2x18xf32> to vector<2xf32>
    %15 = vector.shape_cast %14 : vector<2xf32> to vector<2x1xf32>
    %16 = vector.broadcast %15 : vector<2x1xf32> to vector<2x18xf32>
    %17 = arith.subf %13, %16 : vector<2x18xf32>
    %18 = math.exp %17 : vector<2x18xf32>
    %cst_12 = arith.constant dense<0.000000e+00> : vector<2xf32>
    %19 = vector.multi_reduction <add>, %18, %cst_12 [1] : vector<2x18xf32> to vector<2xf32>
    %20 = vector.shape_cast %19 : vector<2xf32> to vector<2x1xf32>
    %21 = tpu.reciprocal %20 {approx = true} : vector<2x1xf32> -> vector<2x1xf32>
    %22 = vector.broadcast %21 : vector<2x1xf32> to vector<2x18xf32>
    %23 = arith.mulf %18, %22 : vector<2x18xf32>
    %c0_13 = arith.constant 0 : index
    %c0_14 = arith.constant 0 : index
    %24 = vector.load %arg6[%c0_13, %c0_14] : memref<2x18xf32, #tpu.memory_space<vmem>>, vector<2x18xf32>
    tpu.vector_store %arg6[%c0_13, %c0_14], %23 {strides = array<i32>} : memref<2x18xf32, #tpu.memory_space<vmem>>, vector<2x18xf32>,
    return
  }
  func.func @transform_0(%arg0: i32) -> (i32, i32) {
    %c0_i32 = arith.constant 0 : i32
    %c0_i32_0 = arith.constant 0 : i32
    return %arg0, %c0_i32 : i32, i32
  }
  func.func @transform_1(%arg0: i32) -> (i32, i32) {
    %c0_i32 = arith.constant 0 : i32
    %c0_i32_0 = arith.constant 0 : i32
    %c0_i32_1 = arith.constant 0 : i32
    return %c0_i32, %c0_i32_0 : i32, i32
  }
  func.func @transform_2(%arg0: i32) -> (i32, i32) {
    %c0_i32 = arith.constant 0 : i32
    %c0_i32_0 = arith.constant 0 : i32
    %c0_i32_1 = arith.constant 0 : i32
    return %c0_i32, %c0_i32_0 : i32, i32
  }
  func.func @transform_3(%arg0: i32) -> (i32, i32) {
    %c0_i32 = arith.constant 0 : i32
    %c0_i32_0 = arith.constant 0 : i32
    %c0_i32_1 = arith.constant 0 : i32
    return %c0_i32, %c0_i32_0 : i32, i32
  }
  func.func @transform_4(%arg0: i32) -> (i32, i32) {
    %c0_i32 = arith.constant 0 : i32
    %c0_i32_0 = arith.constant 0 : i32
    %c0_i32_1 = arith.constant 0 : i32
    return %c0_i32, %c0_i32_0 : i32, i32
  }
  func.func @transform_5(%arg0: i32) -> (i32, i32) {
    %c0_i32 = arith.constant 0 : i32
    %c0_i32_0 = arith.constant 0 : i32
    return %arg0, %c0_i32 : i32, i32
  }
}

</mosaic_0001>

<bundles_post_ra>
// kernel: cnn_actor_forward.4
= control target key start
LH: loop header
LB: loop body
LE: loop exit
PB: predicated region body
PF: predicated region fallthrough
CT: control target
= control target key end

     0   :  { %s1844_s12 = smov 0   ;;  %s1846_s13 = smov 0   ;;  %s2154_s0 = inlined_call_operand.vmem [shape: bf16[800,256], index: 0, kind: input, shape index: {}]   ;;  %s2155_s1 = inlined_call_operand.vmem [shape: bf16[256,128], index: 1, kind: input, shape index: {}]   ;;  %s2156_s2 = inlined_call_operand.vmem [shape: f32[1,128], index: 2, kind: input, shape index: {}]   ;;  %s2157_s3 = inlined_call_operand.vmem [shape: bf16[800,128], index: 3, kind: output, shape index: {}]  }
   0x1   :  { %s1848_s14 = smov 0  }
   0x2 LB: > { %s1857_s15 = sadd.s32 4294967295, %s1790_s14   ;;  %s1859_s16 = sadd.s32 1, %s1790_s14   ;;  %s1790_s14 = sphi %s1848_s14, %s2164_s14   ;;  %s1786_s13 = sphi %s1846_s13, %s2163_s13   ;;  %s1782_s12 = sphi %s1844_s12, %s2162_s12  }
   0x3   : > { %s85_s17 = ssub.s32 %s1790_s14, %s1859_s16  ;;  %s88_s18 = sadd.s32 1, %s1786_s13 }
   0x4   : > { %p86_p0 = scmp.eq.s32.totalorder %s85_s17, 0  ;;  %p98_p1 = scmp.ne.s32.totalorder %s1786_s13, %s1782_s12 }
   0x5   : > { %p99_p2 = scmp.eq.s32.totalorder %s1857_s15, 3  ;;  %p1222_p3 = scmp.ge.s32.totalorder %s1790_s14, 1 }
   0x6   : > { %s1867_s19 = scalar_select %p86_p0, %s1786_s13, %s88_s18  }
   0x7   : > { %p1869_p4 = por %p99_p2, %p98_p1  ;;  %p149_p5 = scmp.lt.s32.totalorder %s1790_s14, 5 }
   0x9   : > { %p150_p6 = pnand %p1222_p3, %p149_p5 }
   0xa   : > { %v1672_v0 = vld [vmem:[%s2155_s1 + $0x40] sm:$0xff] (!%p150_p6)   ;;  %s1877_s23 = sshll.u32 (!%p150_p6), %s1857_s15, 5  ;;  %v1674_v2 = vld [vmem:[%s2155_s1 + $0x48] sm:$0xff] (!%p150_p6)   ;;  %v1676_v4 = vld [vmem:[%s2155_s1 + $0x50] sm:$0xff] (!%p150_p6)   ;;  %s175_s18 = sand.u32 (!%p150_p6), 1, %s1782_s12  }
   0xb   : > { %153 = sbr.rel (%p150_p6) target bundleno = 394 (0x18a), region = 32  ;;  %v1673_v1 = vld [vmem:[%s2155_s1] sm:$0xff] (!%p150_p6)   ;;  %1456 = vmatprep.subr.bf16.mxu0 (!%p150_p6), %v1672_v0  ;;  %1568 = vmatprep.subr.bf16.mxu1 (!%p150_p6), %v1672_v0  ;;  %v1675_v3 = vld [vmem:[%s2155_s1 + $0x8] sm:$0xff] (!%p150_p6)   ;;  %p184_p7 = scmp.lt.s32.totalorder (!%p150_p6), %s1877_s23, 99  ;;  %v1677_v5 = vld [vmem:[%s2155_s1 + $0x10] sm:$0xff] (!%p150_p6)  }
   0xc   : > { %1457 = vmatpush3.bf16.msra.mxu0 (!%p150_p6), %v1673_v1  ;;  %1576 = vmatpush3.bf16.msra.mxu1 (!%p150_p6), %v1673_v1  ;;  %v1678_v6 = vld [vmem:[%s2155_s1 + $0x58] sm:$0xff] (!%p150_p6)   ;;  %v1680_v8 = vld [vmem:[%s2155_s1 + $0x60] sm:$0xff] (!%p150_p6)   ;;  %v1682_v10 = vld [vmem:[%s2155_s1 + $0x68] sm:$0xff] (!%p150_p6)   ;;  %s1223_s21 = sshll.u32 (!%p150_p6), %s175_s18, 7 }
   0xd   : > { %1458 = vmatprep.subr.bf16.mxu0 (!%p150_p6), %v1674_v2  ;;  %1569 = vmatprep.subr.bf16.mxu1 (!%p150_p6), %v1674_v2  ;;  %v1679_v7 = vld [vmem:[%s2155_s1 + $0x18] sm:$0xff] (!%p150_p6)   ;;  %v1681_v9 = vld [vmem:[%s2155_s1 + $0x20] sm:$0xff] (!%p150_p6)   ;;  %v1683_v13 = vld [vmem:[%s2155_s1 + $0x28] sm:$0xff] (!%p150_p6)   ;;  %s1973_s12 = scalar_lea.vmem (!%p150_p6), [#allocation2], %s1223_s21  }
   0xe   : > { %v1684_v14 = vld [vmem:[%s2155_s1 + $0x70] sm:$0xff] (!%p150_p6)   ;;  %v1686_v16 = vld [vmem:[%s2155_s1 + $0x78] sm:$0xff] (!%p150_p6)   ;;  %v1966_v50 = vld [vmem:[%s2156_s2] ss:$0 sm:$0xff] (!%p150_p6) }
   0xf   : > { %v1685_v15 = vld [vmem:[%s2155_s1 + $0x30] sm:$0xff] (!%p150_p6)   ;;  %v1687_v17 = vld [vmem:[%s2155_s1 + $0x38] sm:$0xff] (!%p150_p6)  }
  0x10   : > { %1459 = vmatpush3.bf16.msra.mxu0 (!%p150_p6), %v1675_v3  ;;  %1577 = vmatpush3.bf16.msra.mxu1 (!%p150_p6), %v1675_v3 }
  0x11   : > { %1460 = vmatprep.subr.bf16.mxu0 (!%p150_p6), %v1676_v4  ;;  %1570 = vmatprep.subr.bf16.mxu1 (!%p150_p6), %v1676_v4 }
  0x12   : > { %s185_s7 = scalar_select %p184_p7, %s1877_s23, 99 }
  0x13   : > { %s889_s22 = ssub.s32 (%p1869_p4), 100, %s1877_s23 }
  0x14   : > { %1461 = vmatpush3.bf16.msra.mxu0 %v1677_v5  ;;  %1578 = vmatpush3.bf16.msra.mxu1 %v1677_v5  ;;  %s1325_s14 = sshll.u32 %s185_s7, 3  ;;  %p890_p8 = scmp.lt.s32.totalorder (%p1869_p4), %s889_s22, 32 }
  0x15   : > { %1462 = vmatprep.subr.bf16.mxu0 %v1678_v6  ;;  %1571 = vmatprep.subr.bf16.mxu1 %v1678_v6  ;;  %s1908_s24 = scalar_lea.vmem %s2154_s0, %s1325_s14 }
  0x16   : > { %v1690_v11 = vld [vmem:[%s1908_s24 + $0x4] ss:$8 sps:$4 sm:$0xff]   ;;  %v1688_v18 = vld [vmem:[%s1908_s24] ss:$8 sps:$4 sm:$0xff]   ;;  %v1694_v20 = vld [vmem:[%s1908_s24 + $0x14] ss:$8 sps:$4 sm:$0xff]  }
  0x17   : > { %v1693_v12 = vld [vmem:[%s1908_s24 + $0x84] ss:$8 sps:$4 sm:$0xff]   ;;  %560 = vmatprep.mubr.bf16.mxu0 %v1690_v11  ;;  %v1691_v19 = vld [vmem:[%s1908_s24 + $0x80] ss:$8 sps:$4 sm:$0xff]   ;;  %v1696_v21 = vld [vmem:[%s1908_s24 + $0x94] ss:$8 sps:$4 sm:$0xff]  }
  0x18   : > { %1463 = vmatpush3.bf16.msra.mxu0 %v1679_v7  ;;  %1579 = vmatpush3.bf16.msra.mxu1 %v1679_v7  ;;  %v1698_v22 = vld [vmem:[%s1908_s24 + $0x10] ss:$8 sps:$4 sm:$0xff]   ;;  %v1700_v24 = vld [vmem:[%s1908_s24 + $0x24] ss:$8 sps:$4 sm:$0xff]   ;;  %v1704_v26 = vld [vmem:[%s1908_s24 + $0x20] ss:$8 sps:$4 sm:$0xff]  }
  0x19   : > { %1464 = vmatprep.subr.bf16.mxu0 %v1680_v8  ;;  %1572 = vmatprep.subr.bf16.mxu1 %v1680_v8  ;;  %v1699_v23 = vld [vmem:[%s1908_s24 + $0x90] ss:$8 sps:$4 sm:$0xff]   ;;  %v1702_v25 = vld [vmem:[%s1908_s24 + $0xa4] ss:$8 sps:$4 sm:$0xff]   ;;  %v1705_v27 = vld [vmem:[%s1908_s24 + $0xa0] ss:$8 sps:$4 sm:$0xff]  }
  0x1a   : > { %624 = vmatprep.mubr.bf16.mxu1 %v1693_v12  ;;  %v1706_v28 = vld [vmem:[%s1908_s24 + $0x34] ss:$8 sps:$4 sm:$0xff]   ;;  %v1710_v30 = vld [vmem:[%s1908_s24 + $0x30] ss:$8 sps:$4 sm:$0xff]   ;;  %v1712_v32 = vld [vmem:[%s1908_s24 + $0x44] ss:$8 sps:$4 sm:$0xff]  }
  0x1b   : > { %v1708_v29 = vld [vmem:[%s1908_s24 + $0xb4] ss:$8 sps:$4 sm:$0xff]   ;;  %v1711_v31 = vld [vmem:[%s1908_s24 + $0xb0] ss:$8 sps:$4 sm:$0xff]   ;;  %v1714_v33 = vld [vmem:[%s1908_s24 + $0xc4] ss:$8 sps:$4 sm:$0xff]  }
  0x1c   : > { %1465 = vmatpush3.bf16.msra.mxu0 %v1681_v9  ;;  %1580 = vmatpush3.bf16.msra.mxu1 %v1681_v9  ;;  %v1716_v34 = vld [vmem:[%s1908_s24 + $0x40] ss:$8 sps:$4 sm:$0xff]   ;;  %v1718_v36 = vld [vmem:[%s1908_s24 + $0x54] ss:$8 sps:$4 sm:$0xff]   ;;  %v1722_v38 = vld [vmem:[%s1908_s24 + $0x50] ss:$8 sps:$4 sm:$0xff]  }
  0x1d   : > { %1466 = vmatprep.subr.bf16.mxu0 %v1682_v10  ;;  %1573 = vmatprep.subr.bf16.mxu1 %v1682_v10  ;;  %v1717_v35 = vld [vmem:[%s1908_s24 + $0xc0] ss:$8 sps:$4 sm:$0xff]   ;;  %v1720_v37 = vld [vmem:[%s1908_s24 + $0xd4] ss:$8 sps:$4 sm:$0xff]   ;;  %v1723_v39 = vld [vmem:[%s1908_s24 + $0xd0] ss:$8 sps:$4 sm:$0xff]  }
  0x1e   : > { %v1724_v40 = vld [vmem:[%s1908_s24 + $0x64] ss:$8 sps:$4 sm:$0xff]   ;;  %v1728_v42 = vld [vmem:[%s1908_s24 + $0x60] ss:$8 sps:$4 sm:$0xff]   ;;  %v1730_v44 = vld [vmem:[%s1908_s24 + $0x74] ss:$8 sps:$4 sm:$0xff]  }
  0x1f   : > { %v1726_v41 = vld [vmem:[%s1908_s24 + $0xe4] ss:$8 sps:$4 sm:$0xff]   ;;  %v1729_v43 = vld [vmem:[%s1908_s24 + $0xe0] ss:$8 sps:$4 sm:$0xff]   ;;  %v1732_v45 = vld [vmem:[%s1908_s24 + $0xf4] ss:$8 sps:$4 sm:$0xff]  }
  0x20   : > { %1467 = vmatpush3.bf16.msra.mxu0 %v1683_v13  ;;  %1581 = vmatpush3.bf16.msra.mxu1 %v1683_v13  ;;  %v1734_v46 = vld [vmem:[%s1908_s24 + $0x70] ss:$8 sps:$4 sm:$0xff]  }
  0x21   : > { %1468 = vmatprep.subr.bf16.mxu0 %v1684_v14  ;;  %1574 = vmatprep.subr.bf16.mxu1 %v1684_v14  ;;  %v1735_v47 = vld [vmem:[%s1908_s24 + $0xf0] ss:$8 sps:$4 sm:$0xff]   ;;  %s1358_s24 = sshll.u32 (%p1869_p4), %s1857_s15, 7 }
  0x22   : > { %s2026_s27 = scalar_lea.vmem (%p1869_p4), %s2157_s3, %s1358_s24  }
  0x24   : > { %1469 = vmatpush3.bf16.msra.mxu0 %v1685_v15  ;;  %1582 = vmatpush3.bf16.msra.mxu1 %v1685_v15 }
  0x25   : > { %1470 = vmatprep.subr.bf16.mxu0 %v1686_v16  ;;  %1575 = vmatprep.subr.bf16.mxu1 %v1686_v16 }
  0x28   : > { %1471 = vmatpush3.bf16.msra.mxu0 %v1687_v17  ;;  %1583 = vmatpush3.bf16.msra.mxu1 %v1687_v17 }
  0x2b   : > { %561 = vmatmul.mubr.bf16.vlgmr.msra.gmra.mrb[0].mxu0 %v1688_v18  ;;  %625 = vmatmul.mubr.bf16.vlgmr.msra.gmra.mrb[0].mxu1 %v1691_v19 }
  0x2c   : > { %568 = vmatprep.mubr.bf16.mxu0 %v1694_v20  ;;  %632 = vmatprep.mubr.bf16.mxu1 %v1696_v21 }
  0x33   : > { %569 = vmatmul.mubr.bf16.gmra.mrb[4].mxu0 %v1698_v22  ;;  %633 = vmatmul.mubr.bf16.gmra.mrb[4].mxu1 %v1699_v23 }
  0x34   : > { %576 = vmatprep.mubr.bf16.mxu0 %v1700_v24  ;;  %640 = vmatprep.mubr.bf16.mxu1 %v1702_v25 }
  0x3b   : > { %577 = vmatmul.mubr.bf16.gmra.mrb[8].mxu0 %v1704_v26  ;;  %641 = vmatmul.mubr.bf16.gmra.mrb[8].mxu1 %v1705_v27 }
  0x3c   : > { %584 = vmatprep.mubr.bf16.mxu0 %v1706_v28  ;;  %648 = vmatprep.mubr.bf16.mxu1 %v1708_v29 }
  0x43   : > { %585 = vmatmul.mubr.bf16.gmra.mrb[12].mxu0 %v1710_v30  ;;  %649 = vmatmul.mubr.bf16.gmra.mrb[12].mxu1 %v1711_v31 }
  0x44   : > { %592 = vmatprep.mubr.bf16.mxu0 %v1712_v32  ;;  %656 = vmatprep.mubr.bf16.mxu1 %v1714_v33 }
  0x4b   : > { %593 = vmatmul.mubr.bf16.gmra.mrb[16].mxu0 %v1716_v34  ;;  %657 = vmatmul.mubr.bf16.gmra.mrb[16].mxu1 %v1717_v35 }
  0x4c   : > { %600 = vmatprep.mubr.bf16.mxu0 %v1718_v36  ;;  %664 = vmatprep.mubr.bf16.mxu1 %v1720_v37 }
  0x53   : > { %601 = vmatmul.mubr.bf16.gmra.mrb[20].mxu0 %v1722_v38  ;;  %665 = vmatmul.mubr.bf16.gmra.mrb[20].mxu1 %v1723_v39 }
  0x54   : > { %608 = vmatprep.mubr.bf16.mxu0 %v1724_v40  ;;  %672 = vmatprep.mubr.bf16.mxu1 %v1726_v41 }
  0x5b   : > { %609 = vmatmul.mubr.bf16.gmra.mrb[24].mxu0 %v1728_v42  ;;  %673 = vmatmul.mubr.bf16.gmra.mrb[24].mxu1 %v1729_v43 }
  0x5c   : > { %616 = vmatprep.mubr.bf16.mxu0 %v1730_v44  ;;  %680 = vmatprep.mubr.bf16.mxu1 %v1732_v45 }
  0x63   : > { %617 = vmatmul.mubr.bf16.gmra.mrb[28].mxu0 %v1734_v46  ;;  %681 = vmatmul.mubr.bf16.gmra.mrb[28].mxu1 %v1735_v47 }
  0xfe   : > { %v1472_v48 = vpop.f32.mrb[0].mxu0  ;;  %v1520_v49 = vpop.f32.mrb[0].mxu1 }
  0xff   : > { %v1473_v51 = vpop.f32.mrb[1].mxu0  ;;  %v1521_v52 = vpop.f32.mrb[1].mxu1 }
 0x100   : > { %v1474_v53 = vadd.f32 %v1473_v51, %v1472_v48  ;;  %v1522_v54 = vadd.f32 %v1521_v52, %v1520_v49  ;;  %v1475_v55 = vpop.f32.mrb[2].mxu0  ;;  %v1523_v56 = vpop.f32.mrb[2].mxu1 }
 0x101   : > { %v1476_v57 = vpop.f32.mrb[3].mxu0  ;;  %v1524_v58 = vpop.f32.mrb[3].mxu1 }
 0x102   : > { %v563_v59 = vadd.f32 %v1474_v53, %v1966_v50  ;;  %v627_v60 = vadd.f32 %v1522_v54, %v1966_v50  ;;  %v1477_v61 = vadd.f32 %v1476_v57, %v1475_v55  ;;  %v1525_v62 = vadd.f32 %v1524_v58, %v1523_v56 }
 0x104   : > { %v566_v63 = vadd.f32 %v1477_v61, %v1966_v50  ;;  %v630_v0 = vadd.f32 %v1525_v62, %v1966_v50  ;;  %v689_v1 = vmax.f32 %v563_v59, 0.0  ;;  %v705_v2 = vmax.f32 %v627_v60, 0.0 }
 0x106   : > { %v690_v3 = vmax.f32 %v566_v63, 0.0  ;;  %v706_v4 = vmax.f32 %v630_v0, 0.0  ;;  %v1478_v5 = vpop.f32.mrb[4].mxu0  ;;  %v1526_v6 = vpop.f32.mrb[4].mxu1 }
 0x107   : > { %v1479_v7 = vpop.f32.mrb[5].mxu0  ;;  %v1527_v8 = vpop.f32.mrb[5].mxu1 }
 0x108   : > { %v1364_v9 = vpack.c.bf16 %v690_v3, %v689_v1  ;;  %v1404_v10 = vpack.c.bf16 %v706_v4, %v705_v2  ;;  %v1480_v11 = vadd.f32 %v1479_v7, %v1478_v5  ;;  %v1528_v12 = vadd.f32 %v1527_v8, %v1526_v6  ;;  %v1481_v13 = vpop.f32.mrb[6].mxu0  ;;  %v1529_v14 = vpop.f32.mrb[6].mxu1 }
 0x109   : > { %v1482_v15 = vpop.f32.mrb[7].mxu0  ;;  %v1530_v16 = vpop.f32.mrb[7].mxu1 }
 0x10a   : > { %1365 = vst [vmem:[%s1973_s12] sm:$0xff] %v1364_v9   ;;  %1448 = vst [vmem:[%s1973_s12 + $0x40] sm:$0xff] %v1404_v10   ;;  %v571_v17 = vadd.f32 %v1480_v11, %v1966_v50  ;;  %v635_v18 = vadd.f32 %v1528_v12, %v1966_v50  ;;  %v1483_v19 = vadd.f32 %v1482_v15, %v1481_v13 }
 0x10b   : > { %v1531_v20 = vadd.f32 %v1530_v16, %v1529_v14 }
 0x10c   : > { %v574_v21 = vadd.f32 %v1483_v19, %v1966_v50  ;;  %v691_v23 = vmax.f32 %v571_v17, 0.0  ;;  %v707_v24 = vmax.f32 %v635_v18, 0.0 }
 0x10d   : > { %v638_v22 = vadd.f32 %v1531_v20, %v1966_v50 }
 0x10e   : > { %v692_v25 = vmax.f32 %v574_v21, 0.0  ;;  %v1484_v27 = vpop.f32.mrb[8].mxu0  ;;  %v1532_v28 = vpop.f32.mrb[8].mxu1 }
 0x10f   : > { %v708_v26 = vmax.f32 %v638_v22, 0.0  ;;  %v1485_v29 = vpop.f32.mrb[9].mxu0  ;;  %v1533_v30 = vpop.f32.mrb[9].mxu1 }
 0x110   : > { %v1369_v31 = vpack.c.bf16 %v692_v25, %v691_v23  ;;  %v1486_v33 = vadd.f32 %v1485_v29, %v1484_v27  ;;  %v1534_v34 = vadd.f32 %v1533_v30, %v1532_v28  ;;  %v1487_v35 = vpop.f32.mrb[10].mxu0  ;;  %v1535_v36 = vpop.f32.mrb[10].mxu1 }
 0x111   : > { %v1409_v32 = vpack.c.bf16 %v708_v26, %v707_v24  ;;  %v1488_v37 = vpop.f32.mrb[11].mxu0  ;;  %v1536_v38 = vpop.f32.mrb[11].mxu1 }
 0x112   : > { %1441 = vst [vmem:[%s1973_s12 + $0x8] sm:$0xff] %v1369_v31   ;;  %v579_v39 = vadd.f32 %v1486_v33, %v1966_v50  ;;  %v643_v40 = vadd.f32 %v1534_v34, %v1966_v50  ;;  %v1489_v41 = vadd.f32 %v1488_v37, %v1487_v35  ;;  %v1537_v42 = vadd.f32 %v1536_v38, %v1535_v36 }
 0x113   : > { %1449 = vst [vmem:[%s1973_s12 + $0x48] sm:$0xff] %v1409_v32  }
 0x114   : > { %v582_v43 = vadd.f32 %v1489_v41, %v1966_v50  ;;  %v646_v44 = vadd.f32 %v1537_v42, %v1966_v50  ;;  %v693_v45 = vmax.f32 %v579_v39, 0.0  ;;  %v709_v46 = vmax.f32 %v643_v40, 0.0 }
 0x116   : > { %v694_v47 = vmax.f32 %v582_v43, 0.0  ;;  %v710_v48 = vmax.f32 %v646_v44, 0.0  ;;  %v1490_v49 = vpop.f32.mrb[12].mxu0  ;;  %v1538_v51 = vpop.f32.mrb[12].mxu1 }
 0x117   : > { %v1491_v52 = vpop.f32.mrb[13].mxu0  ;;  %v1539_v53 = vpop.f32.mrb[13].mxu1 }
 0x118   : > { %v1374_v54 = vpack.c.bf16 %v694_v47, %v693_v45  ;;  %v1414_v55 = vpack.c.bf16 %v710_v48, %v709_v46  ;;  %v1492_v56 = vadd.f32 %v1491_v52, %v1490_v49  ;;  %v1540_v57 = vadd.f32 %v1539_v53, %v1538_v51  ;;  %v1493_v58 = vpop.f32.mrb[14].mxu0  ;;  %v1541_v59 = vpop.f32.mrb[14].mxu1 }
 0x119   : > { %v1494_v60 = vpop.f32.mrb[15].mxu0  ;;  %v1542_v61 = vpop.f32.mrb[15].mxu1 }
 0x11a   : > { %1442 = vst [vmem:[%s1973_s12 + $0x10] sm:$0xff] %v1374_v54   ;;  %1450 = vst [vmem:[%s1973_s12 + $0x50] sm:$0xff] %v1414_v55   ;;  %v587_v62 = vadd.f32 %v1492_v56, %v1966_v50  ;;  %v651_v63 = vadd.f32 %v1540_v57, %v1966_v50  ;;  %v1495_v0 = vadd.f32 %v1494_v60, %v1493_v58 }
 0x11b   : > { %v1543_v1 = vadd.f32 %v1542_v61, %v1541_v59 }
 0x11c   : > { %v590_v2 = vadd.f32 %v1495_v0, %v1966_v50  ;;  %v695_v4 = vmax.f32 %v587_v62, 0.0  ;;  %v711_v5 = vmax.f32 %v651_v63, 0.0 }
 0x11d   : > { %v654_v3 = vadd.f32 %v1543_v1, %v1966_v50 }
 0x11e   : > { %v696_v6 = vmax.f32 %v590_v2, 0.0  ;;  %v1496_v8 = vpop.f32.mrb[16].mxu0  ;;  %v1544_v9 = vpop.f32.mrb[16].mxu1 }
 0x11f   : > { %v712_v7 = vmax.f32 %v654_v3, 0.0  ;;  %v1497_v10 = vpop.f32.mrb[17].mxu0  ;;  %v1545_v11 = vpop.f32.mrb[17].mxu1 }
 0x120   : > { %v1379_v12 = vpack.c.bf16 %v696_v6, %v695_v4  ;;  %v1498_v14 = vadd.f32 %v1497_v10, %v1496_v8  ;;  %v1546_v15 = vadd.f32 %v1545_v11, %v1544_v9  ;;  %v1499_v16 = vpop.f32.mrb[18].mxu0  ;;  %v1547_v17 = vpop.f32.mrb[18].mxu1 }
 0x121   : > { %v1419_v13 = vpack.c.bf16 %v712_v7, %v711_v5  ;;  %v1500_v18 = vpop.f32.mrb[19].mxu0  ;;  %v1548_v19 = vpop.f32.mrb[19].mxu1 }
 0x122   : > { %1443 = vst [vmem:[%s1973_s12 + $0x18] sm:$0xff] %v1379_v12   ;;  %v595_v20 = vadd.f32 %v1498_v14, %v1966_v50  ;;  %v659_v21 = vadd.f32 %v1546_v15, %v1966_v50  ;;  %v1501_v22 = vadd.f32 %v1500_v18, %v1499_v16  ;;  %v1549_v23 = vadd.f32 %v1548_v19, %v1547_v17 }
 0x123   : > { %1451 = vst [vmem:[%s1973_s12 + $0x58] sm:$0xff] %v1419_v13  }
 0x124   : > { %v598_v24 = vadd.f32 %v1501_v22, %v1966_v50  ;;  %v662_v25 = vadd.f32 %v1549_v23, %v1966_v50  ;;  %v697_v26 = vmax.f32 %v595_v20, 0.0  ;;  %v713_v27 = vmax.f32 %v659_v21, 0.0 }
 0x126   : > { %v698_v28 = vmax.f32 %v598_v24, 0.0  ;;  %v714_v29 = vmax.f32 %v662_v25, 0.0  ;;  %v1502_v30 = vpop.f32.mrb[20].mxu0  ;;  %v1550_v31 = vpop.f32.mrb[20].mxu1 }
 0x127   : > { %v1503_v32 = vpop.f32.mrb[21].mxu0  ;;  %v1551_v33 = vpop.f32.mrb[21].mxu1 }
 0x128   : > { %v1384_v34 = vpack.c.bf16 %v698_v28, %v697_v26  ;;  %v1424_v35 = vpack.c.bf16 %v714_v29, %v713_v27  ;;  %v1504_v36 = vadd.f32 %v1503_v32, %v1502_v30  ;;  %v1552_v37 = vadd.f32 %v1551_v33, %v1550_v31  ;;  %v1505_v38 = vpop.f32.mrb[22].mxu0  ;;  %v1553_v39 = vpop.f32.mrb[22].mxu1 }
 0x129   : > { %v1506_v40 = vpop.f32.mrb[23].mxu0  ;;  %v1554_v41 = vpop.f32.mrb[23].mxu1 }
 0x12a   : > { %1444 = vst [vmem:[%s1973_s12 + $0x20] sm:$0xff] %v1384_v34   ;;  %1452 = vst [vmem:[%s1973_s12 + $0x60] sm:$0xff] %v1424_v35   ;;  %v603_v42 = vadd.f32 %v1504_v36, %v1966_v50  ;;  %v667_v43 = vadd.f32 %v1552_v37, %v1966_v50  ;;  %v1507_v44 = vadd.f32 %v1506_v40, %v1505_v38 }
 0x12b   : > { %v1555_v45 = vadd.f32 %v1554_v41, %v1553_v39 }
 0x12c   : > { %v606_v46 = vadd.f32 %v1507_v44, %v1966_v50  ;;  %v699_v48 = vmax.f32 %v603_v42, 0.0  ;;  %v715_v49 = vmax.f32 %v667_v43, 0.0 }
 0x12d   : > { %v670_v47 = vadd.f32 %v1555_v45, %v1966_v50 }
 0x12e   : > { %v700_v51 = vmax.f32 %v606_v46, 0.0  ;;  %v1508_v53 = vpop.f32.mrb[24].mxu0  ;;  %v1556_v54 = vpop.f32.mrb[24].mxu1 }
 0x12f   : > { %v716_v52 = vmax.f32 %v670_v47, 0.0  ;;  %v1509_v55 = vpop.f32.mrb[25].mxu0  ;;  %v1557_v56 = vpop.f32.mrb[25].mxu1 }
 0x130   : > { %v1389_v57 = vpack.c.bf16 %v700_v51, %v699_v48  ;;  %v1510_v59 = vadd.f32 %v1509_v55, %v1508_v53  ;;  %v1558_v60 = vadd.f32 %v1557_v56, %v1556_v54  ;;  %v1511_v61 = vpop.f32.mrb[26].mxu0  ;;  %v1559_v62 = vpop.f32.mrb[26].mxu1 }
 0x131   : > { %v1429_v58 = vpack.c.bf16 %v716_v52, %v715_v49  ;;  %v1512_v63 = vpop.f32.mrb[27].mxu0  ;;  %v1560_v0 = vpop.f32.mrb[27].mxu1 }
 0x132   : > { %1445 = vst [vmem:[%s1973_s12 + $0x28] sm:$0xff] %v1389_v57   ;;  %v611_v1 = vadd.f32 %v1510_v59, %v1966_v50  ;;  %v675_v2 = vadd.f32 %v1558_v60, %v1966_v50  ;;  %v1513_v3 = vadd.f32 %v1512_v63, %v1511_v61  ;;  %v1561_v4 = vadd.f32 %v1560_v0, %v1559_v62 }
 0x133   : > { %1453 = vst [vmem:[%s1973_s12 + $0x68] sm:$0xff] %v1429_v58  }
 0x134   : > { %v614_v5 = vadd.f32 %v1513_v3, %v1966_v50  ;;  %v678_v6 = vadd.f32 %v1561_v4, %v1966_v50  ;;  %v701_v7 = vmax.f32 %v611_v1, 0.0  ;;  %v717_v8 = vmax.f32 %v675_v2, 0.0 }
 0x136   : > { %v702_v9 = vmax.f32 %v614_v5, 0.0  ;;  %v718_v10 = vmax.f32 %v678_v6, 0.0  ;;  %v1514_v11 = vpop.f32.mrb[28].mxu0  ;;  %v1562_v12 = vpop.f32.mrb[28].mxu1 }
 0x137   : > { %v1515_v13 = vpop.f32.mrb[29].mxu0  ;;  %v1563_v14 = vpop.f32.mrb[29].mxu1 }
 0x138   : > { %v1394_v15 = vpack.c.bf16 %v702_v9, %v701_v7  ;;  %v1434_v16 = vpack.c.bf16 %v718_v10, %v717_v8  ;;  %v1516_v17 = vadd.f32 %v1515_v13, %v1514_v11  ;;  %v1564_v18 = vadd.f32 %v1563_v14, %v1562_v12  ;;  %v1517_v19 = vpop.f32.mrb[30].mxu0  ;;  %v1565_v20 = vpop.f32.mrb[30].mxu1 }
 0x139   : > { %v1518_v21 = vpop.f32.mrb[31].mxu0  ;;  %v1566_v22 = vpop.f32.mrb[31].mxu1 }
 0x13a   : > { %1446 = vst [vmem:[%s1973_s12 + $0x30] sm:$0xff] %v1394_v15   ;;  %1454 = vst [vmem:[%s1973_s12 + $0x70] sm:$0xff] %v1434_v16   ;;  %v619_v23 = vadd.f32 %v1516_v17, %v1966_v50  ;;  %v683_v24 = vadd.f32 %v1564_v18, %v1966_v50  ;;  %v1519_v25 = vadd.f32 %v1518_v21, %v1517_v19 }
 0x13b   : > { %v1567_v26 = vadd.f32 %v1566_v22, %v1565_v20 }
 0x13c   : > { %v622_v27 = vadd.f32 %v1519_v25, %v1966_v50  ;;  %v703_v29 = vmax.f32 %v619_v23, 0.0  ;;  %v719_v30 = vmax.f32 %v683_v24, 0.0 }
 0x13d   : > { %v686_v28 = vadd.f32 %v1567_v26, %v1966_v50  ;;  %887 = sbr.rel (!%p1869_p4) target bundleno = 394 (0x18a), region = 36 }
 0x13e   : > { %v704_v31 = vmax.f32 %v622_v27, 0.0 }
 0x13f   : > { %v720_v32 = vmax.f32 %v686_v28, 0.0 }
 0x140   : > { %v1399_v33 = vpack.c.bf16 %v704_v31, %v703_v29 }
 0x141   : > { %v1439_v34 = vpack.c.bf16 %v720_v32, %v719_v30 }
 0x142   : > { %1447 = vst [vmem:[%s1973_s12 + $0x38] sm:$0xff] %v1399_v33  }
 0x143   : > { %1455 = vst [vmem:[%s1973_s12 + $0x78] sm:$0xff] %v1439_v34  }
 0x144   : > { %s2166_s22 = smov (!%p890_p8, %s889_s22), 32 }
 0x145   : > { %s1310_s28 = sshll.u32 %s2166_s22, 6 }
 0x146   : > { %p1313_p9 = scmp.eq.s32.totalorder %s1310_s28, 0 }
 0x147   : > { %s2032_s29 = sshrl.u32 (!%p1313_p9), %s2166_s22, 5 }
 0x148   : > { %898 = sbr.rel (%p1313_p9) target bundleno = 394 (0x18a), region = 40  ;;  %p1314_p10 = scmp.le.s32.totalorder (!%p1313_p9), %s2032_s29, 0 }
 0x14f   : > { %1175 = sbr.rel (%p1314_p10) target bundleno = 373 (0x175), region = 112  ;;  %s2159_s15 = smov (!%p1314_p10), %s2026_s27 }
 0x150   : > { %s2160_s20 = smov (!%p1314_p10), %s1973_s12  ;;  %s2041_s23 = smov (!%p1314_p10), 0  }
 0x151   : > { %s2043_s30 = smov (!%p1314_p10), 0  }
 0x156 LB: >> { %v914_v50 = vld [vmem:[%s1798_s20] sm:$0xf]  ;;  %v916_v35 = vld [vmem:[%s1798_s20 + $0x4] sm:$0xf]  ;;  %v918_v36 = vld [vmem:[%s1798_s20 + $0x8] sm:$0xf]  ;;  %s1806_s30 = sphi %s2043_s30, %s908_s30   ;;  %s1802_s23 = sphi %s2041_s23, %s2161_s23   ;;  %s1798_s20 = sphi %s2160_s20, %s983_s20   ;;  %s1794_s15 = sphi %s2159_s15, %s984_s15  }
 0x157   : >> { %915 = vst [vmem:[%s1794_s15] sm:$0xf] %v914_v50  ;;  %917 = vst [vmem:[%s1794_s15 + $0x4] sm:$0xf] %v916_v35  ;;  %v920_v37 = vld [vmem:[%s1798_s20 + $0xc] sm:$0xf]  ;;  %s978_s4 = sadd.s32 1, %s1802_s23 }
 0x158   : >> { %919 = vst [vmem:[%s1794_s15 + $0x8] sm:$0xf] %v918_v36  ;;  %v922_v38 = vld [vmem:[%s1798_s20 + $0x10] sm:$0xf]  ;;  %v924_v39 = vld [vmem:[%s1798_s20 + $0x14] sm:$0xf]  ;;  %p979_p11 = scmp.ge.s32.totalorder %s978_s4, %s2032_s29 }
 0x159   : >> { %921 = vst [vmem:[%s1794_s15 + $0xc] sm:$0xf] %v920_v37  ;;  %923 = vst [vmem:[%s1794_s15 + $0x10] sm:$0xf] %v922_v38  ;;  %v926_v40 = vld [vmem:[%s1798_s20 + $0x18] sm:$0xf] }
 0x15a   : >> { %925 = vst [vmem:[%s1794_s15 + $0x14] sm:$0xf] %v924_v39  ;;  %v928_v41 = vld [vmem:[%s1798_s20 + $0x1c] sm:$0xf]  ;;  %v930_v42 = vld [vmem:[%s1798_s20 + $0x20] sm:$0xf] }
 0x15b   : >> { %927 = vst [vmem:[%s1794_s15 + $0x18] sm:$0xf] %v926_v40  ;;  %929 = vst [vmem:[%s1794_s15 + $0x1c] sm:$0xf] %v928_v41  ;;  %v932_v43 = vld [vmem:[%s1798_s20 + $0x24] sm:$0xf] }
 0x15c   : >> { %931 = vst [vmem:[%s1794_s15 + $0x20] sm:$0xf] %v930_v42  ;;  %v934_v44 = vld [vmem:[%s1798_s20 + $0x28] sm:$0xf]  ;;  %v936_v45 = vld [vmem:[%s1798_s20 + $0x2c] sm:$0xf] }
 0x15d   : >> { %933 = vst [vmem:[%s1794_s15 + $0x24] sm:$0xf] %v932_v43  ;;  %935 = vst [vmem:[%s1794_s15 + $0x28] sm:$0xf] %v934_v44  ;;  %v938_v46 = vld [vmem:[%s1798_s20 + $0x30] sm:$0xf] }
 0x15e   : >> { %937 = vst [vmem:[%s1794_s15 + $0x2c] sm:$0xf] %v936_v45  ;;  %v940_v47 = vld [vmem:[%s1798_s20 + $0x34] sm:$0xf]  ;;  %v942_v48 = vld [vmem:[%s1798_s20 + $0x38] sm:$0xf] }
 0x15f   : >> { %939 = vst [vmem:[%s1794_s15 + $0x30] sm:$0xf] %v938_v46  ;;  %941 = vst [vmem:[%s1794_s15 + $0x34] sm:$0xf] %v940_v47  ;;  %v944_v49 = vld [vmem:[%s1798_s20 + $0x3c] sm:$0xf] }
 0x160   : >> { %943 = vst [vmem:[%s1794_s15 + $0x38] sm:$0xf] %v942_v48  ;;  %v946_v51 = vld [vmem:[%s1798_s20 + $0x40] sm:$0xf]  ;;  %v948_v52 = vld [vmem:[%s1798_s20 + $0x44] sm:$0xf] }
 0x161   : >> { %945 = vst [vmem:[%s1794_s15 + $0x3c] sm:$0xf] %v944_v49  ;;  %947 = vst [vmem:[%s1794_s15 + $0x40] sm:$0xf] %v946_v51  ;;  %v950_v53 = vld [vmem:[%s1798_s20 + $0x48] sm:$0xf] }
 0x162   : >> { %949 = vst [vmem:[%s1794_s15 + $0x44] sm:$0xf] %v948_v52  ;;  %v952_v54 = vld [vmem:[%s1798_s20 + $0x4c] sm:$0xf]  ;;  %v954_v55 = vld [vmem:[%s1798_s20 + $0x50] sm:$0xf] }
 0x163   : >> { %951 = vst [vmem:[%s1794_s15 + $0x48] sm:$0xf] %v950_v53  ;;  %953 = vst [vmem:[%s1794_s15 + $0x4c] sm:$0xf] %v952_v54  ;;  %v956_v56 = vld [vmem:[%s1798_s20 + $0x54] sm:$0xf] }
 0x164   : >> { %955 = vst [vmem:[%s1794_s15 + $0x50] sm:$0xf] %v954_v55  ;;  %v958_v57 = vld [vmem:[%s1798_s20 + $0x58] sm:$0xf]  ;;  %v960_v58 = vld [vmem:[%s1798_s20 + $0x5c] sm:$0xf] }
 0x165   : >> { %957 = vst [vmem:[%s1794_s15 + $0x54] sm:$0xf] %v956_v56  ;;  %959 = vst [vmem:[%s1794_s15 + $0x58] sm:$0xf] %v958_v57  ;;  %v962_v59 = vld [vmem:[%s1798_s20 + $0x60] sm:$0xf] }
 0x166   : >> { %961 = vst [vmem:[%s1794_s15 + $0x5c] sm:$0xf] %v960_v58  ;;  %v964_v60 = vld [vmem:[%s1798_s20 + $0x64] sm:$0xf]  ;;  %v966_v61 = vld [vmem:[%s1798_s20 + $0x68] sm:$0xf] }
 0x167   : >> { %963 = vst [vmem:[%s1794_s15 + $0x60] sm:$0xf] %v962_v59  ;;  %965 = vst [vmem:[%s1794_s15 + $0x64] sm:$0xf] %v964_v60  ;;  %v968_v62 = vld [vmem:[%s1798_s20 + $0x6c] sm:$0xf] }
 0x168   : >> { %967 = vst [vmem:[%s1794_s15 + $0x68] sm:$0xf] %v966_v61  ;;  %v970_v63 = vld [vmem:[%s1798_s20 + $0x70] sm:$0xf]  ;;  %v972_v0 = vld [vmem:[%s1798_s20 + $0x74] sm:$0xf] }
 0x169   : >> { %969 = vst [vmem:[%s1794_s15 + $0x6c] sm:$0xf] %v968_v62  ;;  %971 = vst [vmem:[%s1794_s15 + $0x70] sm:$0xf] %v970_v63  ;;  %v974_v1 = vld [vmem:[%s1798_s20 + $0x78] sm:$0xf] }
 0x16a   : >> { %973 = vst [vmem:[%s1794_s15 + $0x74] sm:$0xf] %v972_v0  ;;  %v976_v2 = vld [vmem:[%s1798_s20 + $0x7c] sm:$0xf]  ;;  %975 = vst [vmem:[%s1794_s15 + $0x78] sm:$0xf] %v974_v1 }
 0x16b   : >> { %977 = vst [vmem:[%s1794_s15 + $0x7c] sm:$0xf] %v976_v2  ;;  %s2168_s4 = smov (%p979_p11, %s978_s4), 0  ;;  %s908_s30 = sadd.s32 1, %s1806_s30  }
 0x16c   : >> { %s1315_s5 = sshll.u32 %s2168_s4, 7  ;;  %p907_p12 = scmp.ge.s32.totalorder %s908_s30, %s2032_s29 }
 0x16d   : >> { %s983_s20 = scalar_lea.vmem %s1973_s12, %s1315_s5 [#allocation2]   ;;  %s984_s15 = scalar_lea.vmem %s2026_s27, %s1315_s5  }
 0x16e   : >> { %s2161_s23 = smov %s2168_s4  ;;  %910 = sbr.rel (!%p907_p12) target bundleno = 342 (0x156), region = 118 }
 0x175 PF: > { %s2136_s6 = sand.u32 31, %s2166_s22   ;;  %s1359_s7 = sshll.u32 %s2032_s29, 7 }
 0x176   : > { %s989_s8 = scalar_lea.vmem %s1973_s12, %s1359_s7 [#allocation2]   ;;  %s991_s9 = scalar_lea.vmem %s2026_s27, %s1359_s7  }
 0x177   : > { %p1320_p13 = scmp.le.s32.totalorder %s2136_s6, 0 }
 0x178   : > { %s1808_s10 = smov (!%p1320_p13), %s991_s9   ;;  %s1812_s11 = smov (!%p1320_p13), %s989_s8  }
 0x179   : > { %1189 = sbr.rel (%p1320_p13) target bundleno = 394 (0x18a), region = 123  ;;  %s1816_s14 = smov (!%p1320_p13), 0  }
 0x17a   : > { %s1820_s17 = smov (!%p1320_p13), 0  }
 0x180 LB: >> { %v1001_v3 = vld [vmem:[%s1814_s11] sm:$0xf]  ;;  %s1003_s18 = sadd.s32 1, %s1818_s14  ;;  %s995_s17 = sadd.s32 1, %s1822_s17   ;;  %s1822_s17 = sphi %s1820_s17, %s995_s17   ;;  %s1818_s14 = sphi %s1816_s14, %s1817_s14   ;;  %s1814_s11 = sphi %s1812_s11, %s1008_s11   ;;  %s1810_s10 = sphi %s1808_s10, %s1009_s10  }
 0x181   : >> { %1002 = vst [vmem:[%s1810_s10] sm:$0xf] %v1001_v3  ;;  %p1004_p0 = scmp.ge.s32.totalorder %s1003_s18, %s2136_s6  ;;  %p994_p1 = scmp.ge.s32.totalorder %s995_s17, %s2136_s6 }
 0x183   : >> { %s2170_s18 = smov (%p1004_p0, %s1003_s18), 0  ;;  %997 = sbr.rel (!%p994_p1) target bundleno = 384 (0x180), region = 129 }
 0x184   : >> { %s1321_s21 = sshll.u32 %s2170_s18, 2  ;;  %s1817_s14 = smov %s2170_s18  }
 0x185   : >> { %s1008_s11 = scalar_lea.vmem %s989_s8, %s1321_s21 [#allocation2]   ;;  %s1009_s10 = scalar_lea.vmem %s991_s9, %s1321_s21  }
 0x18a PF: > { %p10_p2 = scmp.ge.s32.totalorder %s1859_s16, 6   ;;  %s2162_s12 = smov %s1786_s13 }
 0x18b   : > { %s2163_s13 = smov %s1867_s19  ;;  %s2164_s14 = smov %s1859_s16 }
 0x18c   :  { %12 = sbr.rel (!%p10_p2) target bundleno = 2 (0x2), region = 140 }

// kernel: cnn_actor_forward.5
= control target key start
LH: loop header
LB: loop body
LE: loop exit
PB: predicated region body
PF: predicated region fallthrough
CT: control target
= control target key end

     0   :  { %s1644_s1 = inlined_call_operand.vmem [shape: bf16[512,128], index: 1, kind: input, shape index: {}]   ;;  %s1645_s0 = inlined_call_operand.vmem [shape: bf16[162,512], index: 0, kind: input, shape index: {}]   ;;  %s1646_s2 = inlined_call_operand.vmem [shape: f32[1,128], index: 2, kind: input, shape index: {}]   ;;  %s1647_s3 = inlined_call_operand.vmem [shape: bf16[162,128], index: 3, kind: output, shape index: {}]  }
   0x1   :  { %v1247_v0 = vld [vmem:[%s1644_s1 + $0x40] sm:$0xff]   ;;  %v1251_v4 = vld [vmem:[%s1644_s1 + $0x48] sm:$0xff]   ;;  %v1255_v8 = vld [vmem:[%s1644_s1 + $0x50] sm:$0xff]  }
   0x2   :  { %v1248_v1 = vld [vmem:[%s1644_s1 + $0xc0] sm:$0xff]   ;;  %1083 = vmatprep.subr.bf16.mxu0 %v1247_v0  ;;  %v1252_v5 = vld [vmem:[%s1644_s1 + $0xc8] sm:$0xff]   ;;  %v1256_v9 = vld [vmem:[%s1644_s1 + $0xd0] sm:$0xff]  }
   0x3   :  { %v1249_v2 = vld [vmem:[%s1644_s1] sm:$0xff]   ;;  %1165 = vmatprep.subr.bf16.mxu1 %v1248_v1  ;;  %v1253_v6 = vld [vmem:[%s1644_s1 + $0x8] sm:$0xff]   ;;  %v1257_v10 = vld [vmem:[%s1644_s1 + $0x10] sm:$0xff]  }
   0x4   :  { %v1250_v3 = vld [vmem:[%s1644_s1 + $0x80] sm:$0xff]   ;;  %1084 = vmatpush3.bf16.msra.mxu0 %v1249_v2  ;;  %v1254_v7 = vld [vmem:[%s1644_s1 + $0x88] sm:$0xff]   ;;  %v1258_v11 = vld [vmem:[%s1644_s1 + $0x90] sm:$0xff]  }
   0x5   :  { %1166 = vmatpush3.bf16.msra.mxu1 %v1250_v3  ;;  %1085 = vmatprep.subr.bf16.mxu0 %v1251_v4  ;;  %v1259_v12 = vld [vmem:[%s1644_s1 + $0x58] sm:$0xff]   ;;  %v1263_v16 = vld [vmem:[%s1644_s1 + $0x60] sm:$0xff]   ;;  %v1267_v20 = vld [vmem:[%s1644_s1 + $0x68] sm:$0xff]  }
   0x6   :  { %1167 = vmatprep.subr.bf16.mxu1 %v1252_v5  ;;  %v1260_v13 = vld [vmem:[%s1644_s1 + $0xd8] sm:$0xff]   ;;  %v1264_v17 = vld [vmem:[%s1644_s1 + $0xe0] sm:$0xff]   ;;  %v1268_v21 = vld [vmem:[%s1644_s1 + $0xe8] sm:$0xff]  }
   0x7   :  { %v1261_v14 = vld [vmem:[%s1644_s1 + $0x18] sm:$0xff]   ;;  %v1265_v18 = vld [vmem:[%s1644_s1 + $0x20] sm:$0xff]   ;;  %v1269_v22 = vld [vmem:[%s1644_s1 + $0x28] sm:$0xff]  }
   0x8   :  { %1086 = vmatpush3.bf16.msra.mxu0 %v1253_v6  ;;  %v1262_v15 = vld [vmem:[%s1644_s1 + $0x98] sm:$0xff]   ;;  %v1266_v19 = vld [vmem:[%s1644_s1 + $0xa0] sm:$0xff]   ;;  %v1270_v23 = vld [vmem:[%s1644_s1 + $0xa8] sm:$0xff]  }
   0x9   :  { %1168 = vmatpush3.bf16.msra.mxu1 %v1254_v7  ;;  %1087 = vmatprep.subr.bf16.mxu0 %v1255_v8  ;;  %v1271_v24 = vld [vmem:[%s1644_s1 + $0x70] sm:$0xff]   ;;  %v1275_v28 = vld [vmem:[%s1644_s1 + $0x78] sm:$0xff]   ;;  %v55_v6 = vld [vmem:[%s1645_s0 + $0x140] sm:$0x11] }
   0xa   :  { %1169 = vmatprep.subr.bf16.mxu1 %v1256_v9  ;;  %v1272_v25 = vld [vmem:[%s1644_s1 + $0xf0] sm:$0xff]   ;;  %v1276_v29 = vld [vmem:[%s1644_s1 + $0xf8] sm:$0xff]   ;;  %v56_v7 = vld [vmem:[%s1645_s0 + $0x148] sm:$0x11] }
   0xb   :  { %v1273_v26 = vld [vmem:[%s1644_s1 + $0x30] sm:$0xff]   ;;  %v1277_v30 = vld [vmem:[%s1644_s1 + $0x38] sm:$0xff]  }
   0xc   :  { %1088 = vmatpush3.bf16.msra.mxu0 %v1257_v10  ;;  %v1274_v27 = vld [vmem:[%s1644_s1 + $0xb0] sm:$0xff]   ;;  %v1278_v31 = vld [vmem:[%s1644_s1 + $0xb8] sm:$0xff]   ;;  %v947_v10 = vcombine.high %v55_v6, %v55_v6 }
   0xd   :  { %1170 = vmatpush3.bf16.msra.mxu1 %v1258_v11  ;;  %1089 = vmatprep.subr.bf16.mxu0 %v1259_v12  ;;  %v1279_v32 = vld [vmem:[%s1645_s0] ss:$16 sps:$4 sm:$0xff]   ;;  %v1281_v33 = vld [vmem:[%s1645_s0 + $0x4] ss:$16 sps:$4 sm:$0xff]   ;;  %v1282_v34 = vld [vmem:[%s1645_s0 + $0x8] ss:$16 sps:$4 sm:$0xff]   ;;  %v949_v11 = vcombine.high %v56_v7, %v56_v7  ;;  %v946_v12 = vcombine.low %v55_v6, %v55_v6 }
   0xe   :  { %1171 = vmatprep.subr.bf16.mxu1 %v1260_v13  ;;  %v1284_v35 = vld [vmem:[%s1645_s0 + $0xc] ss:$16 sps:$4 sm:$0xff]   ;;  %566 = vmatprep.mubr.bf16.mxu0 %v1281_v33  ;;  %v1285_v36 = vld [vmem:[%s1645_s0 + $0x24] ss:$16 sps:$4 sm:$0xff]   ;;  %v1289_v38 = vld [vmem:[%s1645_s0 + $0x20] ss:$16 sps:$4 sm:$0xff]   ;;  %v948_v13 = vcombine.low %v56_v7, %v56_v7 }
   0xf   :  { %686 = vmatprep.mubr.bf16.mxu1 %v1284_v35  ;;  %v1287_v37 = vld [vmem:[%s1645_s0 + $0x2c] ss:$16 sps:$4 sm:$0xff]   ;;  %v1290_v39 = vld [vmem:[%s1645_s0 + $0x28] ss:$16 sps:$4 sm:$0xff]   ;;  %v1291_v40 = vld [vmem:[%s1645_s0 + $0x44] ss:$16 sps:$4 sm:$0xff]  }
  0x10   :  { %1090 = vmatpush3.bf16.msra.mxu0 %v1261_v14  ;;  %v1293_v41 = vld [vmem:[%s1645_s0 + $0x4c] ss:$16 sps:$4 sm:$0xff]   ;;  %v1295_v42 = vld [vmem:[%s1645_s0 + $0x40] ss:$16 sps:$4 sm:$0xff]   ;;  %v1296_v43 = vld [vmem:[%s1645_s0 + $0x48] ss:$16 sps:$4 sm:$0xff]  }
  0x11   :  { %1172 = vmatpush3.bf16.msra.mxu1 %v1262_v15  ;;  %1091 = vmatprep.subr.bf16.mxu0 %v1263_v16  ;;  %v1297_v44 = vld [vmem:[%s1645_s0 + $0x64] ss:$16 sps:$4 sm:$0xff]   ;;  %v1299_v45 = vld [vmem:[%s1645_s0 + $0x6c] ss:$16 sps:$4 sm:$0xff]   ;;  %v1301_v46 = vld [vmem:[%s1645_s0 + $0x60] ss:$16 sps:$4 sm:$0xff]  }
  0x12   :  { %1173 = vmatprep.subr.bf16.mxu1 %v1264_v17  ;;  %v1302_v47 = vld [vmem:[%s1645_s0 + $0x68] ss:$16 sps:$4 sm:$0xff]   ;;  %v1303_v48 = vld [vmem:[%s1645_s0 + $0x84] ss:$16 sps:$4 sm:$0xff]   ;;  %v1305_v49 = vld [vmem:[%s1645_s0 + $0x8c] ss:$16 sps:$4 sm:$0xff]  }
  0x13   :  { %v1307_v50 = vld [vmem:[%s1645_s0 + $0x80] ss:$16 sps:$4 sm:$0xff]   ;;  %v1308_v51 = vld [vmem:[%s1645_s0 + $0x88] ss:$16 sps:$4 sm:$0xff]   ;;  %v1309_v52 = vld [vmem:[%s1645_s0 + $0xa4] ss:$16 sps:$4 sm:$0xff]  }
  0x14   :  { %1092 = vmatpush3.bf16.msra.mxu0 %v1265_v18  ;;  %v1311_v53 = vld [vmem:[%s1645_s0 + $0xac] ss:$16 sps:$4 sm:$0xff]   ;;  %v1313_v54 = vld [vmem:[%s1645_s0 + $0xa0] ss:$16 sps:$4 sm:$0xff]   ;;  %v1314_v55 = vld [vmem:[%s1645_s0 + $0xa8] ss:$16 sps:$4 sm:$0xff]  }
  0x15   :  { %1174 = vmatpush3.bf16.msra.mxu1 %v1266_v19  ;;  %1093 = vmatprep.subr.bf16.mxu0 %v1267_v20  ;;  %v1315_v56 = vld [vmem:[%s1645_s0 + $0xc4] ss:$16 sps:$4 sm:$0xff]   ;;  %v1317_v57 = vld [vmem:[%s1645_s0 + $0xcc] ss:$16 sps:$4 sm:$0xff]   ;;  %v1319_v58 = vld [vmem:[%s1645_s0 + $0xc0] ss:$16 sps:$4 sm:$0xff]  }
  0x16   :  { %1175 = vmatprep.subr.bf16.mxu1 %v1268_v21  ;;  %v1320_v59 = vld [vmem:[%s1645_s0 + $0xc8] ss:$16 sps:$4 sm:$0xff]   ;;  %v1321_v60 = vld [vmem:[%s1645_s0 + $0xe4] ss:$16 sps:$4 sm:$0xff]   ;;  %v1323_v61 = vld [vmem:[%s1645_s0 + $0xec] ss:$16 sps:$4 sm:$0xff]  }
  0x17   :  { %v1325_v62 = vld [vmem:[%s1645_s0 + $0xe0] ss:$16 sps:$4 sm:$0xff]   ;;  %v1326_v63 = vld [vmem:[%s1645_s0 + $0xe8] ss:$16 sps:$4 sm:$0xff]   ;;  %v1327_v0 = vld [vmem:[%s1645_s0 + $0x104] ss:$16 sps:$4 sm:$0xff]  }
  0x18   :  { %1094 = vmatpush3.bf16.msra.mxu0 %v1269_v22  ;;  %v1329_v1 = vld [vmem:[%s1645_s0 + $0x10c] ss:$16 sps:$4 sm:$0xff]   ;;  %v1331_v2 = vld [vmem:[%s1645_s0 + $0x100] ss:$16 sps:$4 sm:$0xff]   ;;  %v1332_v3 = vld [vmem:[%s1645_s0 + $0x108] ss:$16 sps:$4 sm:$0xff]  }
  0x19   :  { %1176 = vmatpush3.bf16.msra.mxu1 %v1270_v23  ;;  %1095 = vmatprep.subr.bf16.mxu0 %v1271_v24  ;;  %v1333_v4 = vld [vmem:[%s1645_s0 + $0x124] ss:$16 sps:$4 sm:$0xff]   ;;  %v1335_v5 = vld [vmem:[%s1645_s0 + $0x12c] ss:$16 sps:$4 sm:$0xff]   ;;  %v1337_v8 = vld [vmem:[%s1645_s0 + $0x120] ss:$16 sps:$4 sm:$0xff]  }
  0x1a   :  { %1177 = vmatprep.subr.bf16.mxu1 %v1272_v25  ;;  %v1338_v9 = vld [vmem:[%s1645_s0 + $0x128] ss:$16 sps:$4 sm:$0xff]   ;;  %v1588_v16 = vld [vmem:[%s1646_s2] ss:$0 sm:$0xff] }
  0x1c   :  { %1096 = vmatpush3.bf16.msra.mxu0 %v1273_v26 }
  0x1d   :  { %1178 = vmatpush3.bf16.msra.mxu1 %v1274_v27  ;;  %1097 = vmatprep.subr.bf16.mxu0 %v1275_v28 }
  0x1e   :  { %1179 = vmatprep.subr.bf16.mxu1 %v1276_v29 }
  0x20   :  { %1098 = vmatpush3.bf16.msra.mxu0 %v1277_v30 }
  0x21   :  { %1180 = vmatpush3.bf16.msra.mxu1 %v1278_v31 }
  0x23   :  { %567 = vmatmul.mubr.bf16.vlgmr.msra.gmra.mrb[0].mxu0 %v1279_v32 }
  0x24   :  { %687 = vmatmul.mubr.bf16.vlgmr.msra.gmra.mrb[0].mxu1 %v1282_v34  ;;  %574 = vmatprep.mubr.bf16.mxu0 %v1285_v36 }
  0x25   :  { %694 = vmatprep.mubr.bf16.mxu1 %v1287_v37 }
  0x2b   :  { %575 = vmatmul.mubr.bf16.gmra.mrb[4].mxu0 %v1289_v38 }
  0x2c   :  { %695 = vmatmul.mubr.bf16.gmra.mrb[4].mxu1 %v1290_v39  ;;  %582 = vmatprep.mubr.bf16.mxu0 %v1291_v40 }
  0x2d   :  { %702 = vmatprep.mubr.bf16.mxu1 %v1293_v41 }
  0x33   :  { %583 = vmatmul.mubr.bf16.gmra.mrb[8].mxu0 %v1295_v42 }
  0x34   :  { %703 = vmatmul.mubr.bf16.gmra.mrb[8].mxu1 %v1296_v43  ;;  %590 = vmatprep.mubr.bf16.mxu0 %v1297_v44 }
  0x35   :  { %710 = vmatprep.mubr.bf16.mxu1 %v1299_v45 }
  0x3b   :  { %591 = vmatmul.mubr.bf16.gmra.mrb[12].mxu0 %v1301_v46 }
  0x3c   :  { %711 = vmatmul.mubr.bf16.gmra.mrb[12].mxu1 %v1302_v47  ;;  %598 = vmatprep.mubr.bf16.mxu0 %v1303_v48 }
  0x3d   :  { %718 = vmatprep.mubr.bf16.mxu1 %v1305_v49 }
  0x43   :  { %599 = vmatmul.mubr.bf16.gmra.mrb[16].mxu0 %v1307_v50 }
  0x44   :  { %719 = vmatmul.mubr.bf16.gmra.mrb[16].mxu1 %v1308_v51  ;;  %606 = vmatprep.mubr.bf16.mxu0 %v1309_v52 }
  0x45   :  { %726 = vmatprep.mubr.bf16.mxu1 %v1311_v53 }
  0x4b   :  { %607 = vmatmul.mubr.bf16.gmra.mrb[20].mxu0 %v1313_v54 }
  0x4c   :  { %727 = vmatmul.mubr.bf16.gmra.mrb[20].mxu1 %v1314_v55  ;;  %614 = vmatprep.mubr.bf16.mxu0 %v1315_v56 }
  0x4d   :  { %734 = vmatprep.mubr.bf16.mxu1 %v1317_v57 }
  0x53   :  { %615 = vmatmul.mubr.bf16.gmra.mrb[24].mxu0 %v1319_v58 }
  0x54   :  { %735 = vmatmul.mubr.bf16.gmra.mrb[24].mxu1 %v1320_v59  ;;  %622 = vmatprep.mubr.bf16.mxu0 %v1321_v60 }
  0x55   :  { %742 = vmatprep.mubr.bf16.mxu1 %v1323_v61 }
  0x5b   :  { %623 = vmatmul.mubr.bf16.gmra.mrb[28].mxu0 %v1325_v62 }
  0x5c   :  { %743 = vmatmul.mubr.bf16.gmra.mrb[28].mxu1 %v1326_v63  ;;  %630 = vmatprep.mubr.bf16.mxu0 %v1327_v0 }
  0x5d   :  { %750 = vmatprep.mubr.bf16.mxu1 %v1329_v1 }
  0x63   :  { %631 = vmatmul.mubr.bf16.gmra.mrb[32].mxu0 %v1331_v2 }
  0x64   :  { %751 = vmatmul.mubr.bf16.gmra.mrb[32].mxu1 %v1332_v3  ;;  %638 = vmatprep.mubr.bf16.mxu0 %v1333_v4 }
  0x65   :  { %758 = vmatprep.mubr.bf16.mxu1 %v1335_v5 }
  0x6b   :  { %639 = vmatmul.mubr.bf16.gmra.mrb[36].mxu0 %v1337_v8 }
  0x6c   :  { %759 = vmatmul.mubr.bf16.gmra.mrb[36].mxu1 %v1338_v9  ;;  %646 = vmatprep.mubr.bf16.mxu0 %v947_v10 }
  0x6d   :  { %766 = vmatprep.mubr.bf16.mxu1 %v949_v11 }
  0x73   :  { %647 = vmatmul.mubr.bf16.gmra.mrb[40].mxu0 %v946_v12 }
  0x74   :  { %767 = vmatmul.mubr.bf16.gmra.mrb[40].mxu1 %v948_v13 }
  0xf6   :  { %v1099_v14 = vpop.f32.mrb[0].mxu0 }
  0xf7   :  { %v1181_v15 = vpop.f32.mrb[0].mxu1  ;;  %v1100_v17 = vpop.f32.mrb[1].mxu0 }
  0xf8   :  { %v1101_v18 = vadd.f32 %v1100_v17, %v1099_v14  ;;  %v1182_v19 = vpop.f32.mrb[1].mxu1  ;;  %v1102_v20 = vpop.f32.mrb[2].mxu0 }
  0xf9   :  { %v1183_v21 = vadd.f32 %v1182_v19, %v1181_v15  ;;  %v1184_v22 = vpop.f32.mrb[2].mxu1  ;;  %v1103_v23 = vpop.f32.mrb[3].mxu0 }
  0xfa   :  { %v569_v24 = vadd.f32 %v1101_v18, %v1588_v16  ;;  %v1104_v25 = vadd.f32 %v1103_v23, %v1102_v20  ;;  %v1185_v26 = vpop.f32.mrb[3].mxu1 }
  0xfb   :  { %v1186_v27 = vadd.f32 %v1185_v26, %v1184_v22 }
  0xfc   :  { %v689_v28 = vadd.f32 %v1183_v21, %v569_v24  ;;  %v572_v29 = vadd.f32 %v1104_v25, %v1588_v16 }
  0xfe   :  { %v692_v30 = vadd.f32 %v1186_v27, %v572_v29  ;;  %v1105_v31 = vpop.f32.mrb[4].mxu0  ;;  %v774_v34 = vmax.f32 %v689_v28, 0.0 }
  0xff   :  { %v1187_v32 = vpop.f32.mrb[4].mxu1  ;;  %v1106_v33 = vpop.f32.mrb[5].mxu0 }
 0x100   :  { %v775_v35 = vmax.f32 %v692_v30, 0.0  ;;  %v1107_v36 = vadd.f32 %v1106_v33, %v1105_v31  ;;  %v1188_v37 = vpop.f32.mrb[5].mxu1  ;;  %v1108_v38 = vpop.f32.mrb[6].mxu0 }
 0x101   :  { %v1189_v39 = vadd.f32 %v1188_v37, %v1187_v32  ;;  %v1190_v40 = vpop.f32.mrb[6].mxu1  ;;  %v1109_v41 = vpop.f32.mrb[7].mxu0 }
 0x102   :  { %v1027_v42 = vpack.c.bf16 %v775_v35, %v774_v34  ;;  %v577_v43 = vadd.f32 %v1107_v36, %v1588_v16  ;;  %v1110_v44 = vadd.f32 %v1109_v41, %v1108_v38  ;;  %v1191_v45 = vpop.f32.mrb[7].mxu1 }
 0x103   :  { %v1192_v46 = vadd.f32 %v1191_v45, %v1190_v40 }
 0x104   :  { %1028 = vst [vmem:[%s1647_s3] sm:$0xff] %v1027_v42   ;;  %v697_v47 = vadd.f32 %v1189_v39, %v577_v43  ;;  %v580_v48 = vadd.f32 %v1110_v44, %v1588_v16 }
 0x106   :  { %v700_v49 = vadd.f32 %v1192_v46, %v580_v48  ;;  %v1111_v50 = vpop.f32.mrb[8].mxu0  ;;  %v776_v53 = vmax.f32 %v697_v47, 0.0 }
 0x107   :  { %v1193_v51 = vpop.f32.mrb[8].mxu1  ;;  %v1112_v52 = vpop.f32.mrb[9].mxu0 }
 0x108   :  { %v777_v54 = vmax.f32 %v700_v49, 0.0  ;;  %v1113_v55 = vadd.f32 %v1112_v52, %v1111_v50  ;;  %v1194_v56 = vpop.f32.mrb[9].mxu1  ;;  %v1114_v57 = vpop.f32.mrb[10].mxu0 }
 0x109   :  { %v1195_v58 = vadd.f32 %v1194_v56, %v1193_v51  ;;  %v1196_v59 = vpop.f32.mrb[10].mxu1  ;;  %v1115_v60 = vpop.f32.mrb[11].mxu0 }
 0x10a   :  { %v1032_v61 = vpack.c.bf16 %v777_v54, %v776_v53  ;;  %v585_v62 = vadd.f32 %v1113_v55, %v1588_v16  ;;  %v1116_v63 = vadd.f32 %v1115_v60, %v1114_v57  ;;  %v1197_v0 = vpop.f32.mrb[11].mxu1 }
 0x10b   :  { %v1198_v1 = vadd.f32 %v1197_v0, %v1196_v59 }
 0x10c   :  { %1074 = vst [vmem:[%s1647_s3 + $0x8] sm:$0xff] %v1032_v61   ;;  %v705_v2 = vadd.f32 %v1195_v58, %v585_v62  ;;  %v588_v3 = vadd.f32 %v1116_v63, %v1588_v16 }
 0x10e   :  { %v708_v4 = vadd.f32 %v1198_v1, %v588_v3  ;;  %v1117_v5 = vpop.f32.mrb[12].mxu0  ;;  %v778_v8 = vmax.f32 %v705_v2, 0.0 }
 0x10f   :  { %v1199_v6 = vpop.f32.mrb[12].mxu1  ;;  %v1118_v7 = vpop.f32.mrb[13].mxu0 }
 0x110   :  { %v779_v9 = vmax.f32 %v708_v4, 0.0  ;;  %v1119_v10 = vadd.f32 %v1118_v7, %v1117_v5  ;;  %v1200_v11 = vpop.f32.mrb[13].mxu1  ;;  %v1120_v12 = vpop.f32.mrb[14].mxu0 }
 0x111   :  { %v1201_v13 = vadd.f32 %v1200_v11, %v1199_v6  ;;  %v1202_v14 = vpop.f32.mrb[14].mxu1  ;;  %v1121_v15 = vpop.f32.mrb[15].mxu0 }
 0x112   :  { %v1037_v17 = vpack.c.bf16 %v779_v9, %v778_v8  ;;  %v593_v18 = vadd.f32 %v1119_v10, %v1588_v16  ;;  %v1122_v19 = vadd.f32 %v1121_v15, %v1120_v12  ;;  %v1203_v20 = vpop.f32.mrb[15].mxu1 }
 0x113   :  { %v1204_v21 = vadd.f32 %v1203_v20, %v1202_v14 }
 0x114   :  { %1075 = vst [vmem:[%s1647_s3 + $0x10] sm:$0xff] %v1037_v17   ;;  %v713_v22 = vadd.f32 %v1201_v13, %v593_v18  ;;  %v596_v23 = vadd.f32 %v1122_v19, %v1588_v16 }
 0x116   :  { %v716_v24 = vadd.f32 %v1204_v21, %v596_v23  ;;  %v1123_v25 = vpop.f32.mrb[16].mxu0  ;;  %v780_v28 = vmax.f32 %v713_v22, 0.0 }
 0x117   :  { %v1205_v26 = vpop.f32.mrb[16].mxu1  ;;  %v1124_v27 = vpop.f32.mrb[17].mxu0 }
 0x118   :  { %v781_v29 = vmax.f32 %v716_v24, 0.0  ;;  %v1125_v30 = vadd.f32 %v1124_v27, %v1123_v25  ;;  %v1206_v31 = vpop.f32.mrb[17].mxu1  ;;  %v1126_v32 = vpop.f32.mrb[18].mxu0 }
 0x119   :  { %v1207_v33 = vadd.f32 %v1206_v31, %v1205_v26  ;;  %v1208_v34 = vpop.f32.mrb[18].mxu1  ;;  %v1127_v35 = vpop.f32.mrb[19].mxu0 }
 0x11a   :  { %v1042_v36 = vpack.c.bf16 %v781_v29, %v780_v28  ;;  %v601_v37 = vadd.f32 %v1125_v30, %v1588_v16  ;;  %v1128_v38 = vadd.f32 %v1127_v35, %v1126_v32  ;;  %v1209_v39 = vpop.f32.mrb[19].mxu1 }
 0x11b   :  { %v1210_v40 = vadd.f32 %v1209_v39, %v1208_v34 }
 0x11c   :  { %1076 = vst [vmem:[%s1647_s3 + $0x18] sm:$0xff] %v1042_v36   ;;  %v721_v41 = vadd.f32 %v1207_v33, %v601_v37  ;;  %v604_v42 = vadd.f32 %v1128_v38, %v1588_v16 }
 0x11e   :  { %v724_v43 = vadd.f32 %v1210_v40, %v604_v42  ;;  %v1129_v44 = vpop.f32.mrb[20].mxu0  ;;  %v782_v47 = vmax.f32 %v721_v41, 0.0 }
 0x11f   :  { %v1211_v45 = vpop.f32.mrb[20].mxu1  ;;  %v1130_v46 = vpop.f32.mrb[21].mxu0 }
 0x120   :  { %v783_v48 = vmax.f32 %v724_v43, 0.0  ;;  %v1131_v49 = vadd.f32 %v1130_v46, %v1129_v44  ;;  %v1212_v50 = vpop.f32.mrb[21].mxu1  ;;  %v1132_v51 = vpop.f32.mrb[22].mxu0 }
 0x121   :  { %v1213_v52 = vadd.f32 %v1212_v50, %v1211_v45  ;;  %v1214_v53 = vpop.f32.mrb[22].mxu1  ;;  %v1133_v54 = vpop.f32.mrb[23].mxu0 }
 0x122   :  { %v1047_v55 = vpack.c.bf16 %v783_v48, %v782_v47  ;;  %v609_v56 = vadd.f32 %v1131_v49, %v1588_v16  ;;  %v1134_v57 = vadd.f32 %v1133_v54, %v1132_v51  ;;  %v1215_v58 = vpop.f32.mrb[23].mxu1 }
 0x123   :  { %v1216_v59 = vadd.f32 %v1215_v58, %v1214_v53 }
 0x124   :  { %1077 = vst [vmem:[%s1647_s3 + $0x20] sm:$0xff] %v1047_v55   ;;  %v729_v60 = vadd.f32 %v1213_v52, %v609_v56  ;;  %v612_v61 = vadd.f32 %v1134_v57, %v1588_v16 }
 0x126   :  { %v732_v62 = vadd.f32 %v1216_v59, %v612_v61  ;;  %v1135_v63 = vpop.f32.mrb[24].mxu0  ;;  %v784_v2 = vmax.f32 %v729_v60, 0.0 }
 0x127   :  { %v1217_v0 = vpop.f32.mrb[24].mxu1  ;;  %v1136_v1 = vpop.f32.mrb[25].mxu0 }
 0x128   :  { %v785_v3 = vmax.f32 %v732_v62, 0.0  ;;  %v1137_v4 = vadd.f32 %v1136_v1, %v1135_v63  ;;  %v1218_v5 = vpop.f32.mrb[25].mxu1  ;;  %v1138_v6 = vpop.f32.mrb[26].mxu0 }
 0x129   :  { %v1219_v7 = vadd.f32 %v1218_v5, %v1217_v0  ;;  %v1220_v8 = vpop.f32.mrb[26].mxu1  ;;  %v1139_v9 = vpop.f32.mrb[27].mxu0 }
 0x12a   :  { %v1052_v10 = vpack.c.bf16 %v785_v3, %v784_v2  ;;  %v617_v11 = vadd.f32 %v1137_v4, %v1588_v16  ;;  %v1140_v12 = vadd.f32 %v1139_v9, %v1138_v6  ;;  %v1221_v13 = vpop.f32.mrb[27].mxu1 }
 0x12b   :  { %v1222_v14 = vadd.f32 %v1221_v13, %v1220_v8 }
 0x12c   :  { %1078 = vst [vmem:[%s1647_s3 + $0x28] sm:$0xff] %v1052_v10   ;;  %v737_v15 = vadd.f32 %v1219_v7, %v617_v11  ;;  %v620_v17 = vadd.f32 %v1140_v12, %v1588_v16 }
 0x12e   :  { %v740_v18 = vadd.f32 %v1222_v14, %v620_v17  ;;  %v1141_v19 = vpop.f32.mrb[28].mxu0  ;;  %v786_v22 = vmax.f32 %v737_v15, 0.0 }
 0x12f   :  { %v1223_v20 = vpop.f32.mrb[28].mxu1  ;;  %v1142_v21 = vpop.f32.mrb[29].mxu0 }
 0x130   :  { %v787_v23 = vmax.f32 %v740_v18, 0.0  ;;  %v1143_v24 = vadd.f32 %v1142_v21, %v1141_v19  ;;  %v1224_v25 = vpop.f32.mrb[29].mxu1  ;;  %v1144_v26 = vpop.f32.mrb[30].mxu0 }
 0x131   :  { %v1225_v27 = vadd.f32 %v1224_v25, %v1223_v20  ;;  %v1226_v28 = vpop.f32.mrb[30].mxu1  ;;  %v1145_v29 = vpop.f32.mrb[31].mxu0 }
 0x132   :  { %v1057_v30 = vpack.c.bf16 %v787_v23, %v786_v22  ;;  %v625_v31 = vadd.f32 %v1143_v24, %v1588_v16  ;;  %v1146_v32 = vadd.f32 %v1145_v29, %v1144_v26  ;;  %v1227_v33 = vpop.f32.mrb[31].mxu1 }
 0x133   :  { %v1228_v34 = vadd.f32 %v1227_v33, %v1226_v28 }
 0x134   :  { %1079 = vst [vmem:[%s1647_s3 + $0x30] sm:$0xff] %v1057_v30   ;;  %v745_v35 = vadd.f32 %v1225_v27, %v625_v31  ;;  %v628_v36 = vadd.f32 %v1146_v32, %v1588_v16 }
 0x136   :  { %v748_v37 = vadd.f32 %v1228_v34, %v628_v36  ;;  %v1147_v38 = vpop.f32.mrb[32].mxu0  ;;  %v788_v41 = vmax.f32 %v745_v35, 0.0 }
 0x137   :  { %v1229_v39 = vpop.f32.mrb[32].mxu1  ;;  %v1148_v40 = vpop.f32.mrb[33].mxu0 }
 0x138   :  { %v789_v42 = vmax.f32 %v748_v37, 0.0  ;;  %v1149_v43 = vadd.f32 %v1148_v40, %v1147_v38  ;;  %v1230_v44 = vpop.f32.mrb[33].mxu1  ;;  %v1150_v45 = vpop.f32.mrb[34].mxu0 }
 0x139   :  { %v1231_v46 = vadd.f32 %v1230_v44, %v1229_v39  ;;  %v1232_v47 = vpop.f32.mrb[34].mxu1  ;;  %v1151_v48 = vpop.f32.mrb[35].mxu0 }
 0x13a   :  { %v1062_v49 = vpack.c.bf16 %v789_v42, %v788_v41  ;;  %v633_v50 = vadd.f32 %v1149_v43, %v1588_v16  ;;  %v1152_v51 = vadd.f32 %v1151_v48, %v1150_v45  ;;  %v1233_v52 = vpop.f32.mrb[35].mxu1 }
 0x13b   :  { %v1234_v53 = vadd.f32 %v1233_v52, %v1232_v47 }
 0x13c   :  { %1080 = vst [vmem:[%s1647_s3 + $0x38] sm:$0xff] %v1062_v49   ;;  %v753_v54 = vadd.f32 %v1231_v46, %v633_v50  ;;  %v636_v55 = vadd.f32 %v1152_v51, %v1588_v16 }
 0x13e   :  { %v756_v56 = vadd.f32 %v1234_v53, %v636_v55  ;;  %v1153_v57 = vpop.f32.mrb[36].mxu0  ;;  %v790_v60 = vmax.f32 %v753_v54, 0.0 }
 0x13f   :  { %v1235_v58 = vpop.f32.mrb[36].mxu1  ;;  %v1154_v59 = vpop.f32.mrb[37].mxu0 }
 0x140   :  { %v791_v61 = vmax.f32 %v756_v56, 0.0  ;;  %v1155_v62 = vadd.f32 %v1154_v59, %v1153_v57  ;;  %v1236_v63 = vpop.f32.mrb[37].mxu1  ;;  %v1156_v0 = vpop.f32.mrb[38].mxu0 }
 0x141   :  { %v1237_v1 = vadd.f32 %v1236_v63, %v1235_v58  ;;  %v1238_v2 = vpop.f32.mrb[38].mxu1  ;;  %v1157_v3 = vpop.f32.mrb[39].mxu0 }
 0x142   :  { %v1067_v4 = vpack.c.bf16 %v791_v61, %v790_v60  ;;  %v641_v5 = vadd.f32 %v1155_v62, %v1588_v16  ;;  %v1158_v6 = vadd.f32 %v1157_v3, %v1156_v0  ;;  %v1239_v7 = vpop.f32.mrb[39].mxu1 }
 0x143   :  { %v1240_v8 = vadd.f32 %v1239_v7, %v1238_v2 }
 0x144   :  { %1081 = vst [vmem:[%s1647_s3 + $0x40] sm:$0xff] %v1067_v4   ;;  %v761_v9 = vadd.f32 %v1237_v1, %v641_v5  ;;  %v644_v10 = vadd.f32 %v1158_v6, %v1588_v16 }
 0x146   :  { %v764_v11 = vadd.f32 %v1240_v8, %v644_v10  ;;  %v1159_v12 = vpop.f32.mrb[40].mxu0  ;;  %v792_v15 = vmax.f32 %v761_v9, 0.0 }
 0x147   :  { %v1241_v13 = vpop.f32.mrb[40].mxu1  ;;  %v1160_v14 = vpop.f32.mrb[41].mxu0 }
 0x148   :  { %v793_v17 = vmax.f32 %v764_v11, 0.0  ;;  %v1161_v18 = vadd.f32 %v1160_v14, %v1159_v12  ;;  %v1242_v19 = vpop.f32.mrb[41].mxu1  ;;  %v1162_v20 = vpop.f32.mrb[42].mxu0 }
 0x149   :  { %v1243_v21 = vadd.f32 %v1242_v19, %v1241_v13  ;;  %v1244_v22 = vpop.f32.mrb[42].mxu1  ;;  %v1163_v23 = vpop.f32.mrb[43].mxu0 }
 0x14a   :  { %v1072_v24 = vpack.c.bf16 %v793_v17, %v792_v15  ;;  %v649_v25 = vadd.f32 %v1161_v18, %v1588_v16  ;;  %v1245_v26 = vpop.f32.mrb[43].mxu1 }
 0x14c   :  { %1082 = vst [vmem:[%s1647_s3 + $0x48] sm:$0xff] %v1072_v24   ;;  %v769_v27 = vadd.f32 %v1243_v21, %v649_v25 }
 0x14e   :  { %v794_v28 = vmax.f32 %v769_v27, 0.0 }
 0x150   :  { %v1023_v29 = vpack.c.bf16 %v794_v28, %v794_v28 }
 0x152   :  { %900 = vst [vmem:[%s1647_s3 + $0x50] sm:$0x1] %v1023_v29 }

// kernel: cnn_actor_forward.6
= control target key start
LH: loop header
LB: loop body
LE: loop exit
PB: predicated region body
PF: predicated region fallthrough
CT: control target
= control target key end

     0   :  { %v1281_v34 = vmov 0.0   ;;  %vm1282_vm0 = vmmov 0   ;;  %vm516_vm1 = vcmask 523264   ;;  %s1602_s1 = inlined_call_operand.vmem [shape: bf16[576,128], index: 1, kind: input, shape index: {}]   ;;  %s1603_s0 = inlined_call_operand.vmem [shape: bf16[98,576], index: 0, kind: input, shape index: {}]   ;;  %s1604_s2 = inlined_call_operand.vmem [shape: f32[1,128], index: 2, kind: input, shape index: {}]   ;;  %s1605_s3 = inlined_call_operand.vmem [shape: bf16[98,128], index: 3, kind: output, shape index: {}]  }
   0x1   :  { %v1198_v0 = vld [vmem:[%s1602_s1 + $0x40] sm:$0xff]   ;;  %v1202_v4 = vld [vmem:[%s1602_s1 + $0x48] sm:$0xff]   ;;  %v1206_v8 = vld [vmem:[%s1602_s1 + $0x50] sm:$0xff]  }
   0x2   :  { %v1199_v1 = vld [vmem:[%s1602_s1 + $0xc0] sm:$0xff]   ;;  %1025 = vmatprep.subr.bf16.mxu0 %v1198_v0  ;;  %v1203_v5 = vld [vmem:[%s1602_s1 + $0xc8] sm:$0xff]   ;;  %v1207_v9 = vld [vmem:[%s1602_s1 + $0xd0] sm:$0xff]  }
   0x3   :  { %v1200_v2 = vld [vmem:[%s1602_s1] sm:$0xff]   ;;  %1083 = vmatprep.subr.bf16.mxu1 %v1199_v1  ;;  %v1204_v6 = vld [vmem:[%s1602_s1 + $0x8] sm:$0xff]   ;;  %v1208_v10 = vld [vmem:[%s1602_s1 + $0x10] sm:$0xff]  }
   0x4   :  { %v1201_v3 = vld [vmem:[%s1602_s1 + $0x80] sm:$0xff]   ;;  %1026 = vmatpush3.bf16.msra.mxu0 %v1200_v2  ;;  %v1205_v7 = vld [vmem:[%s1602_s1 + $0x88] sm:$0xff]   ;;  %v1209_v11 = vld [vmem:[%s1602_s1 + $0x90] sm:$0xff]  }
   0x5   :  { %1084 = vmatpush3.bf16.msra.mxu1 %v1201_v3  ;;  %1027 = vmatprep.subr.bf16.mxu0 %v1202_v4  ;;  %v1210_v12 = vld [vmem:[%s1602_s1 + $0x58] sm:$0xff]   ;;  %v1214_v16 = vld [vmem:[%s1602_s1 + $0x60] sm:$0xff]   ;;  %v1218_v20 = vld [vmem:[%s1602_s1 + $0x68] sm:$0xff]  }
   0x6   :  { %1085 = vmatprep.subr.bf16.mxu1 %v1203_v5  ;;  %v1211_v13 = vld [vmem:[%s1602_s1 + $0xd8] sm:$0xff]   ;;  %v1215_v17 = vld [vmem:[%s1602_s1 + $0xe0] sm:$0xff]   ;;  %v1219_v21 = vld [vmem:[%s1602_s1 + $0xe8] sm:$0xff]  }
   0x7   :  { %v1212_v14 = vld [vmem:[%s1602_s1 + $0x18] sm:$0xff]   ;;  %v1216_v18 = vld [vmem:[%s1602_s1 + $0x20] sm:$0xff]   ;;  %v1220_v22 = vld [vmem:[%s1602_s1 + $0x28] sm:$0xff]  }
   0x8   :  { %1028 = vmatpush3.bf16.msra.mxu0 %v1204_v6  ;;  %v1213_v15 = vld [vmem:[%s1602_s1 + $0x98] sm:$0xff]   ;;  %v1217_v19 = vld [vmem:[%s1602_s1 + $0xa0] sm:$0xff]   ;;  %v1221_v23 = vld [vmem:[%s1602_s1 + $0xa8] sm:$0xff]  }
   0x9   :  { %1086 = vmatpush3.bf16.msra.mxu1 %v1205_v7  ;;  %1029 = vmatprep.subr.bf16.mxu0 %v1206_v8  ;;  %v1222_v24 = vld [vmem:[%s1602_s1 + $0x70] sm:$0xff]   ;;  %v1226_v28 = vld [vmem:[%s1602_s1 + $0x78] sm:$0xff]   ;;  %v1235_v36 = vld [vmem:[%s1603_s0 + $0xc] ss:$20 sps:$4 sm:$0xff]  }
   0xa   :  { %1087 = vmatprep.subr.bf16.mxu1 %v1207_v9  ;;  %v1223_v25 = vld [vmem:[%s1602_s1 + $0xf0] sm:$0xff]   ;;  %v1227_v29 = vld [vmem:[%s1602_s1 + $0xf8] sm:$0xff]   ;;  %v1236_v37 = vld [vmem:[%s1602_s1 + $0x100] sm:$0xff]   ;;  %658 = vmatprep.mubr.bf16.mxu1 %v1235_v36 }
   0xb   :  { %v1224_v26 = vld [vmem:[%s1602_s1 + $0x30] sm:$0xff]   ;;  %v1228_v30 = vld [vmem:[%s1602_s1 + $0x38] sm:$0xff]   ;;  %v1237_v38 = vld [vmem:[%s1603_s0 + $0x2c] ss:$20 sps:$4 sm:$0xff]  }
   0xc   :  { %1030 = vmatpush3.bf16.msra.mxu0 %v1208_v10  ;;  %v1225_v27 = vld [vmem:[%s1602_s1 + $0xb0] sm:$0xff]   ;;  %v1229_v31 = vld [vmem:[%s1602_s1 + $0xb8] sm:$0xff]   ;;  %v1247_v43 = vld [vmem:[%s1602_s1 + $0x108] sm:$0xff]  }
   0xd   :  { %1088 = vmatpush3.bf16.msra.mxu1 %v1209_v11  ;;  %1031 = vmatprep.subr.bf16.mxu0 %v1210_v12  ;;  %v1230_v32 = vld [vmem:[%s1603_s0] ss:$20 sps:$4 sm:$0xff]   ;;  %v1232_v33 = vld [vmem:[%s1603_s0 + $0x4] ss:$20 sps:$4 sm:$0xff]   ;;  %v1233_v35 = vld [vmem:[%s1603_s0 + $0x8] ss:$20 sps:$4 sm:$0xff]  }
   0xe   :  { %1089 = vmatprep.subr.bf16.mxu1 %v1211_v13  ;;  %570 = vmatprep.mubr.bf16.mxu0 %v1232_v33  ;;  %v1239_v39 = vld [vmem:[%s1603_s0 + $0x34] ss:$20 sps:$4 sm:$0xff]   ;;  %v1242_v41 = vld [vmem:[%s1603_s0 + $0x30] ss:$20 sps:$4 sm:$0xff]   ;;  %v1249_v47 = vld [vmem:[%s1603_s0 + $0x58] ss:$20 sps:$4 sm:$0xff]  }
   0xf   :  { %v1241_v40 = vld [vmem:[%s1603_s0 + $0x28] ss:$20 sps:$4 sm:$0xff]   ;;  %v1256_v45 = vld [vmem:[%s1602_s1 + $0x110] sm:$0xff]   ;;  %v1252_v49 = vld [vmem:[%s1603_s0 + $0x84] ss:$20 sps:$4 sm:$0xff]  }
  0x10   :  { %1032 = vmatpush3.bf16.msra.mxu0 %v1212_v14  ;;  %v1243_v42 = vld [vmem:[%s1603_s0 + $0x54] ss:$20 sps:$4 sm:$0xff]   ;;  %v1245_v44 = vld [vmem:[%s1603_s0 + $0x5c] ss:$20 sps:$4 sm:$0xff]   ;;  %v1254_v51 = vld [vmem:[%s1603_s0 + $0x78] ss:$20 sps:$4 sm:$0xff]  }
  0x11   :  { %1090 = vmatpush3.bf16.msra.mxu1 %v1213_v15  ;;  %1033 = vmatprep.subr.bf16.mxu0 %v1214_v16  ;;  %v1248_v46 = vld [vmem:[%s1603_s0 + $0x50] ss:$20 sps:$4 sm:$0xff]   ;;  %v1269_v50 = vld [vmem:[%s1602_s1 + $0x118] sm:$0xff]   ;;  %v1255_v52 = vld [vmem:[%s1603_s0 + $0x80] ss:$20 sps:$4 sm:$0xff]  }
  0x12   :  { %1091 = vmatprep.subr.bf16.mxu1 %v1215_v17  ;;  %v1250_v48 = vld [vmem:[%s1603_s0 + $0x7c] ss:$20 sps:$4 sm:$0xff]   ;;  %v1257_v53 = vld [vmem:[%s1603_s0 + $0xa4] ss:$20 sps:$4 sm:$0xff]   ;;  %v1259_v54 = vld [vmem:[%s1603_s0 + $0xac] ss:$20 sps:$4 sm:$0xff]  }
  0x13   :  { %v1261_v55 = vld [vmem:[%s1603_s0 + $0xa0] ss:$20 sps:$4 sm:$0xff]   ;;  %v1262_v56 = vld [vmem:[%s1603_s0 + $0xa8] ss:$20 sps:$4 sm:$0xff]   ;;  %v1268_v62 = vld [vmem:[%s1603_s0 + $0xd0] ss:$20 sps:$4 sm:$0xff]  }
  0x14   :  { %1034 = vmatpush3.bf16.msra.mxu0 %v1216_v18  ;;  %v1263_v57 = vld [vmem:[%s1603_s0 + $0xcc] ss:$20 sps:$4 sm:$0xff]   ;;  %v1265_v58 = vld [vmem:[%s1603_s0 + $0xd4] ss:$20 sps:$4 sm:$0xff]   ;;  %v52_v60 = vld [vmem:[%s1603_s0 + $0xf8] sm:$0x11] }
  0x15   :  { %1092 = vmatpush3.bf16.msra.mxu1 %v1217_v19  ;;  %1035 = vmatprep.subr.bf16.mxu0 %v1218_v20  ;;  %v51_v59 = vld [vmem:[%s1603_s0 + $0xf0] sm:$0x11]  ;;  %v1267_v61 = vld [vmem:[%s1603_s0 + $0xc8] ss:$20 sps:$4 sm:$0xff]   ;;  %v919_v0 = vcombine.high %v52_v60, %v52_v60  ;;  %v918_v2 = vcombine.low %v52_v60, %v52_v60  ;;  %v1276_v5 = vld [vmem:[%s1603_s0 + $0x38] ss:$20 sps:$4 sm:$0xff]  }
  0x16   :  { %1093 = vmatprep.subr.bf16.mxu1 %v1219_v21  ;;  %v917_v63 = vcombine.high %v51_v59, %v51_v59  ;;  %v916_v1 = vcombine.low %v51_v59, %v51_v59  ;;  %v1274_v3 = vld [vmem:[%s1603_s0 + $0x10] ss:$20 sps:$4 sm:$0xff]   ;;  %v1277_v6 = vld [vmem:[%s1603_s0 + $0xd8] ss:$20 sps:$4 sm:$0xff]   ;;  %v1278_v7 = vld [vmem:[%s1603_s0 + $0x60] ss:$20 sps:$4 sm:$0xff]  }
  0x17   :  { %v1275_v4 = vld [vmem:[%s1603_s0 + $0xb0] ss:$20 sps:$4 sm:$0xff]   ;;  %v1279_v8 = vld [vmem:[%s1603_s0 + $0x100] ss:$0 sps:$4 sm:$0x11]  }
  0x18   :  { %1036 = vmatpush3.bf16.msra.mxu0 %v1220_v22  ;;  %v1280_v9 = vld [vmem:[%s1603_s0 + $0x88] ss:$20 sps:$4 sm:$0xff]   ;;  %v1542_v11 = vld [vmem:[%s1604_s2] ss:$0 sm:$0xff] }
  0x19   :  { %1094 = vmatpush3.bf16.msra.mxu1 %v1221_v23  ;;  %1037 = vmatprep.subr.bf16.mxu0 %v1222_v24 }
  0x1a   :  { %1095 = vmatprep.subr.bf16.mxu1 %v1223_v25 }
  0x1c   :  { %1038 = vmatpush3.bf16.msra.mxu0 %v1224_v26 }
  0x1d   :  { %1096 = vmatpush3.bf16.msra.mxu1 %v1225_v27  ;;  %1039 = vmatprep.subr.bf16.mxu0 %v1226_v28 }
  0x1e   :  { %1097 = vmatprep.subr.bf16.mxu1 %v1227_v29 }
  0x20   :  { %1040 = vmatpush3.bf16.msra.mxu0 %v1228_v30 }
  0x21   :  { %1098 = vmatpush3.bf16.msra.mxu1 %v1229_v31  ;;  %1152 = vmatprep.subr.bf16.mxu0 %v1281_v34 }
  0x22   :  { %1188 = vmatprep.subr.bf16.mxu1 %v1281_v34 }
  0x23   :  { %571 = vmatmul.mubr.bf16.vlgmr.msra.gmra.mrb[0].mxu0 %v1230_v32 }
  0x24   :  { %659 = vmatmul.mubr.bf16.vlgmr.msra.gmra.mrb[0].mxu1 %v1233_v35  ;;  %1153 = vmatpush3.bf16.msra.mxu0 %v1236_v37 }
  0x25   :  { %578 = vmatprep.mubr.bf16.mxu0 %v1237_v38  ;;  %1192 = vmatpush3.bf16.msra.mxu1 %v1236_v37 }
  0x26   :  { %666 = vmatprep.mubr.bf16.mxu1 %v1239_v39  ;;  %1154 = vmatprep.subr.bf16.mxu0 %v1281_v34 }
  0x27   :  { %1189 = vmatprep.subr.bf16.mxu1 %v1281_v34 }
  0x28   :  { %1155 = vmatpush3.bf16.msra.mxu0 %v1247_v43 }
  0x29   :  { %1193 = vmatpush3.bf16.msra.mxu1 %v1247_v43  ;;  %1156 = vmatprep.subr.bf16.mxu0 %v1281_v34 }
  0x2a   :  { %1190 = vmatprep.subr.bf16.mxu1 %v1281_v34 }
  0x2b   :  { %579 = vmatmul.mubr.bf16.gmra.mrb[4].mxu0 %v1241_v40 }
  0x2c   :  { %667 = vmatmul.mubr.bf16.gmra.mrb[4].mxu1 %v1242_v41  ;;  %586 = vmatprep.mubr.bf16.mxu0 %v1243_v42 }
  0x2d   :  { %674 = vmatprep.mubr.bf16.mxu1 %v1245_v44  ;;  %1157 = vmatpush3.bf16.msra.mxu0 %v1256_v45 }
  0x2e   :  { %1194 = vmatpush3.bf16.msra.mxu1 %v1256_v45  ;;  %1158 = vmatprep.subr.bf16.mxu0 %v1281_v34 }
  0x2f   :  { %1191 = vmatprep.subr.bf16.mxu1 %v1281_v34 }
  0x31   :  { %1159 = vmatpush3.bf16.msra.mxu0 %v1269_v50 }
  0x32   :  { %1195 = vmatpush3.bf16.msra.mxu1 %v1269_v50 }
  0x33   :  { %587 = vmatmul.mubr.bf16.gmra.mrb[8].mxu0 %v1248_v46 }
  0x34   :  { %675 = vmatmul.mubr.bf16.gmra.mrb[8].mxu1 %v1249_v47  ;;  %594 = vmatprep.mubr.bf16.mxu0 %v1250_v48 }
  0x35   :  { %682 = vmatprep.mubr.bf16.mxu1 %v1252_v49 }
  0x3b   :  { %595 = vmatmul.mubr.bf16.gmra.mrb[12].mxu0 %v1254_v51 }
  0x3c   :  { %683 = vmatmul.mubr.bf16.gmra.mrb[12].mxu1 %v1255_v52  ;;  %602 = vmatprep.mubr.bf16.mxu0 %v1257_v53 }
  0x3d   :  { %690 = vmatprep.mubr.bf16.mxu1 %v1259_v54 }
  0x43   :  { %603 = vmatmul.mubr.bf16.gmra.mrb[16].mxu0 %v1261_v55 }
  0x44   :  { %691 = vmatmul.mubr.bf16.gmra.mrb[16].mxu1 %v1262_v56  ;;  %610 = vmatprep.mubr.bf16.mxu0 %v1263_v57 }
  0x45   :  { %698 = vmatprep.mubr.bf16.mxu1 %v1265_v58 }
  0x4b   :  { %611 = vmatmul.mubr.bf16.gmra.mrb[20].mxu0 %v1267_v61 }
  0x4c   :  { %699 = vmatmul.mubr.bf16.gmra.mrb[20].mxu1 %v1268_v62  ;;  %618 = vmatprep.mubr.bf16.mxu0 %v917_v63 }
  0x4d   :  { %706 = vmatprep.mubr.bf16.mxu1 %v919_v0 }
  0x53   :  { %619 = vmatmul.mubr.bf16.gmra.mrb[24].mxu0 %v916_v1 }
  0x54   :  { %707 = vmatmul.mubr.bf16.gmra.mrb[24].mxu1 %v918_v2  ;;  %1160 = vmatprep.mubr.msk.bf16.mxu0 %vm1282_vm0, %v1281_v34 }
  0x55   :  { %1176 = vmatprep.mubr.msk.bf16.mxu1 %vm1282_vm0, %v1281_v34 }
  0x5b   :  { %1161 = vmatmul.mubr.msk.bf16.vlgmr.msra.gmra.mrb[28].mxu0 %vm516_vm1, %v1274_v3 }
  0x5c   :  { %1177 = vmatmul.mubr.msk.bf16.vlgmr.msra.gmra.mrb[28].mxu1 %vm516_vm1, %v1275_v4  ;;  %1164 = vmatprep.mubr.msk.bf16.mxu0 %vm1282_vm0, %v1281_v34 }
  0x5d   :  { %1180 = vmatprep.mubr.msk.bf16.mxu1 %vm1282_vm0, %v1281_v34 }
  0x63   :  { %1165 = vmatmul.mubr.msk.bf16.gmra.mrb[32].mxu0 %vm516_vm1, %v1276_v5 }
  0x64   :  { %1181 = vmatmul.mubr.msk.bf16.gmra.mrb[32].mxu1 %vm516_vm1, %v1277_v6  ;;  %1168 = vmatprep.mubr.msk.bf16.mxu0 %vm1282_vm0, %v1281_v34 }
  0x65   :  { %1184 = vmatprep.mubr.msk.bf16.mxu1 %vm1282_vm0, %v1281_v34 }
  0x6b   :  { %1169 = vmatmul.mubr.msk.bf16.gmra.mrb[36].mxu0 %vm516_vm1, %v1278_v7 }
  0x6c   :  { %1185 = vmatmul.mubr.msk.bf16.gmra.mrb[36].mxu1 %vm516_vm1, %v1279_v8  ;;  %1172 = vmatprep.mubr.msk.bf16.mxu0 %vm1282_vm0, %v1281_v34 }
  0x73   :  { %1173 = vmatmul.mubr.msk.bf16.gmra.mrb[40].mxu0 %vm516_vm1, %v1280_v9 }
  0xf6   :  { %v1041_v10 = vpop.f32.mrb[0].mxu0 }
  0xf7   :  { %v1042_v12 = vpop.f32.mrb[1].mxu0  ;;  %v1099_v13 = vpop.f32.mrb[0].mxu1 }
  0xf8   :  { %v1043_v14 = vadd.f32 %v1042_v12, %v1041_v10  ;;  %v1044_v15 = vpop.f32.mrb[2].mxu0  ;;  %v1100_v16 = vpop.f32.mrb[1].mxu1 }
  0xf9   :  { %v1045_v17 = vpop.f32.mrb[3].mxu0  ;;  %v1101_v18 = vadd.f32 %v1100_v16, %v1099_v13  ;;  %v1102_v19 = vpop.f32.mrb[2].mxu1 }
  0xfa   :  { %v573_v20 = vadd.f32 %v1043_v14, %v1542_v11  ;;  %v1046_v21 = vadd.f32 %v1045_v17, %v1044_v15  ;;  %v1103_v22 = vpop.f32.mrb[3].mxu1 }
  0xfb   :  { %v1104_v23 = vadd.f32 %v1103_v22, %v1102_v19 }
  0xfc   :  { %v576_v24 = vadd.f32 %v1046_v21, %v1542_v11  ;;  %v1546_v25 = vadd.f32 %v1101_v18, %v573_v20 }
  0xfe   :  { %v1047_v26 = vpop.f32.mrb[4].mxu0  ;;  %v1548_v27 = vadd.f32 %v1104_v23, %v576_v24 }
  0xff   :  { %v1048_v28 = vpop.f32.mrb[5].mxu0  ;;  %v1105_v29 = vpop.f32.mrb[4].mxu1 }
 0x100   :  { %v1049_v30 = vadd.f32 %v1048_v28, %v1047_v26  ;;  %v1050_v31 = vpop.f32.mrb[6].mxu0  ;;  %v1106_v32 = vpop.f32.mrb[5].mxu1 }
 0x101   :  { %v1051_v33 = vpop.f32.mrb[7].mxu0  ;;  %v1107_v34 = vadd.f32 %v1106_v32, %v1105_v29  ;;  %v1108_v35 = vpop.f32.mrb[6].mxu1 }
 0x102   :  { %v581_v36 = vadd.f32 %v1049_v30, %v1542_v11  ;;  %v1052_v37 = vadd.f32 %v1051_v33, %v1050_v31  ;;  %v1109_v38 = vpop.f32.mrb[7].mxu1 }
 0x103   :  { %v1110_v39 = vadd.f32 %v1109_v38, %v1108_v35 }
 0x104   :  { %v584_v40 = vadd.f32 %v1052_v37, %v1542_v11  ;;  %v1552_v41 = vadd.f32 %v1107_v34, %v581_v36 }
 0x106   :  { %v1053_v42 = vpop.f32.mrb[8].mxu0  ;;  %v1554_v43 = vadd.f32 %v1110_v39, %v584_v40 }
 0x107   :  { %v1054_v44 = vpop.f32.mrb[9].mxu0  ;;  %v1111_v45 = vpop.f32.mrb[8].mxu1 }
 0x108   :  { %v1055_v46 = vadd.f32 %v1054_v44, %v1053_v42  ;;  %v1056_v47 = vpop.f32.mrb[10].mxu0  ;;  %v1112_v48 = vpop.f32.mrb[9].mxu1 }
 0x109   :  { %v1057_v49 = vpop.f32.mrb[11].mxu0  ;;  %v1113_v50 = vadd.f32 %v1112_v48, %v1111_v45  ;;  %v1114_v51 = vpop.f32.mrb[10].mxu1 }
 0x10a   :  { %v589_v52 = vadd.f32 %v1055_v46, %v1542_v11  ;;  %v1058_v53 = vadd.f32 %v1057_v49, %v1056_v47  ;;  %v1115_v54 = vpop.f32.mrb[11].mxu1 }
 0x10b   :  { %v1116_v55 = vadd.f32 %v1115_v54, %v1114_v51 }
 0x10c   :  { %v592_v56 = vadd.f32 %v1058_v53, %v1542_v11  ;;  %v1558_v57 = vadd.f32 %v1113_v50, %v589_v52 }
 0x10e   :  { %v1059_v58 = vpop.f32.mrb[12].mxu0  ;;  %v1560_v59 = vadd.f32 %v1116_v55, %v592_v56 }
 0x10f   :  { %v1060_v60 = vpop.f32.mrb[13].mxu0  ;;  %v1117_v61 = vpop.f32.mrb[12].mxu1 }
 0x110   :  { %v1061_v62 = vadd.f32 %v1060_v60, %v1059_v58  ;;  %v1062_v63 = vpop.f32.mrb[14].mxu0  ;;  %v1118_v0 = vpop.f32.mrb[13].mxu1 }
 0x111   :  { %v1063_v1 = vpop.f32.mrb[15].mxu0  ;;  %v1119_v2 = vadd.f32 %v1118_v0, %v1117_v61  ;;  %v1120_v3 = vpop.f32.mrb[14].mxu1 }
 0x112   :  { %v597_v4 = vadd.f32 %v1061_v62, %v1542_v11  ;;  %v1064_v5 = vadd.f32 %v1063_v1, %v1062_v63  ;;  %v1121_v6 = vpop.f32.mrb[15].mxu1 }
 0x113   :  { %v1122_v7 = vadd.f32 %v1121_v6, %v1120_v3 }
 0x114   :  { %v600_v8 = vadd.f32 %v1064_v5, %v1542_v11  ;;  %v1564_v9 = vadd.f32 %v1119_v2, %v597_v4 }
 0x116   :  { %v1065_v10 = vpop.f32.mrb[16].mxu0  ;;  %v1566_v12 = vadd.f32 %v1122_v7, %v600_v8 }
 0x117   :  { %v1066_v13 = vpop.f32.mrb[17].mxu0  ;;  %v1123_v14 = vpop.f32.mrb[16].mxu1 }
 0x118   :  { %v1067_v15 = vadd.f32 %v1066_v13, %v1065_v10  ;;  %v1068_v16 = vpop.f32.mrb[18].mxu0  ;;  %v1124_v17 = vpop.f32.mrb[17].mxu1 }
 0x119   :  { %v1069_v18 = vpop.f32.mrb[19].mxu0  ;;  %v1125_v19 = vadd.f32 %v1124_v17, %v1123_v14  ;;  %v1126_v20 = vpop.f32.mrb[18].mxu1 }
 0x11a   :  { %v605_v21 = vadd.f32 %v1067_v15, %v1542_v11  ;;  %v1070_v22 = vadd.f32 %v1069_v18, %v1068_v16  ;;  %v1127_v23 = vpop.f32.mrb[19].mxu1 }
 0x11b   :  { %v1128_v24 = vadd.f32 %v1127_v23, %v1126_v20 }
 0x11c   :  { %v608_v26 = vadd.f32 %v1070_v22, %v1542_v11  ;;  %v693_v28 = vadd.f32 %v1125_v19, %v605_v21 }
 0x11e   :  { %v1071_v29 = vpop.f32.mrb[20].mxu0  ;;  %v696_v30 = vadd.f32 %v1128_v24, %v608_v26 }
 0x11f   :  { %v1072_v31 = vpop.f32.mrb[21].mxu0  ;;  %v1129_v32 = vpop.f32.mrb[20].mxu1 }
 0x120   :  { %v1073_v33 = vadd.f32 %v1072_v31, %v1071_v29  ;;  %v1074_v34 = vpop.f32.mrb[22].mxu0  ;;  %v1130_v35 = vpop.f32.mrb[21].mxu1 }
 0x121   :  { %v1075_v36 = vpop.f32.mrb[23].mxu0  ;;  %v1131_v37 = vadd.f32 %v1130_v35, %v1129_v32  ;;  %v1132_v38 = vpop.f32.mrb[22].mxu1 }
 0x122   :  { %v613_v39 = vadd.f32 %v1073_v33, %v1542_v11  ;;  %v1076_v40 = vadd.f32 %v1075_v36, %v1074_v34  ;;  %v1133_v42 = vpop.f32.mrb[23].mxu1 }
 0x123   :  { %v1134_v44 = vadd.f32 %v1133_v42, %v1132_v38 }
 0x124   :  { %v616_v45 = vadd.f32 %v1076_v40, %v1542_v11  ;;  %v701_v46 = vadd.f32 %v1131_v37, %v613_v39 }
 0x126   :  { %v1077_v47 = vpop.f32.mrb[24].mxu0  ;;  %v704_v48 = vadd.f32 %v1134_v44, %v616_v45 }
 0x127   :  { %v1078_v49 = vpop.f32.mrb[25].mxu0  ;;  %v1135_v50 = vpop.f32.mrb[24].mxu1 }
 0x128   :  { %v1079_v51 = vadd.f32 %v1078_v49, %v1077_v47  ;;  %v1080_v52 = vpop.f32.mrb[26].mxu0  ;;  %v1136_v53 = vpop.f32.mrb[25].mxu1 }
 0x129   :  { %v1081_v54 = vpop.f32.mrb[27].mxu0  ;;  %v1137_v55 = vadd.f32 %v1136_v53, %v1135_v50  ;;  %v1138_v56 = vpop.f32.mrb[26].mxu1 }
 0x12a   :  { %v621_v58 = vadd.f32 %v1079_v51, %v1542_v11  ;;  %v1139_v60 = vpop.f32.mrb[27].mxu1 }
 0x12c   :  { %v709_v61 = vadd.f32 %v1137_v55, %v621_v58 }
 0x12e   :  { %v748_v62 = vpop.f32.mrb[28].mxu0 }
 0x12f   :  { %v749_v63 = vadd.f32 %v748_v62, %v1546_v25  ;;  %v780_v0 = vpop.f32.mrb[28].mxu1  ;;  %v1162_v1 = vpop.f32.mrb[29].mxu0 }
 0x130   :  { %v781_v2 = vadd.f32 %v780_v0, %v693_v28  ;;  %v1178_v3 = vpop.f32.mrb[29].mxu1  ;;  %v751_v4 = vpop.f32.mrb[30].mxu0 }
 0x131   :  { %v752_v5 = vadd.f32 %v751_v4, %v1548_v27  ;;  %v783_v6 = vpop.f32.mrb[30].mxu1  ;;  %v1163_v7 = vpop.f32.mrb[31].mxu0  ;;  %v802_v13 = vmax.f32 %v749_v63, 0.0 }
 0x132   :  { %v784_v8 = vadd.f32 %v783_v6, %v696_v30  ;;  %v1179_v10 = vpop.f32.mrb[31].mxu1  ;;  %v810_v15 = vmax.f32 %v781_v2, 0.0 }
 0x133   :  { %v803_v14 = vmax.f32 %v752_v5, 0.0 }
 0x134   :  { %v811_v11 = vmax.f32 %v784_v8, 0.0 }
 0x135   :  { %v993_v16 = vpack.c.bf16 %v803_v14, %v802_v13 }
 0x136   :  { %v1013_v17 = vpack.c.bf16 %v811_v11, %v810_v15  ;;  %v756_v18 = vpop.f32.mrb[32].mxu0 }
 0x137   :  { %994 = vst [vmem:[%s1605_s3] sm:$0xff] %v993_v16   ;;  %v757_v25 = vadd.f32 %v756_v18, %v1552_v41  ;;  %v788_v19 = vpop.f32.mrb[32].mxu1  ;;  %v1166_v20 = vpop.f32.mrb[33].mxu0 }
 0x138   :  { %1023 = vst [vmem:[%s1605_s3 + $0x20] sm:$0xff] %v1013_v17   ;;  %v789_v27 = vadd.f32 %v788_v19, %v701_v46  ;;  %v1182_v21 = vpop.f32.mrb[33].mxu1  ;;  %v759_v22 = vpop.f32.mrb[34].mxu0 }
 0x139   :  { %v760_v23 = vadd.f32 %v759_v22, %v1554_v43  ;;  %v791_v24 = vpop.f32.mrb[34].mxu1  ;;  %v1167_v26 = vpop.f32.mrb[35].mxu0  ;;  %v804_v30 = vmax.f32 %v757_v25, 0.0 }
 0x13a   :  { %v792_v28 = vadd.f32 %v791_v24, %v704_v48  ;;  %v1183_v29 = vpop.f32.mrb[35].mxu1  ;;  %v812_v32 = vmax.f32 %v789_v27, 0.0 }
 0x13b   :  { %v805_v31 = vmax.f32 %v760_v23, 0.0 }
 0x13c   :  { %v813_v33 = vmax.f32 %v792_v28, 0.0 }
 0x13d   :  { %v998_v41 = vpack.c.bf16 %v805_v31, %v804_v30 }
 0x13e   :  { %v1018_v34 = vpack.c.bf16 %v813_v33, %v812_v32  ;;  %v764_v35 = vpop.f32.mrb[36].mxu0 }
 0x13f   :  { %1020 = vst [vmem:[%s1605_s3 + $0x8] sm:$0xff] %v998_v41   ;;  %v765_v36 = vadd.f32 %v764_v35, %v1558_v57  ;;  %v796_v37 = vpop.f32.mrb[36].mxu1  ;;  %v1170_v38 = vpop.f32.mrb[37].mxu0 }
 0x140   :  { %1024 = vst [vmem:[%s1605_s3 + $0x28] sm:$0xff] %v1018_v34   ;;  %v797_v43 = vadd.f32 %v796_v37, %v709_v61  ;;  %v767_v39 = vpop.f32.mrb[38].mxu0  ;;  %v1186_v40 = vpop.f32.mrb[37].mxu1 }
 0x141   :  { %v768_v42 = vadd.f32 %v767_v39, %v1560_v59  ;;  %v1171_v44 = vpop.f32.mrb[39].mxu0  ;;  %v799_v45 = vpop.f32.mrb[38].mxu1  ;;  %v806_v48 = vmax.f32 %v765_v36, 0.0 }
 0x142   :  { %v814_v46 = vmax.f32 %v797_v43, 0.0  ;;  %v1187_v47 = vpop.f32.mrb[39].mxu1 }
 0x143   :  { %v807_v49 = vmax.f32 %v768_v42, 0.0 }
 0x144   :  { %v989_v50 = vpack.c.bf16 %v814_v46, %v814_v46 }
 0x145   :  { %v1003_v51 = vpack.c.bf16 %v807_v49, %v806_v48 }
 0x146   :  { %880 = vst [vmem:[%s1605_s3 + $0x30] sm:$0x1] %v989_v50  ;;  %v772_v57 = vpop.f32.mrb[40].mxu0 }
 0x147   :  { %1021 = vst [vmem:[%s1605_s3 + $0x10] sm:$0xff] %v1003_v51   ;;  %v773_v52 = vadd.f32 %v772_v57, %v1564_v9  ;;  %v1174_v59 = vpop.f32.mrb[41].mxu0 }
 0x148   :  { %v775_v53 = vpop.f32.mrb[42].mxu0 }
 0x149   :  { %v776_v54 = vadd.f32 %v775_v53, %v1566_v12  ;;  %v1175_v55 = vpop.f32.mrb[43].mxu0  ;;  %v808_v56 = vmax.f32 %v773_v52, 0.0 }
 0x14b   :  { %v809_v58 = vmax.f32 %v776_v54, 0.0 }
 0x14d   :  { %v1008_v60 = vpack.c.bf16 %v809_v58, %v808_v56 }
 0x14f   :  { %1022 = vst [vmem:[%s1605_s3 + $0x18] sm:$0xff] %v1008_v60  }

// kernel: cnn_actor_forward.7
= control target key start
LH: loop header
LB: loop body
LE: loop exit
PB: predicated region body
PF: predicated region fallthrough
CT: control target
= control target key end

     0   :  { %v812_v36 = vlaneseq  ;;  %v8597_v37 = vmov 1966171168   ;;  %s11242_s0 = inlined_call_operand.vmem [shape: bf16[2,3136], index: 0, kind: input, shape index: {}]   ;;  %s11243_s1 = inlined_call_operand.vmem [shape: bf16[3136,512], index: 1, kind: input, shape index: {}]   ;;  %s11244_s2 = inlined_call_operand.vmem [shape: f32[1,512], index: 2, kind: input, shape index: {}]   ;;  %s11245_s3 = inlined_call_operand.vmem [shape: bf16[512,18], index: 3, kind: input, shape index: {}]   ;;  %s11246_s4 = inlined_call_operand.vmem [shape: f32[1,18], index: 4, kind: input, shape index: {}]   ;;  %s11247_s5 = inlined_call_operand.hbm [shape: f32[2,18], index: 5, kind: output, shape index: {}]  }
   0x1   :  { %v7356_v0 = vld [vmem:[%s11243_s1 + $0x4] ss:$16 sps:$4 sm:$0xff]   ;;  %v7358_v1 = vld [vmem:[%s11243_s1 + $0xc] ss:$16 sps:$4 sm:$0xff]   ;;  %v7360_v2 = vld [vmem:[%s11243_s1] ss:$16 sps:$4 sm:$0xff]   ;;  %v838_v38 = vunpack.c.l.s4 %v8597_v37 }
   0x2   :  { %4945 = vmatprep.subr.bf16.mxu0 %v7356_v0  ;;  %v7361_v3 = vld [vmem:[%s11243_s1 + $0x8] ss:$16 sps:$4 sm:$0xff]   ;;  %5478 = vmatprep.subr.bf16.mxu1 %v7358_v1  ;;  %v7362_v4 = vld [vmem:[%s11243_s1 + $0x24] ss:$16 sps:$4 sm:$0xff]   ;;  %v7364_v5 = vld [vmem:[%s11243_s1 + $0x2c] ss:$16 sps:$4 sm:$0xff]  }
   0x3   :  { %4946 = vmatpush1.bf16.msra.mxu0 %v7360_v2  ;;  %5479 = vmatpush1.bf16.msra.mxu1 %v7361_v3  ;;  %v7366_v6 = vld [vmem:[%s11243_s1 + $0x20] ss:$16 sps:$4 sm:$0xff]   ;;  %v7367_v7 = vld [vmem:[%s11243_s1 + $0x28] ss:$16 sps:$4 sm:$0xff]   ;;  %v7368_v8 = vld [vmem:[%s11243_s1 + $0x44] ss:$16 sps:$4 sm:$0xff]   ;;  %v839_v43 = vunpack.c.0.s8 %v838_v38 }
   0x4   :  { %4947 = vmatprep.subr.bf16.mxu0 %v7362_v4  ;;  %5480 = vmatprep.subr.bf16.mxu1 %v7364_v5  ;;  %v7370_v9 = vld [vmem:[%s11243_s1 + $0x4c] ss:$16 sps:$4 sm:$0xff]   ;;  %v7372_v10 = vld [vmem:[%s11243_s1 + $0x40] ss:$16 sps:$4 sm:$0xff]   ;;  %v7373_v11 = vld [vmem:[%s11243_s1 + $0x48] ss:$16 sps:$4 sm:$0xff]  }
   0x5   :  { %v7374_v12 = vld [vmem:[%s11243_s1 + $0x64] ss:$16 sps:$4 sm:$0xff]   ;;  %v7376_v13 = vld [vmem:[%s11243_s1 + $0x6c] ss:$16 sps:$4 sm:$0xff]   ;;  %v7378_v14 = vld [vmem:[%s11243_s1 + $0x60] ss:$16 sps:$4 sm:$0xff]  }
   0x6   :  { %v7379_v15 = vld [vmem:[%s11243_s1 + $0x68] ss:$16 sps:$4 sm:$0xff]   ;;  %v7380_v16 = vld [vmem:[%s11243_s1 + $0x84] ss:$16 sps:$4 sm:$0xff]   ;;  %v7382_v17 = vld [vmem:[%s11243_s1 + $0x8c] ss:$16 sps:$4 sm:$0xff]  }
   0x7   :  { %4948 = vmatpush1.bf16.msra.mxu0 %v7366_v6  ;;  %5481 = vmatpush1.bf16.msra.mxu1 %v7367_v7  ;;  %v7384_v18 = vld [vmem:[%s11243_s1 + $0x80] ss:$16 sps:$4 sm:$0xff]   ;;  %v7385_v19 = vld [vmem:[%s11243_s1 + $0x88] ss:$16 sps:$4 sm:$0xff]   ;;  %v7386_v20 = vld [vmem:[%s11243_s1 + $0xa4] ss:$16 sps:$4 sm:$0xff]  }
   0x8   :  { %4949 = vmatprep.subr.bf16.mxu0 %v7368_v8  ;;  %5482 = vmatprep.subr.bf16.mxu1 %v7370_v9  ;;  %v7388_v21 = vld [vmem:[%s11243_s1 + $0xac] ss:$16 sps:$4 sm:$0xff]   ;;  %v7390_v22 = vld [vmem:[%s11243_s1 + $0xa0] ss:$16 sps:$4 sm:$0xff]   ;;  %v7391_v23 = vld [vmem:[%s11243_s1 + $0xa8] ss:$16 sps:$4 sm:$0xff]  }
   0x9   :  { %v7392_v24 = vld [vmem:[%s11243_s1 + $0xc4] ss:$16 sps:$4 sm:$0xff]   ;;  %v7394_v25 = vld [vmem:[%s11243_s1 + $0xcc] ss:$16 sps:$4 sm:$0xff]   ;;  %v7396_v26 = vld [vmem:[%s11243_s1 + $0xc0] ss:$16 sps:$4 sm:$0xff]  }
   0xa   :  { %v7397_v27 = vld [vmem:[%s11243_s1 + $0xc8] ss:$16 sps:$4 sm:$0xff]   ;;  %v7398_v28 = vld [vmem:[%s11243_s1 + $0xe4] ss:$16 sps:$4 sm:$0xff]   ;;  %v7400_v29 = vld [vmem:[%s11243_s1 + $0xec] ss:$16 sps:$4 sm:$0xff]  }
   0xb   :  { %4950 = vmatpush1.bf16.msra.mxu0 %v7372_v10  ;;  %5483 = vmatpush1.bf16.msra.mxu1 %v7373_v11  ;;  %v7402_v30 = vld [vmem:[%s11243_s1 + $0xe0] ss:$16 sps:$4 sm:$0xff]   ;;  %v7403_v31 = vld [vmem:[%s11243_s1 + $0xe8] ss:$16 sps:$4 sm:$0xff]   ;;  %v7404_v32 = vld [vmem:[%s11243_s1 + $0x104] ss:$16 sps:$4 sm:$0xff]  }
   0xc   :  { %4951 = vmatprep.subr.bf16.mxu0 %v7374_v12  ;;  %5484 = vmatprep.subr.bf16.mxu1 %v7376_v13  ;;  %v7406_v33 = vld [vmem:[%s11243_s1 + $0x10c] ss:$16 sps:$4 sm:$0xff]   ;;  %v7408_v34 = vld [vmem:[%s11243_s1 + $0x100] ss:$16 sps:$4 sm:$0xff]   ;;  %v7409_v35 = vld [vmem:[%s11243_s1 + $0x108] ss:$16 sps:$4 sm:$0xff]  }
   0xd   :  { %v7410_v39 = vld [vmem:[%s11243_s1 + $0x124] ss:$16 sps:$4 sm:$0xff]   ;;  %v7412_v40 = vld [vmem:[%s11243_s1 + $0x12c] ss:$16 sps:$4 sm:$0xff]   ;;  %v7414_v41 = vld [vmem:[%s11243_s1 + $0x120] ss:$16 sps:$4 sm:$0xff]  }
   0xe   :  { %v8747_v42 = vshrl.u32 %v812_v36, 7  ;;  %v7415_v44 = vld [vmem:[%s11243_s1 + $0x128] ss:$16 sps:$4 sm:$0xff]   ;;  %v7416_v45 = vld [vmem:[%s11243_s1 + $0x144] ss:$16 sps:$4 sm:$0xff]  }
   0xf   :  { %4952 = vmatpush1.bf16.msra.mxu0 %v7378_v14  ;;  %5485 = vmatpush1.bf16.msra.mxu1 %v7379_v15  ;;  %v7418_v46 = vld [vmem:[%s11243_s1 + $0x14c] ss:$16 sps:$4 sm:$0xff]   ;;  %v7420_v47 = vld [vmem:[%s11243_s1 + $0x140] ss:$16 sps:$4 sm:$0xff]   ;;  %v7421_v48 = vld [vmem:[%s11243_s1 + $0x148] ss:$16 sps:$4 sm:$0xff]  }
  0x10   :  { %4953 = vmatprep.subr.bf16.mxu0 %v7380_v16  ;;  %5486 = vmatprep.subr.bf16.mxu1 %v7382_v17  ;;  %v8765_v49 = vsub.s32 %v839_v43, %v8747_v42  ;;  %v7422_v50 = vld [vmem:[%s11243_s1 + $0x164] ss:$16 sps:$4 sm:$0xff]   ;;  %v7424_v51 = vld [vmem:[%s11243_s1 + $0x16c] ss:$16 sps:$4 sm:$0xff]   ;;  %v7426_v53 = vld [vmem:[%s11243_s1 + $0x160] ss:$16 sps:$4 sm:$0xff]  }
  0x11   :  { %v8776_v52 = vld [vmem:[%s11242_s0] sm:$0xff]  ;;  %v7427_v55 = vld [vmem:[%s11243_s1 + $0x168] ss:$16 sps:$4 sm:$0xff]   ;;  %v7430_v57 = vld [vmem:[%s11243_s1 + $0x18c] ss:$16 sps:$4 sm:$0xff]  }
  0x12   :  { %v843_v54 = vrot.slane %v8776_v52, %v8765_v49  ;;  %v7428_v56 = vld [vmem:[%s11243_s1 + $0x184] ss:$16 sps:$4 sm:$0xff]   ;;  %v7432_v59 = vld [vmem:[%s11243_s1 + $0x180] ss:$16 sps:$4 sm:$0xff]   ;;  %v7433_v61 = vld [vmem:[%s11243_s1 + $0x188] ss:$16 sps:$4 sm:$0xff]  }
  0x13   :  { %4954 = vmatpush1.bf16.msra.mxu0 %v7384_v18  ;;  %5487 = vmatpush1.bf16.msra.mxu1 %v7385_v19  ;;  %v7434_v62 = vld [vmem:[%s11243_s1 + $0x1a4] ss:$16 sps:$4 sm:$0xff]   ;;  %v7436_v63 = vld [vmem:[%s11243_s1 + $0x1ac] ss:$16 sps:$4 sm:$0xff]   ;;  %v7438_v0 = vld [vmem:[%s11243_s1 + $0x1a0] ss:$16 sps:$4 sm:$0xff]  }
  0x14   :  { %4955 = vmatprep.subr.bf16.mxu0 %v7386_v20  ;;  %5488 = vmatprep.subr.bf16.mxu1 %v7388_v21  ;;  %v851_v58 = vcombine.high %v843_v54, %v843_v54  ;;  %v7439_v1 = vld [vmem:[%s11243_s1 + $0x1a8] ss:$16 sps:$4 sm:$0xff]   ;;  %v7440_v2 = vld [vmem:[%s11243_s1 + $0x1c4] ss:$16 sps:$4 sm:$0xff]   ;;  %v7442_v3 = vld [vmem:[%s11243_s1 + $0x1cc] ss:$16 sps:$4 sm:$0xff]   ;;  %v8845_v13 = vrot.slane %v843_v54, %v8765_v49 }
  0x15   :  { %v7444_v4 = vld [vmem:[%s11243_s1 + $0x1c0] ss:$16 sps:$4 sm:$0xff]   ;;  %v7445_v5 = vld [vmem:[%s11243_s1 + $0x1c8] ss:$16 sps:$4 sm:$0xff]   ;;  %v7446_v6 = vld [vmem:[%s11243_s1 + $0x1e4] ss:$16 sps:$4 sm:$0xff]  }
  0x16   :  { %v873_v60 = vrot.slane %v851_v58, %v8765_v49  ;;  %v7448_v7 = vld [vmem:[%s11243_s1 + $0x1ec] ss:$16 sps:$4 sm:$0xff]   ;;  %v7450_v8 = vld [vmem:[%s11243_s1 + $0x1e0] ss:$16 sps:$4 sm:$0xff]   ;;  %v7451_v9 = vld [vmem:[%s11243_s1 + $0x1e8] ss:$16 sps:$4 sm:$0xff]  }
  0x17   :  { %4956 = vmatpush1.bf16.msra.mxu0 %v7390_v22  ;;  %5489 = vmatpush1.bf16.msra.mxu1 %v7391_v23  ;;  %v7454_v10 = vld [vmem:[%s11243_s1 + $0x204] ss:$16 sps:$4 sm:$0xff]   ;;  %v7457_v11 = vld [vmem:[%s11243_s1 + $0x20c] ss:$16 sps:$4 sm:$0xff]   ;;  %v7452_v12 = vld [vmem:[%s11243_s1 + $0x200] ss:$16 sps:$4 sm:$0xff]  }
  0x18   :  { %4957 = vmatprep.subr.bf16.mxu0 %v7392_v24  ;;  %5490 = vmatprep.subr.bf16.mxu1 %v7394_v25  ;;  %v7455_v14 = vld [vmem:[%s11243_s1 + $0x208] ss:$16 sps:$4 sm:$0xff]   ;;  %v7460_v15 = vld [vmem:[%s11243_s1 + $0x224] ss:$16 sps:$4 sm:$0xff]   ;;  %v7463_v16 = vld [vmem:[%s11243_s1 + $0x22c] ss:$16 sps:$4 sm:$0xff]   ;;  %v883_v17 = vcombine.high %v873_v60, %v873_v60 }
  0x19   :  { %4977 = vmatprep.mubr.bf16.mxu0 %v873_v60  ;;  %5510 = vmatprep.mubr.bf16.mxu1 %v873_v60  ;;  %v7458_v18 = vld [vmem:[%s11243_s1 + $0x220] ss:$16 sps:$4 sm:$0xff]   ;;  %v7461_v19 = vld [vmem:[%s11243_s1 + $0x228] ss:$16 sps:$4 sm:$0xff]   ;;  %v7466_v20 = vld [vmem:[%s11243_s1 + $0x244] ss:$16 sps:$4 sm:$0xff]  }
  0x1a   :  { %v7469_v21 = vld [vmem:[%s11243_s1 + $0x24c] ss:$16 sps:$4 sm:$0xff]   ;;  %v7464_v22 = vld [vmem:[%s11243_s1 + $0x240] ss:$16 sps:$4 sm:$0xff]   ;;  %v7467_v23 = vld [vmem:[%s11243_s1 + $0x248] ss:$16 sps:$4 sm:$0xff]  }
  0x1b   :  { %4958 = vmatpush1.bf16.msra.mxu0 %v7396_v26  ;;  %5491 = vmatpush1.bf16.msra.mxu1 %v7397_v27  ;;  %v7472_v24 = vld [vmem:[%s11243_s1 + $0x264] ss:$16 sps:$4 sm:$0xff]   ;;  %v7475_v25 = vld [vmem:[%s11243_s1 + $0x26c] ss:$16 sps:$4 sm:$0xff]   ;;  %v7470_v26 = vld [vmem:[%s11243_s1 + $0x260] ss:$16 sps:$4 sm:$0xff]  }
  0x1c   :  { %4959 = vmatprep.subr.bf16.mxu0 %v7398_v28  ;;  %5492 = vmatprep.subr.bf16.mxu1 %v7400_v29  ;;  %v7473_v27 = vld [vmem:[%s11243_s1 + $0x268] ss:$16 sps:$4 sm:$0xff]   ;;  %v7478_v28 = vld [vmem:[%s11243_s1 + $0x284] ss:$16 sps:$4 sm:$0xff]   ;;  %v7481_v29 = vld [vmem:[%s11243_s1 + $0x28c] ss:$16 sps:$4 sm:$0xff]  }
  0x1d   :  { %v7490_v36 = vld [vmem:[%s11243_s1 + $0x2c4] ss:$16 sps:$4 sm:$0xff]   ;;  %v7493_v37 = vld [vmem:[%s11243_s1 + $0x2cc] ss:$16 sps:$4 sm:$0xff]   ;;  %v7488_v38 = vld [vmem:[%s11243_s1 + $0x2c0] ss:$16 sps:$4 sm:$0xff]  }
  0x1e   :  { %v7494_v43 = vld [vmem:[%s11243_s1 + $0x2e0] ss:$16 sps:$4 sm:$0xff]   ;;  %v7509_v54 = vld [vmem:[%s11243_s1 + $0x328] ss:$16 sps:$4 sm:$0xff]   ;;  %v7523_v60 = vld [vmem:[%s11243_s1 + $0x36c] ss:$16 sps:$4 sm:$0xff]  }
  0x1f   :  { %4960 = vmatpush1.bf16.msra.mxu0 %v7402_v30  ;;  %5493 = vmatpush1.bf16.msra.mxu1 %v7403_v31  ;;  %v7476_v30 = vld [vmem:[%s11243_s1 + $0x280] ss:$16 sps:$4 sm:$0xff]   ;;  %v7479_v31 = vld [vmem:[%s11243_s1 + $0x288] ss:$16 sps:$4 sm:$0xff]  }
  0x20   :  { %4961 = vmatprep.subr.bf16.mxu0 %v7404_v32  ;;  %5494 = vmatprep.subr.bf16.mxu1 %v7406_v33  ;;  %v7484_v32 = vld [vmem:[%s11243_s1 + $0x2a4] ss:$16 sps:$4 sm:$0xff]   ;;  %v7487_v33 = vld [vmem:[%s11243_s1 + $0x2ac] ss:$16 sps:$4 sm:$0xff]   ;;  %v7515_v58 = vld [vmem:[%s11243_s1 + $0x348] ss:$16 sps:$4 sm:$0xff]  }
  0x23   :  { %4962 = vmatpush1.bf16.msra.mxu0 %v7408_v34  ;;  %5495 = vmatpush1.bf16.msra.mxu1 %v7409_v35  ;;  %v7482_v34 = vld [vmem:[%s11243_s1 + $0x2a0] ss:$16 sps:$4 sm:$0xff]   ;;  %v7485_v35 = vld [vmem:[%s11243_s1 + $0x2a8] ss:$16 sps:$4 sm:$0xff]  }
  0x24   :  { %4963 = vmatprep.subr.bf16.mxu0 %v7410_v39  ;;  %5496 = vmatprep.subr.bf16.mxu1 %v7412_v40  ;;  %v7491_v39 = vld [vmem:[%s11243_s1 + $0x2c8] ss:$16 sps:$4 sm:$0xff]   ;;  %v7496_v40 = vld [vmem:[%s11243_s1 + $0x2e4] ss:$16 sps:$4 sm:$0xff]  }
  0x27   :  { %4964 = vmatpush1.bf16.msra.mxu0 %v7414_v41  ;;  %5497 = vmatpush1.bf16.msra.mxu1 %v7415_v44  ;;  %v7499_v41 = vld [vmem:[%s11243_s1 + $0x2ec] ss:$16 sps:$4 sm:$0xff]   ;;  %v7497_v44 = vld [vmem:[%s11243_s1 + $0x2e8] ss:$16 sps:$4 sm:$0xff]  }
  0x28   :  { %4965 = vmatprep.subr.bf16.mxu0 %v7416_v45  ;;  %5498 = vmatprep.subr.bf16.mxu1 %v7418_v46  ;;  %v7502_v45 = vld [vmem:[%s11243_s1 + $0x304] ss:$16 sps:$4 sm:$0xff]   ;;  %v7505_v46 = vld [vmem:[%s11243_s1 + $0x30c] ss:$16 sps:$4 sm:$0xff]  }
  0x2b   :  { %4966 = vmatpush1.bf16.msra.mxu0 %v7420_v47  ;;  %5499 = vmatpush1.bf16.msra.mxu1 %v7421_v48  ;;  %v7500_v47 = vld [vmem:[%s11243_s1 + $0x300] ss:$16 sps:$4 sm:$0xff]   ;;  %v7503_v48 = vld [vmem:[%s11243_s1 + $0x308] ss:$16 sps:$4 sm:$0xff]  }
  0x2c   :  { %4967 = vmatprep.subr.bf16.mxu0 %v7422_v50  ;;  %5500 = vmatprep.subr.bf16.mxu1 %v7424_v51  ;;  %v7508_v50 = vld [vmem:[%s11243_s1 + $0x324] ss:$16 sps:$4 sm:$0xff]   ;;  %v7511_v51 = vld [vmem:[%s11243_s1 + $0x32c] ss:$16 sps:$4 sm:$0xff]  }
  0x2f   :  { %4968 = vmatpush1.bf16.msra.mxu0 %v7426_v53  ;;  %5501 = vmatpush1.bf16.msra.mxu1 %v7427_v55  ;;  %v7506_v53 = vld [vmem:[%s11243_s1 + $0x320] ss:$16 sps:$4 sm:$0xff]   ;;  %v7514_v55 = vld [vmem:[%s11243_s1 + $0x344] ss:$16 sps:$4 sm:$0xff]  }
  0x30   :  { %4969 = vmatprep.subr.bf16.mxu0 %v7428_v56  ;;  %5502 = vmatprep.subr.bf16.mxu1 %v7430_v57  ;;  %v7517_v56 = vld [vmem:[%s11243_s1 + $0x34c] ss:$16 sps:$4 sm:$0xff]   ;;  %v7512_v57 = vld [vmem:[%s11243_s1 + $0x340] ss:$16 sps:$4 sm:$0xff]  }
  0x33   :  { %4970 = vmatpush1.bf16.msra.mxu0 %v7432_v59  ;;  %5503 = vmatpush1.bf16.msra.mxu1 %v7433_v61  ;;  %v7520_v59 = vld [vmem:[%s11243_s1 + $0x364] ss:$16 sps:$4 sm:$0xff]   ;;  %v7518_v61 = vld [vmem:[%s11243_s1 + $0x360] ss:$16 sps:$4 sm:$0xff]  }
  0x34   :  { %4971 = vmatprep.subr.bf16.mxu0 %v7434_v62  ;;  %5504 = vmatprep.subr.bf16.mxu1 %v7436_v63  ;;  %v7521_v62 = vld [vmem:[%s11243_s1 + $0x368] ss:$16 sps:$4 sm:$0xff]   ;;  %v7526_v63 = vld [vmem:[%s11243_s1 + $0x384] ss:$16 sps:$4 sm:$0xff]  }
  0x37   :  { %4972 = vmatpush1.bf16.msra.mxu0 %v7438_v0  ;;  %5505 = vmatpush1.bf16.msra.mxu1 %v7439_v1  ;;  %v7529_v0 = vld [vmem:[%s11243_s1 + $0x38c] ss:$16 sps:$4 sm:$0xff]   ;;  %v7524_v1 = vld [vmem:[%s11243_s1 + $0x380] ss:$16 sps:$4 sm:$0xff]  }
  0x38   :  { %4973 = vmatprep.subr.bf16.mxu0 %v7440_v2  ;;  %5506 = vmatprep.subr.bf16.mxu1 %v7442_v3  ;;  %v7527_v2 = vld [vmem:[%s11243_s1 + $0x388] ss:$16 sps:$4 sm:$0xff]   ;;  %v7532_v3 = vld [vmem:[%s11243_s1 + $0x3a4] ss:$16 sps:$4 sm:$0xff]  }
  0x3b   :  { %4974 = vmatpush1.bf16.msra.mxu0 %v7444_v4  ;;  %5507 = vmatpush1.bf16.msra.mxu1 %v7445_v5  ;;  %v7535_v4 = vld [vmem:[%s11243_s1 + $0x3ac] ss:$16 sps:$4 sm:$0xff]   ;;  %v7530_v5 = vld [vmem:[%s11243_s1 + $0x3a0] ss:$16 sps:$4 sm:$0xff]  }
  0x3c   :  { %4975 = vmatprep.subr.bf16.mxu0 %v7446_v6  ;;  %5508 = vmatprep.subr.bf16.mxu1 %v7448_v7  ;;  %v7533_v6 = vld [vmem:[%s11243_s1 + $0x3a8] ss:$16 sps:$4 sm:$0xff]   ;;  %v7538_v7 = vld [vmem:[%s11243_s1 + $0x3c4] ss:$16 sps:$4 sm:$0xff]  }
  0x3f   :  { %4976 = vmatpush1.bf16.msra.mxu0 %v7450_v8  ;;  %5509 = vmatpush1.bf16.msra.mxu1 %v7451_v9  ;;  %v7541_v8 = vld [vmem:[%s11243_s1 + $0x3cc] ss:$16 sps:$4 sm:$0xff]   ;;  %v836_v9 = vcombine.high %v8776_v52, %v8776_v52 }
  0x40   :  { %4986 = vmatprep.subr.bf16.mxu0 %v7454_v10  ;;  %5519 = vmatprep.subr.bf16.mxu1 %v7457_v11  ;;  %v7536_v10 = vld [vmem:[%s11243_s1 + $0x3c0] ss:$16 sps:$4 sm:$0xff]   ;;  %v7539_v11 = vld [vmem:[%s11243_s1 + $0x3c8] ss:$16 sps:$4 sm:$0xff]   ;;  %v7547_v52 = vld [vmem:[%s11243_s1 + $0x3ec] ss:$16 sps:$4 sm:$0xff]  }
  0x42   :  { %4978 = vmatmul.mubr.bf16.vlgmr.msra.gmra.mrb[0].mxu0 %v8845_v13  ;;  %5511 = vmatmul.mubr.bf16.vlgmr.msra.gmra.mrb[0].mxu1 %v8845_v13 }
  0x43   :  { %4987 = vmatpush1.bf16.msra.mxu0 %v7452_v12  ;;  %5520 = vmatpush1.bf16.msra.mxu1 %v7455_v14  ;;  %v7544_v12 = vld [vmem:[%s11243_s1 + $0x3e4] ss:$16 sps:$4 sm:$0xff]   ;;  %v9029_v14 = vrot.slane %v836_v9, %v8765_v49  ;;  %v7623_v9 = vld [vmem:[%s11243_s1 + $0x588] ss:$16 sps:$4 sm:$0xff]  }
  0x44   :  { %4988 = vmatprep.subr.bf16.mxu0 %v7460_v15  ;;  %5521 = vmatprep.subr.bf16.mxu1 %v7463_v16  ;;  %v7542_v15 = vld [vmem:[%s11243_s1 + $0x3e0] ss:$16 sps:$4 sm:$0xff]   ;;  %v7545_v16 = vld [vmem:[%s11243_s1 + $0x3e8] ss:$16 sps:$4 sm:$0xff]  }
  0x45   :  { %5018 = vmatprep.mubr.bf16.mxu0 %v883_v17  ;;  %5551 = vmatprep.mubr.bf16.mxu1 %v883_v17  ;;  %v7550_v17 = vld [vmem:[%s11243_s1 + $0x404] ss:$16 sps:$4 sm:$0xff]  }
  0x47   :  { %4989 = vmatpush1.bf16.msra.mxu0 %v7458_v18  ;;  %5522 = vmatpush1.bf16.msra.mxu1 %v7461_v19  ;;  %v7553_v18 = vld [vmem:[%s11243_s1 + $0x40c] ss:$16 sps:$4 sm:$0xff]   ;;  %v852_v19 = vcombine.high %v9029_v14, %v9029_v14 }
  0x48   :  { %4990 = vmatprep.subr.bf16.mxu0 %v7466_v20  ;;  %5523 = vmatprep.subr.bf16.mxu1 %v7469_v21  ;;  %v7548_v20 = vld [vmem:[%s11243_s1 + $0x400] ss:$16 sps:$4 sm:$0xff]   ;;  %v881_v21 = vcombine.high %v8845_v13, %v8845_v13 }
  0x49   :  { %v7554_v13 = vld [vmem:[%s11243_s1 + $0x420] ss:$16 sps:$4 sm:$0xff]  }
  0x4b   :  { %4991 = vmatpush1.bf16.msra.mxu0 %v7464_v22  ;;  %5524 = vmatpush1.bf16.msra.mxu1 %v7467_v23  ;;  %v7551_v22 = vld [vmem:[%s11243_s1 + $0x408] ss:$16 sps:$4 sm:$0xff]   ;;  %v7556_v23 = vld [vmem:[%s11243_s1 + $0x424] ss:$16 sps:$4 sm:$0xff]  }
  0x4c   :  { %4992 = vmatprep.subr.bf16.mxu0 %v7472_v24  ;;  %5525 = vmatprep.subr.bf16.mxu1 %v7475_v25  ;;  %v7559_v24 = vld [vmem:[%s11243_s1 + $0x42c] ss:$16 sps:$4 sm:$0xff]   ;;  %v9060_v25 = vrot.slane %v852_v19, %v8765_v49  ;;  %v7640_v19 = vld [vmem:[%s11243_s1 + $0x5e4] ss:$16 sps:$4 sm:$0xff]  }
  0x4f   :  { %4993 = vmatpush1.bf16.msra.mxu0 %v7470_v26  ;;  %5526 = vmatpush1.bf16.msra.mxu1 %v7473_v27  ;;  %v7557_v26 = vld [vmem:[%s11243_s1 + $0x428] ss:$16 sps:$4 sm:$0xff]   ;;  %v7562_v27 = vld [vmem:[%s11243_s1 + $0x444] ss:$16 sps:$4 sm:$0xff]  }
  0x50   :  { %4994 = vmatprep.subr.bf16.mxu0 %v7478_v28  ;;  %5527 = vmatprep.subr.bf16.mxu1 %v7481_v29  ;;  %v7565_v28 = vld [vmem:[%s11243_s1 + $0x44c] ss:$16 sps:$4 sm:$0xff]   ;;  %v7560_v29 = vld [vmem:[%s11243_s1 + $0x440] ss:$16 sps:$4 sm:$0xff]  }
  0x53   :  { %4995 = vmatpush1.bf16.msra.mxu0 %v7476_v30  ;;  %5528 = vmatpush1.bf16.msra.mxu1 %v7479_v31  ;;  %v7563_v30 = vld [vmem:[%s11243_s1 + $0x448] ss:$16 sps:$4 sm:$0xff]   ;;  %v7568_v31 = vld [vmem:[%s11243_s1 + $0x464] ss:$16 sps:$4 sm:$0xff]  }
  0x54   :  { %4996 = vmatprep.subr.bf16.mxu0 %v7484_v32  ;;  %5529 = vmatprep.subr.bf16.mxu1 %v7487_v33  ;;  %v7571_v32 = vld [vmem:[%s11243_s1 + $0x46c] ss:$16 sps:$4 sm:$0xff]   ;;  %v7566_v33 = vld [vmem:[%s11243_s1 + $0x460] ss:$16 sps:$4 sm:$0xff]  }
  0x57   :  { %4997 = vmatpush1.bf16.msra.mxu0 %v7482_v34  ;;  %5530 = vmatpush1.bf16.msra.mxu1 %v7485_v35  ;;  %v7569_v34 = vld [vmem:[%s11243_s1 + $0x468] ss:$16 sps:$4 sm:$0xff]   ;;  %v7574_v35 = vld [vmem:[%s11243_s1 + $0x484] ss:$16 sps:$4 sm:$0xff]  }
  0x58   :  { %4998 = vmatprep.subr.bf16.mxu0 %v7490_v36  ;;  %5531 = vmatprep.subr.bf16.mxu1 %v7493_v37  ;;  %v7577_v36 = vld [vmem:[%s11243_s1 + $0x48c] ss:$16 sps:$4 sm:$0xff]   ;;  %v7572_v37 = vld [vmem:[%s11243_s1 + $0x480] ss:$16 sps:$4 sm:$0xff]  }
  0x5b   :  { %4999 = vmatpush1.bf16.msra.mxu0 %v7488_v38  ;;  %5532 = vmatpush1.bf16.msra.mxu1 %v7491_v39  ;;  %v7575_v38 = vld [vmem:[%s11243_s1 + $0x488] ss:$16 sps:$4 sm:$0xff]   ;;  %v7580_v39 = vld [vmem:[%s11243_s1 + $0x4a4] ss:$16 sps:$4 sm:$0xff]  }
  0x5c   :  { %5000 = vmatprep.subr.bf16.mxu0 %v7496_v40  ;;  %5533 = vmatprep.subr.bf16.mxu1 %v7499_v41  ;;  %v7583_v40 = vld [vmem:[%s11243_s1 + $0x4ac] ss:$16 sps:$4 sm:$0xff]   ;;  %v7578_v41 = vld [vmem:[%s11243_s1 + $0x4a0] ss:$16 sps:$4 sm:$0xff]  }
  0x5f   :  { %5001 = vmatpush1.bf16.msra.mxu0 %v7494_v43  ;;  %5534 = vmatpush1.bf16.msra.mxu1 %v7497_v44  ;;  %v7581_v43 = vld [vmem:[%s11243_s1 + $0x4a8] ss:$16 sps:$4 sm:$0xff]   ;;  %v7586_v44 = vld [vmem:[%s11243_s1 + $0x4c4] ss:$16 sps:$4 sm:$0xff]  }
  0x60   :  { %5002 = vmatprep.subr.bf16.mxu0 %v7502_v45  ;;  %5535 = vmatprep.subr.bf16.mxu1 %v7505_v46  ;;  %v7589_v45 = vld [vmem:[%s11243_s1 + $0x4cc] ss:$16 sps:$4 sm:$0xff]   ;;  %v7584_v46 = vld [vmem:[%s11243_s1 + $0x4c0] ss:$16 sps:$4 sm:$0xff]  }
  0x63   :  { %5003 = vmatpush1.bf16.msra.mxu0 %v7500_v47  ;;  %5536 = vmatpush1.bf16.msra.mxu1 %v7503_v48  ;;  %v7587_v47 = vld [vmem:[%s11243_s1 + $0x4c8] ss:$16 sps:$4 sm:$0xff]   ;;  %v7592_v48 = vld [vmem:[%s11243_s1 + $0x4e4] ss:$16 sps:$4 sm:$0xff]  }
  0x64   :  { %5004 = vmatprep.subr.bf16.mxu0 %v7508_v50  ;;  %5537 = vmatprep.subr.bf16.mxu1 %v7511_v51  ;;  %v7595_v50 = vld [vmem:[%s11243_s1 + $0x4ec] ss:$16 sps:$4 sm:$0xff]   ;;  %v7590_v51 = vld [vmem:[%s11243_s1 + $0x4e0] ss:$16 sps:$4 sm:$0xff]  }
  0x67   :  { %5005 = vmatpush1.bf16.msra.mxu0 %v7506_v53  ;;  %5538 = vmatpush1.bf16.msra.mxu1 %v7509_v54  ;;  %v7593_v53 = vld [vmem:[%s11243_s1 + $0x4e8] ss:$16 sps:$4 sm:$0xff]   ;;  %v7598_v54 = vld [vmem:[%s11243_s1 + $0x504] ss:$16 sps:$4 sm:$0xff]  }
  0x68   :  { %5006 = vmatprep.subr.bf16.mxu0 %v7514_v55  ;;  %5539 = vmatprep.subr.bf16.mxu1 %v7517_v56  ;;  %v7601_v55 = vld [vmem:[%s11243_s1 + $0x50c] ss:$16 sps:$4 sm:$0xff]   ;;  %v7596_v56 = vld [vmem:[%s11243_s1 + $0x500] ss:$16 sps:$4 sm:$0xff]  }
  0x6b   :  { %5007 = vmatpush1.bf16.msra.mxu0 %v7512_v57  ;;  %5540 = vmatpush1.bf16.msra.mxu1 %v7515_v58  ;;  %v7599_v57 = vld [vmem:[%s11243_s1 + $0x508] ss:$16 sps:$4 sm:$0xff]   ;;  %v7604_v58 = vld [vmem:[%s11243_s1 + $0x524] ss:$16 sps:$4 sm:$0xff]  }
  0x6c   :  { %5008 = vmatprep.subr.bf16.mxu0 %v7520_v59  ;;  %5541 = vmatprep.subr.bf16.mxu1 %v7523_v60  ;;  %v7607_v59 = vld [vmem:[%s11243_s1 + $0x52c] ss:$16 sps:$4 sm:$0xff]   ;;  %v7602_v60 = vld [vmem:[%s11243_s1 + $0x520] ss:$16 sps:$4 sm:$0xff]  }
  0x6f   :  { %5009 = vmatpush1.bf16.msra.mxu0 %v7518_v61  ;;  %5542 = vmatpush1.bf16.msra.mxu1 %v7521_v62  ;;  %v7605_v61 = vld [vmem:[%s11243_s1 + $0x528] ss:$16 sps:$4 sm:$0xff]   ;;  %v7610_v62 = vld [vmem:[%s11243_s1 + $0x544] ss:$16 sps:$4 sm:$0xff]  }
  0x70   :  { %5010 = vmatprep.subr.bf16.mxu0 %v7526_v63  ;;  %5543 = vmatprep.subr.bf16.mxu1 %v7529_v0  ;;  %v7613_v63 = vld [vmem:[%s11243_s1 + $0x54c] ss:$16 sps:$4 sm:$0xff]   ;;  %v7608_v0 = vld [vmem:[%s11243_s1 + $0x540] ss:$16 sps:$4 sm:$0xff]  }
  0x73   :  { %5011 = vmatpush1.bf16.msra.mxu0 %v7524_v1  ;;  %5544 = vmatpush1.bf16.msra.mxu1 %v7527_v2  ;;  %v7611_v1 = vld [vmem:[%s11243_s1 + $0x548] ss:$16 sps:$4 sm:$0xff]   ;;  %v7616_v2 = vld [vmem:[%s11243_s1 + $0x564] ss:$16 sps:$4 sm:$0xff]  }
  0x74   :  { %5012 = vmatprep.subr.bf16.mxu0 %v7532_v3  ;;  %5545 = vmatprep.subr.bf16.mxu1 %v7535_v4  ;;  %v7619_v3 = vld [vmem:[%s11243_s1 + $0x56c] ss:$16 sps:$4 sm:$0xff]   ;;  %v7614_v4 = vld [vmem:[%s11243_s1 + $0x560] ss:$16 sps:$4 sm:$0xff]  }
  0x77   :  { %5013 = vmatpush1.bf16.msra.mxu0 %v7530_v5  ;;  %5546 = vmatpush1.bf16.msra.mxu1 %v7533_v6  ;;  %v7617_v5 = vld [vmem:[%s11243_s1 + $0x568] ss:$16 sps:$4 sm:$0xff]   ;;  %v7622_v6 = vld [vmem:[%s11243_s1 + $0x584] ss:$16 sps:$4 sm:$0xff]  }
  0x78   :  { %5014 = vmatprep.subr.bf16.mxu0 %v7538_v7  ;;  %5547 = vmatprep.subr.bf16.mxu1 %v7541_v8  ;;  %v7625_v7 = vld [vmem:[%s11243_s1 + $0x58c] ss:$16 sps:$4 sm:$0xff]   ;;  %v7620_v8 = vld [vmem:[%s11243_s1 + $0x580] ss:$16 sps:$4 sm:$0xff]  }
  0x7b   :  { %5015 = vmatpush1.bf16.msra.mxu0 %v7536_v10  ;;  %5548 = vmatpush1.bf16.msra.mxu1 %v7539_v11  ;;  %v7628_v10 = vld [vmem:[%s11243_s1 + $0x5a4] ss:$16 sps:$4 sm:$0xff]   ;;  %v7631_v11 = vld [vmem:[%s11243_s1 + $0x5ac] ss:$16 sps:$4 sm:$0xff]  }
  0x7c   :  { %5016 = vmatprep.subr.bf16.mxu0 %v7544_v12  ;;  %5549 = vmatprep.subr.bf16.mxu1 %v7547_v52  ;;  %v7626_v12 = vld [vmem:[%s11243_s1 + $0x5a0] ss:$16 sps:$4 sm:$0xff]   ;;  %v7629_v52 = vld [vmem:[%s11243_s1 + $0x5a8] ss:$16 sps:$4 sm:$0xff]  }
  0x7f   :  { %5017 = vmatpush1.bf16.msra.mxu0 %v7542_v15  ;;  %5550 = vmatpush1.bf16.msra.mxu1 %v7545_v16  ;;  %v7634_v15 = vld [vmem:[%s11243_s1 + $0x5c4] ss:$16 sps:$4 sm:$0xff]   ;;  %v7637_v16 = vld [vmem:[%s11243_s1 + $0x5cc] ss:$16 sps:$4 sm:$0xff]  }
  0x80   :  { %5027 = vmatprep.subr.bf16.mxu0 %v7550_v17  ;;  %5560 = vmatprep.subr.bf16.mxu1 %v7553_v18  ;;  %v7632_v17 = vld [vmem:[%s11243_s1 + $0x5c0] ss:$16 sps:$4 sm:$0xff]   ;;  %v7635_v18 = vld [vmem:[%s11243_s1 + $0x5c8] ss:$16 sps:$4 sm:$0xff]  }
  0x82   :  { %5019 = vmatmul.mubr.bf16.vlgmr.msra.gmra.mrb[0].mxu0 %v881_v21  ;;  %5552 = vmatmul.mubr.bf16.vlgmr.msra.gmra.mrb[0].mxu1 %v881_v21  ;;  %v7638_v21 = vld [vmem:[%s11243_s1 + $0x5e0] ss:$16 sps:$4 sm:$0xff]  }
  0x83   :  { %5028 = vmatpush1.bf16.msra.mxu0 %v7548_v20  ;;  %5561 = vmatpush1.bf16.msra.mxu1 %v7551_v22  ;;  %v7643_v20 = vld [vmem:[%s11243_s1 + $0x5ec] ss:$16 sps:$4 sm:$0xff]   ;;  %v7641_v22 = vld [vmem:[%s11243_s1 + $0x5e8] ss:$16 sps:$4 sm:$0xff]  }
  0x84   :  { %5029 = vmatprep.subr.bf16.mxu0 %v7556_v23  ;;  %5562 = vmatprep.subr.bf16.mxu1 %v7559_v24  ;;  %v7647_v23 = vld [vmem:[%s11243_s1 + $0x604] ss:$16 sps:$4 sm:$0xff]   ;;  %v7650_v24 = vld [vmem:[%s11243_s1 + $0x60c] ss:$16 sps:$4 sm:$0xff]  }
  0x85   :  { %5059 = vmatprep.mubr.bf16.mxu0 %v9060_v25  ;;  %5592 = vmatprep.mubr.bf16.mxu1 %v9060_v25 }
  0x87   :  { %5030 = vmatpush1.bf16.msra.mxu0 %v7554_v13  ;;  %5563 = vmatpush1.bf16.msra.mxu1 %v7557_v26  ;;  %v7645_v13 = vld [vmem:[%s11243_s1 + $0x600] ss:$16 sps:$4 sm:$0xff]   ;;  %v9249_v26 = vrot.slane %v9029_v14, %v8765_v49  ;;  %v884_v14 = vcombine.high %v9060_v25, %v9060_v25  ;;  %v7659_v25 = vld [vmem:[%s11243_s1 + $0x644] ss:$16 sps:$4 sm:$0xff]  }
  0x88   :  { %5031 = vmatprep.subr.bf16.mxu0 %v7562_v27  ;;  %5564 = vmatprep.subr.bf16.mxu1 %v7565_v28  ;;  %v7648_v27 = vld [vmem:[%s11243_s1 + $0x608] ss:$16 sps:$4 sm:$0xff]   ;;  %v7653_v28 = vld [vmem:[%s11243_s1 + $0x624] ss:$16 sps:$4 sm:$0xff]  }
  0x8b   :  { %5032 = vmatpush1.bf16.msra.mxu0 %v7560_v29  ;;  %5565 = vmatpush1.bf16.msra.mxu1 %v7563_v30  ;;  %v7656_v29 = vld [vmem:[%s11243_s1 + $0x62c] ss:$16 sps:$4 sm:$0xff]   ;;  %v7651_v30 = vld [vmem:[%s11243_s1 + $0x620] ss:$16 sps:$4 sm:$0xff]  }
  0x8c   :  { %5033 = vmatprep.subr.bf16.mxu0 %v7568_v31  ;;  %5566 = vmatprep.subr.bf16.mxu1 %v7571_v32  ;;  %v7654_v31 = vld [vmem:[%s11243_s1 + $0x628] ss:$16 sps:$4 sm:$0xff]   ;;  %v7662_v32 = vld [vmem:[%s11243_s1 + $0x64c] ss:$16 sps:$4 sm:$0xff]  }
  0x8f   :  { %5034 = vmatpush1.bf16.msra.mxu0 %v7566_v33  ;;  %5567 = vmatpush1.bf16.msra.mxu1 %v7569_v34  ;;  %v7657_v33 = vld [vmem:[%s11243_s1 + $0x640] ss:$16 sps:$4 sm:$0xff]   ;;  %v7660_v34 = vld [vmem:[%s11243_s1 + $0x648] ss:$16 sps:$4 sm:$0xff]  }
  0x90   :  { %5035 = vmatprep.subr.bf16.mxu0 %v7574_v35  ;;  %5568 = vmatprep.subr.bf16.mxu1 %v7577_v36  ;;  %v7665_v35 = vld [vmem:[%s11243_s1 + $0x664] ss:$16 sps:$4 sm:$0xff]   ;;  %v7668_v36 = vld [vmem:[%s11243_s1 + $0x66c] ss:$16 sps:$4 sm:$0xff]  }
  0x93   :  { %5036 = vmatpush1.bf16.msra.mxu0 %v7572_v37  ;;  %5569 = vmatpush1.bf16.msra.mxu1 %v7575_v38  ;;  %v7663_v37 = vld [vmem:[%s11243_s1 + $0x660] ss:$16 sps:$4 sm:$0xff]   ;;  %v7666_v38 = vld [vmem:[%s11243_s1 + $0x668] ss:$16 sps:$4 sm:$0xff]  }
  0x94   :  { %5037 = vmatprep.subr.bf16.mxu0 %v7580_v39  ;;  %5570 = vmatprep.subr.bf16.mxu1 %v7583_v40  ;;  %v7671_v39 = vld [vmem:[%s11243_s1 + $0x684] ss:$16 sps:$4 sm:$0xff]   ;;  %v7674_v40 = vld [vmem:[%s11243_s1 + $0x68c] ss:$16 sps:$4 sm:$0xff]  }
  0x97   :  { %5038 = vmatpush1.bf16.msra.mxu0 %v7578_v41  ;;  %5571 = vmatpush1.bf16.msra.mxu1 %v7581_v43  ;;  %v7669_v41 = vld [vmem:[%s11243_s1 + $0x680] ss:$16 sps:$4 sm:$0xff]   ;;  %v7672_v43 = vld [vmem:[%s11243_s1 + $0x688] ss:$16 sps:$4 sm:$0xff]  }
  0x98   :  { %5039 = vmatprep.subr.bf16.mxu0 %v7586_v44  ;;  %5572 = vmatprep.subr.bf16.mxu1 %v7589_v45  ;;  %v7677_v44 = vld [vmem:[%s11243_s1 + $0x6a4] ss:$16 sps:$4 sm:$0xff]   ;;  %v7680_v45 = vld [vmem:[%s11243_s1 + $0x6ac] ss:$16 sps:$4 sm:$0xff]  }
  0x9b   :  { %5040 = vmatpush1.bf16.msra.mxu0 %v7584_v46  ;;  %5573 = vmatpush1.bf16.msra.mxu1 %v7587_v47  ;;  %v7675_v46 = vld [vmem:[%s11243_s1 + $0x6a0] ss:$16 sps:$4 sm:$0xff]   ;;  %v7678_v47 = vld [vmem:[%s11243_s1 + $0x6a8] ss:$16 sps:$4 sm:$0xff]  }
  0x9c   :  { %5041 = vmatprep.subr.bf16.mxu0 %v7592_v48  ;;  %5574 = vmatprep.subr.bf16.mxu1 %v7595_v50  ;;  %v7683_v48 = vld [vmem:[%s11243_s1 + $0x6c4] ss:$16 sps:$4 sm:$0xff]   ;;  %v7686_v50 = vld [vmem:[%s11243_s1 + $0x6cc] ss:$16 sps:$4 sm:$0xff]  }
  0x9f   :  { %5042 = vmatpush1.bf16.msra.mxu0 %v7590_v51  ;;  %5575 = vmatpush1.bf16.msra.mxu1 %v7593_v53  ;;  %v7681_v51 = vld [vmem:[%s11243_s1 + $0x6c0] ss:$16 sps:$4 sm:$0xff]   ;;  %v7684_v53 = vld [vmem:[%s11243_s1 + $0x6c8] ss:$16 sps:$4 sm:$0xff]  }
  0xa0   :  { %5043 = vmatprep.subr.bf16.mxu0 %v7598_v54  ;;  %5576 = vmatprep.subr.bf16.mxu1 %v7601_v55  ;;  %v7689_v54 = vld [vmem:[%s11243_s1 + $0x6e4] ss:$16 sps:$4 sm:$0xff]   ;;  %v7692_v55 = vld [vmem:[%s11243_s1 + $0x6ec] ss:$16 sps:$4 sm:$0xff]  }
  0xa3   :  { %5044 = vmatpush1.bf16.msra.mxu0 %v7596_v56  ;;  %5577 = vmatpush1.bf16.msra.mxu1 %v7599_v57  ;;  %v7687_v56 = vld [vmem:[%s11243_s1 + $0x6e0] ss:$16 sps:$4 sm:$0xff]   ;;  %v7690_v57 = vld [vmem:[%s11243_s1 + $0x6e8] ss:$16 sps:$4 sm:$0xff]  }
  0xa4   :  { %5045 = vmatprep.subr.bf16.mxu0 %v7604_v58  ;;  %5578 = vmatprep.subr.bf16.mxu1 %v7607_v59  ;;  %v7695_v58 = vld [vmem:[%s11243_s1 + $0x704] ss:$16 sps:$4 sm:$0xff]   ;;  %v7698_v59 = vld [vmem:[%s11243_s1 + $0x70c] ss:$16 sps:$4 sm:$0xff]  }
  0xa7   :  { %5046 = vmatpush1.bf16.msra.mxu0 %v7602_v60  ;;  %5579 = vmatpush1.bf16.msra.mxu1 %v7605_v61  ;;  %v7693_v60 = vld [vmem:[%s11243_s1 + $0x700] ss:$16 sps:$4 sm:$0xff]   ;;  %v7696_v61 = vld [vmem:[%s11243_s1 + $0x708] ss:$16 sps:$4 sm:$0xff]  }
  0xa8   :  { %5047 = vmatprep.subr.bf16.mxu0 %v7610_v62  ;;  %5580 = vmatprep.subr.bf16.mxu1 %v7613_v63  ;;  %v7701_v62 = vld [vmem:[%s11243_s1 + $0x724] ss:$16 sps:$4 sm:$0xff]   ;;  %v7704_v63 = vld [vmem:[%s11243_s1 + $0x72c] ss:$16 sps:$4 sm:$0xff]  }
  0xab   :  { %5048 = vmatpush1.bf16.msra.mxu0 %v7608_v0  ;;  %5581 = vmatpush1.bf16.msra.mxu1 %v7611_v1  ;;  %v7699_v0 = vld [vmem:[%s11243_s1 + $0x720] ss:$16 sps:$4 sm:$0xff]   ;;  %v7702_v1 = vld [vmem:[%s11243_s1 + $0x728] ss:$16 sps:$4 sm:$0xff]  }
  0xac   :  { %5049 = vmatprep.subr.bf16.mxu0 %v7616_v2  ;;  %5582 = vmatprep.subr.bf16.mxu1 %v7619_v3  ;;  %v7707_v2 = vld [vmem:[%s11243_s1 + $0x744] ss:$16 sps:$4 sm:$0xff]   ;;  %v7710_v3 = vld [vmem:[%s11243_s1 + $0x74c] ss:$16 sps:$4 sm:$0xff]  }
  0xaf   :  { %5050 = vmatpush1.bf16.msra.mxu0 %v7614_v4  ;;  %5583 = vmatpush1.bf16.msra.mxu1 %v7617_v5  ;;  %v7705_v4 = vld [vmem:[%s11243_s1 + $0x740] ss:$16 sps:$4 sm:$0xff]   ;;  %v7708_v5 = vld [vmem:[%s11243_s1 + $0x748] ss:$16 sps:$4 sm:$0xff]  }
  0xb0   :  { %5051 = vmatprep.subr.bf16.mxu0 %v7622_v6  ;;  %5584 = vmatprep.subr.bf16.mxu1 %v7625_v7  ;;  %v7713_v6 = vld [vmem:[%s11243_s1 + $0x764] ss:$16 sps:$4 sm:$0xff]   ;;  %v7716_v7 = vld [vmem:[%s11243_s1 + $0x76c] ss:$16 sps:$4 sm:$0xff]  }
  0xb3   :  { %5052 = vmatpush1.bf16.msra.mxu0 %v7620_v8  ;;  %5585 = vmatpush1.bf16.msra.mxu1 %v7623_v9  ;;  %v7711_v8 = vld [vmem:[%s11243_s1 + $0x760] ss:$16 sps:$4 sm:$0xff]   ;;  %v7714_v9 = vld [vmem:[%s11243_s1 + $0x768] ss:$16 sps:$4 sm:$0xff]  }
  0xb4   :  { %5053 = vmatprep.subr.bf16.mxu0 %v7628_v10  ;;  %5586 = vmatprep.subr.bf16.mxu1 %v7631_v11  ;;  %v7719_v10 = vld [vmem:[%s11243_s1 + $0x784] ss:$16 sps:$4 sm:$0xff]   ;;  %v7722_v11 = vld [vmem:[%s11243_s1 + $0x78c] ss:$16 sps:$4 sm:$0xff]  }
  0xb7   :  { %5054 = vmatpush1.bf16.msra.mxu0 %v7626_v12  ;;  %5587 = vmatpush1.bf16.msra.mxu1 %v7629_v52  ;;  %v7717_v12 = vld [vmem:[%s11243_s1 + $0x780] ss:$16 sps:$4 sm:$0xff]   ;;  %v7720_v52 = vld [vmem:[%s11243_s1 + $0x788] ss:$16 sps:$4 sm:$0xff]  }
  0xb8   :  { %5055 = vmatprep.subr.bf16.mxu0 %v7634_v15  ;;  %5588 = vmatprep.subr.bf16.mxu1 %v7637_v16  ;;  %v7725_v15 = vld [vmem:[%s11243_s1 + $0x7a4] ss:$16 sps:$4 sm:$0xff]   ;;  %v7728_v16 = vld [vmem:[%s11243_s1 + $0x7ac] ss:$16 sps:$4 sm:$0xff]  }
  0xbb   :  { %5056 = vmatpush1.bf16.msra.mxu0 %v7632_v17  ;;  %5589 = vmatpush1.bf16.msra.mxu1 %v7635_v18  ;;  %v7723_v17 = vld [vmem:[%s11243_s1 + $0x7a0] ss:$16 sps:$4 sm:$0xff]   ;;  %v7726_v18 = vld [vmem:[%s11243_s1 + $0x7a8] ss:$16 sps:$4 sm:$0xff]  }
  0xbc   :  { %5057 = vmatprep.subr.bf16.mxu0 %v7640_v19  ;;  %5590 = vmatprep.subr.bf16.mxu1 %v7643_v20  ;;  %v7731_v19 = vld [vmem:[%s11243_s1 + $0x7c4] ss:$16 sps:$4 sm:$0xff]   ;;  %v7734_v20 = vld [vmem:[%s11243_s1 + $0x7cc] ss:$16 sps:$4 sm:$0xff]  }
  0xbf   :  { %5058 = vmatpush1.bf16.msra.mxu0 %v7638_v21  ;;  %5591 = vmatpush1.bf16.msra.mxu1 %v7641_v22  ;;  %v9423_v21 = vld.sshfl [vmem:[%s11242_s0 + $0x8] sm:$0xff pattern:$0x75316420]  ;;  %v7729_v22 = vld [vmem:[%s11243_s1 + $0x7c0] ss:$16 sps:$4 sm:$0xff]  }
  0xc0   :  { %5068 = vmatprep.subr.bf16.mxu0 %v7647_v23  ;;  %5601 = vmatprep.subr.bf16.mxu1 %v7650_v24  ;;  %v7732_v23 = vld [vmem:[%s11243_s1 + $0x7c8] ss:$16 sps:$4 sm:$0xff]   ;;  %v7737_v24 = vld [vmem:[%s11243_s1 + $0x7e4] ss:$16 sps:$4 sm:$0xff]  }
  0xc2   :  { %5060 = vmatmul.mubr.bf16.vlgmr.msra.gmra.mrb[0].mxu0 %v9249_v26  ;;  %5593 = vmatmul.mubr.bf16.vlgmr.msra.gmra.mrb[0].mxu1 %v9249_v26 }
  0xc3   :  { %5069 = vmatpush1.bf16.msra.mxu0 %v7645_v13  ;;  %5602 = vmatpush1.bf16.msra.mxu1 %v7648_v27  ;;  %v7740_v13 = vld [vmem:[%s11243_s1 + $0x7ec] ss:$16 sps:$4 sm:$0xff]   ;;  %v7735_v27 = vld [vmem:[%s11243_s1 + $0x7e0] ss:$16 sps:$4 sm:$0xff]  }
  0xc4   :  { %5070 = vmatprep.subr.bf16.mxu0 %v7653_v28  ;;  %5603 = vmatprep.subr.bf16.mxu1 %v7656_v29  ;;  %v7738_v28 = vld [vmem:[%s11243_s1 + $0x7e8] ss:$16 sps:$4 sm:$0xff]   ;;  %v7743_v29 = vld [vmem:[%s11243_s1 + $0x804] ss:$16 sps:$4 sm:$0xff]  }
  0xc5   :  { %5100 = vmatprep.mubr.bf16.mxu0 %v884_v14  ;;  %5633 = vmatprep.mubr.bf16.mxu1 %v884_v14  ;;  %v7746_v14 = vld [vmem:[%s11243_s1 + $0x80c] ss:$16 sps:$4 sm:$0xff]  }
  0xc7   :  { %5071 = vmatpush1.bf16.msra.mxu0 %v7651_v30  ;;  %5604 = vmatpush1.bf16.msra.mxu1 %v7654_v31  ;;  %v900_v30 = vcombine.high %v9423_v21, %v9423_v21  ;;  %v882_v31 = vcombine.high %v9249_v26, %v9249_v26  ;;  %v7752_v26 = vld [vmem:[%s11243_s1 + $0x82c] ss:$16 sps:$4 sm:$0xff]  }
  0xc8   :  { %5072 = vmatprep.subr.bf16.mxu0 %v7659_v25  ;;  %5605 = vmatprep.subr.bf16.mxu1 %v7662_v32  ;;  %v7741_v25 = vld [vmem:[%s11243_s1 + $0x800] ss:$16 sps:$4 sm:$0xff]   ;;  %v7744_v32 = vld [vmem:[%s11243_s1 + $0x808] ss:$16 sps:$4 sm:$0xff]  }
  0xcb   :  { %5073 = vmatpush1.bf16.msra.mxu0 %v7657_v33  ;;  %5606 = vmatpush1.bf16.msra.mxu1 %v7660_v34  ;;  %v7749_v33 = vld [vmem:[%s11243_s1 + $0x824] ss:$16 sps:$4 sm:$0xff]   ;;  %v9466_v34 = vrot.slane %v900_v30, %v8765_v49 }
  0xcc   :  { %5074 = vmatprep.subr.bf16.mxu0 %v7665_v35  ;;  %5607 = vmatprep.subr.bf16.mxu1 %v7668_v36  ;;  %v7747_v35 = vld [vmem:[%s11243_s1 + $0x820] ss:$16 sps:$4 sm:$0xff]   ;;  %v7750_v36 = vld [vmem:[%s11243_s1 + $0x828] ss:$16 sps:$4 sm:$0xff]   ;;  %v7833_v30 = vld [vmem:[%s11243_s1 + $0x9e4] ss:$16 sps:$4 sm:$0xff]  }
  0xcf   :  { %5075 = vmatpush1.bf16.msra.mxu0 %v7663_v37  ;;  %5608 = vmatpush1.bf16.msra.mxu1 %v7666_v38  ;;  %v7755_v37 = vld [vmem:[%s11243_s1 + $0x844] ss:$16 sps:$4 sm:$0xff]   ;;  %v7758_v38 = vld [vmem:[%s11243_s1 + $0x84c] ss:$16 sps:$4 sm:$0xff]  }
  0xd0   :  { %5076 = vmatprep.subr.bf16.mxu0 %v7671_v39  ;;  %5609 = vmatprep.subr.bf16.mxu1 %v7674_v40  ;;  %v7753_v39 = vld [vmem:[%s11243_s1 + $0x840] ss:$16 sps:$4 sm:$0xff]   ;;  %v7756_v40 = vld [vmem:[%s11243_s1 + $0x848] ss:$16 sps:$4 sm:$0xff]  }
  0xd3   :  { %5077 = vmatpush1.bf16.msra.mxu0 %v7669_v41  ;;  %5610 = vmatpush1.bf16.msra.mxu1 %v7672_v43  ;;  %v7761_v41 = vld [vmem:[%s11243_s1 + $0x864] ss:$16 sps:$4 sm:$0xff]   ;;  %v7764_v43 = vld [vmem:[%s11243_s1 + $0x86c] ss:$16 sps:$4 sm:$0xff]  }
  0xd4   :  { %5078 = vmatprep.subr.bf16.mxu0 %v7677_v44  ;;  %5611 = vmatprep.subr.bf16.mxu1 %v7680_v45  ;;  %v7759_v44 = vld [vmem:[%s11243_s1 + $0x860] ss:$16 sps:$4 sm:$0xff]   ;;  %v7762_v45 = vld [vmem:[%s11243_s1 + $0x868] ss:$16 sps:$4 sm:$0xff]  }
  0xd7   :  { %5079 = vmatpush1.bf16.msra.mxu0 %v7675_v46  ;;  %5612 = vmatpush1.bf16.msra.mxu1 %v7678_v47  ;;  %v7767_v46 = vld [vmem:[%s11243_s1 + $0x884] ss:$16 sps:$4 sm:$0xff]   ;;  %v7770_v47 = vld [vmem:[%s11243_s1 + $0x88c] ss:$16 sps:$4 sm:$0xff]  }
  0xd8   :  { %5080 = vmatprep.subr.bf16.mxu0 %v7683_v48  ;;  %5613 = vmatprep.subr.bf16.mxu1 %v7686_v50  ;;  %v7765_v48 = vld [vmem:[%s11243_s1 + $0x880] ss:$16 sps:$4 sm:$0xff]   ;;  %v7768_v50 = vld [vmem:[%s11243_s1 + $0x888] ss:$16 sps:$4 sm:$0xff]  }
  0xdb   :  { %5081 = vmatpush1.bf16.msra.mxu0 %v7681_v51  ;;  %5614 = vmatpush1.bf16.msra.mxu1 %v7684_v53  ;;  %v7773_v51 = vld [vmem:[%s11243_s1 + $0x8a4] ss:$16 sps:$4 sm:$0xff]   ;;  %v7776_v53 = vld [vmem:[%s11243_s1 + $0x8ac] ss:$16 sps:$4 sm:$0xff]  }
  0xdc   :  { %5082 = vmatprep.subr.bf16.mxu0 %v7689_v54  ;;  %5615 = vmatprep.subr.bf16.mxu1 %v7692_v55  ;;  %v7771_v54 = vld [vmem:[%s11243_s1 + $0x8a0] ss:$16 sps:$4 sm:$0xff]   ;;  %v7774_v55 = vld [vmem:[%s11243_s1 + $0x8a8] ss:$16 sps:$4 sm:$0xff]  }
  0xdf   :  { %5083 = vmatpush1.bf16.msra.mxu0 %v7687_v56  ;;  %5616 = vmatpush1.bf16.msra.mxu1 %v7690_v57  ;;  %v7779_v56 = vld [vmem:[%s11243_s1 + $0x8c4] ss:$16 sps:$4 sm:$0xff]   ;;  %v7782_v57 = vld [vmem:[%s11243_s1 + $0x8cc] ss:$16 sps:$4 sm:$0xff]  }
  0xe0   :  { %5084 = vmatprep.subr.bf16.mxu0 %v7695_v58  ;;  %5617 = vmatprep.subr.bf16.mxu1 %v7698_v59  ;;  %v7777_v58 = vld [vmem:[%s11243_s1 + $0x8c0] ss:$16 sps:$4 sm:$0xff]   ;;  %v7780_v59 = vld [vmem:[%s11243_s1 + $0x8c8] ss:$16 sps:$4 sm:$0xff]  }
  0xe3   :  { %5085 = vmatpush1.bf16.msra.mxu0 %v7693_v60  ;;  %5618 = vmatpush1.bf16.msra.mxu1 %v7696_v61  ;;  %v7785_v60 = vld [vmem:[%s11243_s1 + $0x8e4] ss:$16 sps:$4 sm:$0xff]   ;;  %v7788_v61 = vld [vmem:[%s11243_s1 + $0x8ec] ss:$16 sps:$4 sm:$0xff]  }
  0xe4   :  { %5086 = vmatprep.subr.bf16.mxu0 %v7701_v62  ;;  %5619 = vmatprep.subr.bf16.mxu1 %v7704_v63  ;;  %v7783_v62 = vld [vmem:[%s11243_s1 + $0x8e0] ss:$16 sps:$4 sm:$0xff]   ;;  %v7786_v63 = vld [vmem:[%s11243_s1 + $0x8e8] ss:$16 sps:$4 sm:$0xff]  }
  0xe7   :  { %5087 = vmatpush1.bf16.msra.mxu0 %v7699_v0  ;;  %5620 = vmatpush1.bf16.msra.mxu1 %v7702_v1  ;;  %v7791_v0 = vld [vmem:[%s11243_s1 + $0x904] ss:$16 sps:$4 sm:$0xff]   ;;  %v7794_v1 = vld [vmem:[%s11243_s1 + $0x90c] ss:$16 sps:$4 sm:$0xff]  }
  0xe8   :  { %5088 = vmatprep.subr.bf16.mxu0 %v7707_v2  ;;  %5621 = vmatprep.subr.bf16.mxu1 %v7710_v3  ;;  %v7789_v2 = vld [vmem:[%s11243_s1 + $0x900] ss:$16 sps:$4 sm:$0xff]   ;;  %v7792_v3 = vld [vmem:[%s11243_s1 + $0x908] ss:$16 sps:$4 sm:$0xff]  }
  0xeb   :  { %5089 = vmatpush1.bf16.msra.mxu0 %v7705_v4  ;;  %5622 = vmatpush1.bf16.msra.mxu1 %v7708_v5  ;;  %v7797_v4 = vld [vmem:[%s11243_s1 + $0x924] ss:$16 sps:$4 sm:$0xff]   ;;  %v7800_v5 = vld [vmem:[%s11243_s1 + $0x92c] ss:$16 sps:$4 sm:$0xff]  }
  0xec   :  { %5090 = vmatprep.subr.bf16.mxu0 %v7713_v6  ;;  %5623 = vmatprep.subr.bf16.mxu1 %v7716_v7  ;;  %v7795_v6 = vld [vmem:[%s11243_s1 + $0x920] ss:$16 sps:$4 sm:$0xff]   ;;  %v7798_v7 = vld [vmem:[%s11243_s1 + $0x928] ss:$16 sps:$4 sm:$0xff]  }
  0xef   :  { %5091 = vmatpush1.bf16.msra.mxu0 %v7711_v8  ;;  %5624 = vmatpush1.bf16.msra.mxu1 %v7714_v9  ;;  %v7803_v8 = vld [vmem:[%s11243_s1 + $0x944] ss:$16 sps:$4 sm:$0xff]   ;;  %v7806_v9 = vld [vmem:[%s11243_s1 + $0x94c] ss:$16 sps:$4 sm:$0xff]  }
  0xf0   :  { %5092 = vmatprep.subr.bf16.mxu0 %v7719_v10  ;;  %5625 = vmatprep.subr.bf16.mxu1 %v7722_v11  ;;  %v7801_v10 = vld [vmem:[%s11243_s1 + $0x940] ss:$16 sps:$4 sm:$0xff]   ;;  %v7804_v11 = vld [vmem:[%s11243_s1 + $0x948] ss:$16 sps:$4 sm:$0xff]  }
  0xf3   :  { %5093 = vmatpush1.bf16.msra.mxu0 %v7717_v12  ;;  %5626 = vmatpush1.bf16.msra.mxu1 %v7720_v52  ;;  %v7809_v12 = vld [vmem:[%s11243_s1 + $0x964] ss:$16 sps:$4 sm:$0xff]   ;;  %v7812_v52 = vld [vmem:[%s11243_s1 + $0x96c] ss:$16 sps:$4 sm:$0xff]  }
  0xf4   :  { %5094 = vmatprep.subr.bf16.mxu0 %v7725_v15  ;;  %5627 = vmatprep.subr.bf16.mxu1 %v7728_v16  ;;  %v7807_v15 = vld [vmem:[%s11243_s1 + $0x960] ss:$16 sps:$4 sm:$0xff]   ;;  %v7810_v16 = vld [vmem:[%s11243_s1 + $0x968] ss:$16 sps:$4 sm:$0xff]  }
  0xf7   :  { %5095 = vmatpush1.bf16.msra.mxu0 %v7723_v17  ;;  %5628 = vmatpush1.bf16.msra.mxu1 %v7726_v18  ;;  %v7815_v17 = vld [vmem:[%s11243_s1 + $0x984] ss:$16 sps:$4 sm:$0xff]   ;;  %v7818_v18 = vld [vmem:[%s11243_s1 + $0x98c] ss:$16 sps:$4 sm:$0xff]  }
  0xf8   :  { %5096 = vmatprep.subr.bf16.mxu0 %v7731_v19  ;;  %5629 = vmatprep.subr.bf16.mxu1 %v7734_v20  ;;  %v7813_v19 = vld [vmem:[%s11243_s1 + $0x980] ss:$16 sps:$4 sm:$0xff]   ;;  %v7816_v20 = vld [vmem:[%s11243_s1 + $0x988] ss:$16 sps:$4 sm:$0xff]  }
  0xfb   :  { %5097 = vmatpush1.bf16.msra.mxu0 %v7729_v22  ;;  %5630 = vmatpush1.bf16.msra.mxu1 %v7732_v23  ;;  %v7821_v22 = vld [vmem:[%s11243_s1 + $0x9a4] ss:$16 sps:$4 sm:$0xff]   ;;  %v7824_v23 = vld [vmem:[%s11243_s1 + $0x9ac] ss:$16 sps:$4 sm:$0xff]  }
  0xfc   :  { %5098 = vmatprep.subr.bf16.mxu0 %v7737_v24  ;;  %5631 = vmatprep.subr.bf16.mxu1 %v7740_v13  ;;  %v7819_v24 = vld [vmem:[%s11243_s1 + $0x9a0] ss:$16 sps:$4 sm:$0xff]   ;;  %v7822_v13 = vld [vmem:[%s11243_s1 + $0x9a8] ss:$16 sps:$4 sm:$0xff]  }
  0xff   :  { %5099 = vmatpush1.bf16.msra.mxu0 %v7735_v27  ;;  %5632 = vmatpush1.bf16.msra.mxu1 %v7738_v28  ;;  %v7827_v27 = vld [vmem:[%s11243_s1 + $0x9c4] ss:$16 sps:$4 sm:$0xff]   ;;  %v7830_v28 = vld [vmem:[%s11243_s1 + $0x9cc] ss:$16 sps:$4 sm:$0xff]  }
 0x100   :  { %5109 = vmatprep.subr.bf16.mxu0 %v7743_v29  ;;  %5642 = vmatprep.subr.bf16.mxu1 %v7746_v14  ;;  %v7825_v29 = vld [vmem:[%s11243_s1 + $0x9c0] ss:$16 sps:$4 sm:$0xff]   ;;  %v7828_v14 = vld [vmem:[%s11243_s1 + $0x9c8] ss:$16 sps:$4 sm:$0xff]  }
 0x102   :  { %5101 = vmatmul.mubr.bf16.vlgmr.msra.gmra.mrb[0].mxu0 %v882_v31  ;;  %5634 = vmatmul.mubr.bf16.vlgmr.msra.gmra.mrb[0].mxu1 %v882_v31  ;;  %v7836_v31 = vld [vmem:[%s11243_s1 + $0x9ec] ss:$16 sps:$4 sm:$0xff]  }
 0x103   :  { %5110 = vmatpush1.bf16.msra.mxu0 %v7741_v25  ;;  %5643 = vmatpush1.bf16.msra.mxu1 %v7744_v32  ;;  %v7831_v25 = vld [vmem:[%s11243_s1 + $0x9e0] ss:$16 sps:$4 sm:$0xff]   ;;  %v7834_v32 = vld [vmem:[%s11243_s1 + $0x9e8] ss:$16 sps:$4 sm:$0xff]  }
 0x104   :  { %5111 = vmatprep.subr.bf16.mxu0 %v7749_v33  ;;  %5644 = vmatprep.subr.bf16.mxu1 %v7752_v26  ;;  %v7839_v33 = vld [vmem:[%s11243_s1 + $0xa04] ss:$16 sps:$4 sm:$0xff]   ;;  %v7842_v26 = vld [vmem:[%s11243_s1 + $0xa0c] ss:$16 sps:$4 sm:$0xff]  }
 0x105   :  { %5141 = vmatprep.mubr.bf16.mxu0 %v9466_v34  ;;  %5674 = vmatprep.mubr.bf16.mxu1 %v9466_v34 }
 0x107   :  { %5112 = vmatpush1.bf16.msra.mxu0 %v7747_v35  ;;  %5645 = vmatpush1.bf16.msra.mxu1 %v7750_v36  ;;  %v9652_v35 = vrot.slane %v9423_v21, %v8765_v49  ;;  %v7837_v36 = vld [vmem:[%s11243_s1 + $0xa00] ss:$16 sps:$4 sm:$0xff]   ;;  %v7848_v21 = vld [vmem:[%s11243_s1 + $0xa2c] ss:$16 sps:$4 sm:$0xff]  }
 0x108   :  { %5113 = vmatprep.subr.bf16.mxu0 %v7755_v37  ;;  %5646 = vmatprep.subr.bf16.mxu1 %v7758_v38  ;;  %v7840_v37 = vld [vmem:[%s11243_s1 + $0xa08] ss:$16 sps:$4 sm:$0xff]   ;;  %v7845_v38 = vld [vmem:[%s11243_s1 + $0xa24] ss:$16 sps:$4 sm:$0xff]  }
 0x10b   :  { %5114 = vmatpush1.bf16.msra.mxu0 %v7753_v39  ;;  %5647 = vmatpush1.bf16.msra.mxu1 %v7756_v40  ;;  %v932_v39 = vcombine.high %v9466_v34, %v9466_v34  ;;  %v7843_v40 = vld [vmem:[%s11243_s1 + $0xa20] ss:$16 sps:$4 sm:$0xff]   ;;  %v7851_v34 = vld [vmem:[%s11243_s1 + $0xa44] ss:$16 sps:$4 sm:$0xff]  }
 0x10c   :  { %5115 = vmatprep.subr.bf16.mxu0 %v7761_v41  ;;  %5648 = vmatprep.subr.bf16.mxu1 %v7764_v43  ;;  %v7846_v41 = vld [vmem:[%s11243_s1 + $0xa28] ss:$16 sps:$4 sm:$0xff]   ;;  %v7854_v43 = vld [vmem:[%s11243_s1 + $0xa4c] ss:$16 sps:$4 sm:$0xff]  }
 0x10f   :  { %5116 = vmatpush1.bf16.msra.mxu0 %v7759_v44  ;;  %5649 = vmatpush1.bf16.msra.mxu1 %v7762_v45  ;;  %v7849_v44 = vld [vmem:[%s11243_s1 + $0xa40] ss:$16 sps:$4 sm:$0xff]   ;;  %v7852_v45 = vld [vmem:[%s11243_s1 + $0xa48] ss:$16 sps:$4 sm:$0xff]  }
 0x110   :  { %5117 = vmatprep.subr.bf16.mxu0 %v7767_v46  ;;  %5650 = vmatprep.subr.bf16.mxu1 %v7770_v47  ;;  %v7857_v46 = vld [vmem:[%s11243_s1 + $0xa64] ss:$16 sps:$4 sm:$0xff]   ;;  %v7860_v47 = vld [vmem:[%s11243_s1 + $0xa6c] ss:$16 sps:$4 sm:$0xff]  }
 0x113   :  { %5118 = vmatpush1.bf16.msra.mxu0 %v7765_v48  ;;  %5651 = vmatpush1.bf16.msra.mxu1 %v7768_v50  ;;  %v7855_v48 = vld [vmem:[%s11243_s1 + $0xa60] ss:$16 sps:$4 sm:$0xff]   ;;  %v7858_v50 = vld [vmem:[%s11243_s1 + $0xa68] ss:$16 sps:$4 sm:$0xff]  }
 0x114   :  { %5119 = vmatprep.subr.bf16.mxu0 %v7773_v51  ;;  %5652 = vmatprep.subr.bf16.mxu1 %v7776_v53  ;;  %v7863_v51 = vld [vmem:[%s11243_s1 + $0xa84] ss:$16 sps:$4 sm:$0xff]   ;;  %v7866_v53 = vld [vmem:[%s11243_s1 + $0xa8c] ss:$16 sps:$4 sm:$0xff]  }
 0x117   :  { %5120 = vmatpush1.bf16.msra.mxu0 %v7771_v54  ;;  %5653 = vmatpush1.bf16.msra.mxu1 %v7774_v55  ;;  %v7861_v54 = vld [vmem:[%s11243_s1 + $0xa80] ss:$16 sps:$4 sm:$0xff]   ;;  %v7864_v55 = vld [vmem:[%s11243_s1 + $0xa88] ss:$16 sps:$4 sm:$0xff]  }
 0x118   :  { %5121 = vmatprep.subr.bf16.mxu0 %v7779_v56  ;;  %5654 = vmatprep.subr.bf16.mxu1 %v7782_v57  ;;  %v7869_v56 = vld [vmem:[%s11243_s1 + $0xaa4] ss:$16 sps:$4 sm:$0xff]   ;;  %v7872_v57 = vld [vmem:[%s11243_s1 + $0xaac] ss:$16 sps:$4 sm:$0xff]  }
 0x11b   :  { %5122 = vmatpush1.bf16.msra.mxu0 %v7777_v58  ;;  %5655 = vmatpush1.bf16.msra.mxu1 %v7780_v59  ;;  %v7867_v58 = vld [vmem:[%s11243_s1 + $0xaa0] ss:$16 sps:$4 sm:$0xff]   ;;  %v7870_v59 = vld [vmem:[%s11243_s1 + $0xaa8] ss:$16 sps:$4 sm:$0xff]  }
 0x11c   :  { %5123 = vmatprep.subr.bf16.mxu0 %v7785_v60  ;;  %5656 = vmatprep.subr.bf16.mxu1 %v7788_v61  ;;  %v7875_v60 = vld [vmem:[%s11243_s1 + $0xac4] ss:$16 sps:$4 sm:$0xff]   ;;  %v7878_v61 = vld [vmem:[%s11243_s1 + $0xacc] ss:$16 sps:$4 sm:$0xff]  }
 0x11f   :  { %5124 = vmatpush1.bf16.msra.mxu0 %v7783_v62  ;;  %5657 = vmatpush1.bf16.msra.mxu1 %v7786_v63  ;;  %v7873_v62 = vld [vmem:[%s11243_s1 + $0xac0] ss:$16 sps:$4 sm:$0xff]   ;;  %v7876_v63 = vld [vmem:[%s11243_s1 + $0xac8] ss:$16 sps:$4 sm:$0xff]  }
 0x120   :  { %5125 = vmatprep.subr.bf16.mxu0 %v7791_v0  ;;  %5658 = vmatprep.subr.bf16.mxu1 %v7794_v1  ;;  %v7881_v0 = vld [vmem:[%s11243_s1 + $0xae4] ss:$16 sps:$4 sm:$0xff]   ;;  %v7884_v1 = vld [vmem:[%s11243_s1 + $0xaec] ss:$16 sps:$4 sm:$0xff]  }
 0x123   :  { %5126 = vmatpush1.bf16.msra.mxu0 %v7789_v2  ;;  %5659 = vmatpush1.bf16.msra.mxu1 %v7792_v3  ;;  %v7879_v2 = vld [vmem:[%s11243_s1 + $0xae0] ss:$16 sps:$4 sm:$0xff]   ;;  %v7882_v3 = vld [vmem:[%s11243_s1 + $0xae8] ss:$16 sps:$4 sm:$0xff]  }
 0x124   :  { %5127 = vmatprep.subr.bf16.mxu0 %v7797_v4  ;;  %5660 = vmatprep.subr.bf16.mxu1 %v7800_v5  ;;  %v7887_v4 = vld [vmem:[%s11243_s1 + $0xb04] ss:$16 sps:$4 sm:$0xff]   ;;  %v7890_v5 = vld [vmem:[%s11243_s1 + $0xb0c] ss:$16 sps:$4 sm:$0xff]  }
 0x127   :  { %5128 = vmatpush1.bf16.msra.mxu0 %v7795_v6  ;;  %5661 = vmatpush1.bf16.msra.mxu1 %v7798_v7  ;;  %v7885_v6 = vld [vmem:[%s11243_s1 + $0xb00] ss:$16 sps:$4 sm:$0xff]   ;;  %v7888_v7 = vld [vmem:[%s11243_s1 + $0xb08] ss:$16 sps:$4 sm:$0xff]  }
 0x128   :  { %5129 = vmatprep.subr.bf16.mxu0 %v7803_v8  ;;  %5662 = vmatprep.subr.bf16.mxu1 %v7806_v9  ;;  %v7893_v8 = vld [vmem:[%s11243_s1 + $0xb24] ss:$16 sps:$4 sm:$0xff]   ;;  %v7896_v9 = vld [vmem:[%s11243_s1 + $0xb2c] ss:$16 sps:$4 sm:$0xff]  }
 0x12b   :  { %5130 = vmatpush1.bf16.msra.mxu0 %v7801_v10  ;;  %5663 = vmatpush1.bf16.msra.mxu1 %v7804_v11  ;;  %v7891_v10 = vld [vmem:[%s11243_s1 + $0xb20] ss:$16 sps:$4 sm:$0xff]   ;;  %v7894_v11 = vld [vmem:[%s11243_s1 + $0xb28] ss:$16 sps:$4 sm:$0xff]  }
 0x12c   :  { %5131 = vmatprep.subr.bf16.mxu0 %v7809_v12  ;;  %5664 = vmatprep.subr.bf16.mxu1 %v7812_v52  ;;  %v7899_v12 = vld [vmem:[%s11243_s1 + $0xb44] ss:$16 sps:$4 sm:$0xff]   ;;  %v7902_v52 = vld [vmem:[%s11243_s1 + $0xb4c] ss:$16 sps:$4 sm:$0xff]  }
 0x12f   :  { %5132 = vmatpush1.bf16.msra.mxu0 %v7807_v15  ;;  %5665 = vmatpush1.bf16.msra.mxu1 %v7810_v16  ;;  %v7897_v15 = vld [vmem:[%s11243_s1 + $0xb40] ss:$16 sps:$4 sm:$0xff]   ;;  %v7900_v16 = vld [vmem:[%s11243_s1 + $0xb48] ss:$16 sps:$4 sm:$0xff]  }
 0x130   :  { %5133 = vmatprep.subr.bf16.mxu0 %v7815_v17  ;;  %5666 = vmatprep.subr.bf16.mxu1 %v7818_v18  ;;  %v7905_v17 = vld [vmem:[%s11243_s1 + $0xb64] ss:$16 sps:$4 sm:$0xff]   ;;  %v7908_v18 = vld [vmem:[%s11243_s1 + $0xb6c] ss:$16 sps:$4 sm:$0xff]  }
 0x133   :  { %5134 = vmatpush1.bf16.msra.mxu0 %v7813_v19  ;;  %5667 = vmatpush1.bf16.msra.mxu1 %v7816_v20  ;;  %v7903_v19 = vld [vmem:[%s11243_s1 + $0xb60] ss:$16 sps:$4 sm:$0xff]   ;;  %v7906_v20 = vld [vmem:[%s11243_s1 + $0xb68] ss:$16 sps:$4 sm:$0xff]  }
 0x134   :  { %5135 = vmatprep.subr.bf16.mxu0 %v7821_v22  ;;  %5668 = vmatprep.subr.bf16.mxu1 %v7824_v23  ;;  %v7911_v22 = vld [vmem:[%s11243_s1 + $0xb84] ss:$16 sps:$4 sm:$0xff]   ;;  %v7914_v23 = vld [vmem:[%s11243_s1 + $0xb8c] ss:$16 sps:$4 sm:$0xff]  }
 0x137   :  { %5136 = vmatpush1.bf16.msra.mxu0 %v7819_v24  ;;  %5669 = vmatpush1.bf16.msra.mxu1 %v7822_v13  ;;  %v7909_v24 = vld [vmem:[%s11243_s1 + $0xb80] ss:$16 sps:$4 sm:$0xff]   ;;  %v7912_v13 = vld [vmem:[%s11243_s1 + $0xb88] ss:$16 sps:$4 sm:$0xff]  }
 0x138   :  { %5137 = vmatprep.subr.bf16.mxu0 %v7827_v27  ;;  %5670 = vmatprep.subr.bf16.mxu1 %v7830_v28  ;;  %v7917_v27 = vld [vmem:[%s11243_s1 + $0xba4] ss:$16 sps:$4 sm:$0xff]   ;;  %v7920_v28 = vld [vmem:[%s11243_s1 + $0xbac] ss:$16 sps:$4 sm:$0xff]  }
 0x13b   :  { %5138 = vmatpush1.bf16.msra.mxu0 %v7825_v29  ;;  %5671 = vmatpush1.bf16.msra.mxu1 %v7828_v14  ;;  %v7915_v29 = vld [vmem:[%s11243_s1 + $0xba0] ss:$16 sps:$4 sm:$0xff]   ;;  %v7918_v14 = vld [vmem:[%s11243_s1 + $0xba8] ss:$16 sps:$4 sm:$0xff]  }
 0x13c   :  { %5139 = vmatprep.subr.bf16.mxu0 %v7833_v30  ;;  %5672 = vmatprep.subr.bf16.mxu1 %v7836_v31  ;;  %v7923_v30 = vld [vmem:[%s11243_s1 + $0xbc4] ss:$16 sps:$4 sm:$0xff]   ;;  %v7926_v31 = vld [vmem:[%s11243_s1 + $0xbcc] ss:$16 sps:$4 sm:$0xff]  }
 0x13f   :  { %5140 = vmatpush1.bf16.msra.mxu0 %v7831_v25  ;;  %5673 = vmatpush1.bf16.msra.mxu1 %v7834_v32  ;;  %v8571_v25 = vld [vmem:[%s11242_s0 + $0x8] sm:$0xff] }
 0x140   :  { %5150 = vmatprep.subr.bf16.mxu0 %v7839_v33  ;;  %5683 = vmatprep.subr.bf16.mxu1 %v7842_v26  ;;  %v885_v32 = vcombine.high %v8571_v25, %v8571_v25  ;;  %v7921_v33 = vld [vmem:[%s11243_s1 + $0xbc0] ss:$16 sps:$4 sm:$0xff]   ;;  %v7924_v26 = vld [vmem:[%s11243_s1 + $0xbc8] ss:$16 sps:$4 sm:$0xff]  }
 0x141   :  { %v8005_v25 = vld [vmem:[%s11243_s1 + $0xd80] ss:$16 sps:$4 sm:$0xff]  }
 0x142   :  { %5142 = vmatmul.mubr.bf16.vlgmr.msra.gmra.mrb[0].mxu0 %v9652_v35  ;;  %5675 = vmatmul.mubr.bf16.vlgmr.msra.gmra.mrb[0].mxu1 %v9652_v35 }
 0x143   :  { %5151 = vmatpush1.bf16.msra.mxu0 %v7837_v36  ;;  %5684 = vmatpush1.bf16.msra.mxu1 %v7840_v37  ;;  %v7929_v36 = vld [vmem:[%s11243_s1 + $0xbe4] ss:$16 sps:$4 sm:$0xff]   ;;  %v7932_v37 = vld [vmem:[%s11243_s1 + $0xbec] ss:$16 sps:$4 sm:$0xff]  }
 0x144   :  { %5152 = vmatprep.subr.bf16.mxu0 %v7845_v38  ;;  %5685 = vmatprep.subr.bf16.mxu1 %v7848_v21  ;;  %v9842_v38 = vrot.slane %v885_v32, %v8765_v49  ;;  %v7927_v21 = vld [vmem:[%s11243_s1 + $0xbe0] ss:$16 sps:$4 sm:$0xff]   ;;  %v8008_v32 = vld [vmem:[%s11243_s1 + $0xd88] ss:$16 sps:$4 sm:$0xff]  }
 0x145   :  { %5182 = vmatprep.mubr.bf16.mxu0 %v932_v39  ;;  %5715 = vmatprep.mubr.bf16.mxu1 %v932_v39  ;;  %v7930_v39 = vld [vmem:[%s11243_s1 + $0xbe8] ss:$16 sps:$4 sm:$0xff]  }
 0x147   :  { %5153 = vmatpush1.bf16.msra.mxu0 %v7843_v40  ;;  %5686 = vmatpush1.bf16.msra.mxu1 %v7846_v41  ;;  %v7935_v40 = vld [vmem:[%s11243_s1 + $0xc04] ss:$16 sps:$4 sm:$0xff]   ;;  %v7938_v41 = vld [vmem:[%s11243_s1 + $0xc0c] ss:$16 sps:$4 sm:$0xff]  }
 0x148   :  { %5154 = vmatprep.subr.bf16.mxu0 %v7851_v34  ;;  %5687 = vmatprep.subr.bf16.mxu1 %v7854_v43  ;;  %v901_v34 = vcombine.high %v9842_v38, %v9842_v38  ;;  %v930_v43 = vcombine.high %v9652_v35, %v9652_v35  ;;  %v7944_v35 = vld [vmem:[%s11243_s1 + $0xc2c] ss:$16 sps:$4 sm:$0xff]  }
 0x14b   :  { %5155 = vmatpush1.bf16.msra.mxu0 %v7849_v44  ;;  %5688 = vmatpush1.bf16.msra.mxu1 %v7852_v45  ;;  %v7933_v44 = vld [vmem:[%s11243_s1 + $0xc00] ss:$16 sps:$4 sm:$0xff]   ;;  %v7936_v45 = vld [vmem:[%s11243_s1 + $0xc08] ss:$16 sps:$4 sm:$0xff]  }
 0x14c   :  { %5156 = vmatprep.subr.bf16.mxu0 %v7857_v46  ;;  %5689 = vmatprep.subr.bf16.mxu1 %v7860_v47  ;;  %v7941_v46 = vld [vmem:[%s11243_s1 + $0xc24] ss:$16 sps:$4 sm:$0xff]   ;;  %v9873_v47 = vrot.slane %v901_v34, %v8765_v49 }
 0x14d   :  { %v8025_v34 = vld [vmem:[%s11243_s1 + $0xde4] ss:$16 sps:$4 sm:$0xff]  }
 0x14f   :  { %5157 = vmatpush1.bf16.msra.mxu0 %v7855_v48  ;;  %5690 = vmatpush1.bf16.msra.mxu1 %v7858_v50  ;;  %v7939_v48 = vld [vmem:[%s11243_s1 + $0xc20] ss:$16 sps:$4 sm:$0xff]   ;;  %v7942_v50 = vld [vmem:[%s11243_s1 + $0xc28] ss:$16 sps:$4 sm:$0xff]  }
 0x150   :  { %5158 = vmatprep.subr.bf16.mxu0 %v7863_v51  ;;  %5691 = vmatprep.subr.bf16.mxu1 %v7866_v53  ;;  %v7947_v51 = vld [vmem:[%s11243_s1 + $0xc44] ss:$16 sps:$4 sm:$0xff]   ;;  %v7950_v53 = vld [vmem:[%s11243_s1 + $0xc4c] ss:$16 sps:$4 sm:$0xff]  }
 0x153   :  { %5159 = vmatpush1.bf16.msra.mxu0 %v7861_v54  ;;  %5692 = vmatpush1.bf16.msra.mxu1 %v7864_v55  ;;  %v7945_v54 = vld [vmem:[%s11243_s1 + $0xc40] ss:$16 sps:$4 sm:$0xff]   ;;  %v7948_v55 = vld [vmem:[%s11243_s1 + $0xc48] ss:$16 sps:$4 sm:$0xff]  }
 0x154   :  { %5160 = vmatprep.subr.bf16.mxu0 %v7869_v56  ;;  %5693 = vmatprep.subr.bf16.mxu1 %v7872_v57  ;;  %v7953_v56 = vld [vmem:[%s11243_s1 + $0xc64] ss:$16 sps:$4 sm:$0xff]   ;;  %v7956_v57 = vld [vmem:[%s11243_s1 + $0xc6c] ss:$16 sps:$4 sm:$0xff]  }
 0x157   :  { %5161 = vmatpush1.bf16.msra.mxu0 %v7867_v58  ;;  %5694 = vmatpush1.bf16.msra.mxu1 %v7870_v59  ;;  %v7951_v58 = vld [vmem:[%s11243_s1 + $0xc60] ss:$16 sps:$4 sm:$0xff]   ;;  %v7954_v59 = vld [vmem:[%s11243_s1 + $0xc68] ss:$16 sps:$4 sm:$0xff]  }
 0x158   :  { %5162 = vmatprep.subr.bf16.mxu0 %v7875_v60  ;;  %5695 = vmatprep.subr.bf16.mxu1 %v7878_v61  ;;  %v7959_v60 = vld [vmem:[%s11243_s1 + $0xc84] ss:$16 sps:$4 sm:$0xff]   ;;  %v7962_v61 = vld [vmem:[%s11243_s1 + $0xc8c] ss:$16 sps:$4 sm:$0xff]  }
 0x15b   :  { %5163 = vmatpush1.bf16.msra.mxu0 %v7873_v62  ;;  %5696 = vmatpush1.bf16.msra.mxu1 %v7876_v63  ;;  %v7957_v62 = vld [vmem:[%s11243_s1 + $0xc80] ss:$16 sps:$4 sm:$0xff]   ;;  %v7960_v63 = vld [vmem:[%s11243_s1 + $0xc88] ss:$16 sps:$4 sm:$0xff]  }
 0x15c   :  { %5164 = vmatprep.subr.bf16.mxu0 %v7881_v0  ;;  %5697 = vmatprep.subr.bf16.mxu1 %v7884_v1  ;;  %v7965_v0 = vld [vmem:[%s11243_s1 + $0xca4] ss:$16 sps:$4 sm:$0xff]   ;;  %v7968_v1 = vld [vmem:[%s11243_s1 + $0xcac] ss:$16 sps:$4 sm:$0xff]  }
 0x15f   :  { %5165 = vmatpush1.bf16.msra.mxu0 %v7879_v2  ;;  %5698 = vmatpush1.bf16.msra.mxu1 %v7882_v3  ;;  %v7963_v2 = vld [vmem:[%s11243_s1 + $0xca0] ss:$16 sps:$4 sm:$0xff]   ;;  %v7966_v3 = vld [vmem:[%s11243_s1 + $0xca8] ss:$16 sps:$4 sm:$0xff]  }
 0x160   :  { %5166 = vmatprep.subr.bf16.mxu0 %v7887_v4  ;;  %5699 = vmatprep.subr.bf16.mxu1 %v7890_v5  ;;  %v7971_v4 = vld [vmem:[%s11243_s1 + $0xcc4] ss:$16 sps:$4 sm:$0xff]   ;;  %v7974_v5 = vld [vmem:[%s11243_s1 + $0xccc] ss:$16 sps:$4 sm:$0xff]  }
 0x163   :  { %5167 = vmatpush1.bf16.msra.mxu0 %v7885_v6  ;;  %5700 = vmatpush1.bf16.msra.mxu1 %v7888_v7  ;;  %v7969_v6 = vld [vmem:[%s11243_s1 + $0xcc0] ss:$16 sps:$4 sm:$0xff]   ;;  %v7972_v7 = vld [vmem:[%s11243_s1 + $0xcc8] ss:$16 sps:$4 sm:$0xff]  }
 0x164   :  { %5168 = vmatprep.subr.bf16.mxu0 %v7893_v8  ;;  %5701 = vmatprep.subr.bf16.mxu1 %v7896_v9  ;;  %v7977_v8 = vld [vmem:[%s11243_s1 + $0xce4] ss:$16 sps:$4 sm:$0xff]   ;;  %v7980_v9 = vld [vmem:[%s11243_s1 + $0xcec] ss:$16 sps:$4 sm:$0xff]  }
 0x167   :  { %5169 = vmatpush1.bf16.msra.mxu0 %v7891_v10  ;;  %5702 = vmatpush1.bf16.msra.mxu1 %v7894_v11  ;;  %v7975_v10 = vld [vmem:[%s11243_s1 + $0xce0] ss:$16 sps:$4 sm:$0xff]   ;;  %v7978_v11 = vld [vmem:[%s11243_s1 + $0xce8] ss:$16 sps:$4 sm:$0xff]  }
 0x168   :  { %5170 = vmatprep.subr.bf16.mxu0 %v7899_v12  ;;  %5703 = vmatprep.subr.bf16.mxu1 %v7902_v52  ;;  %v7983_v12 = vld [vmem:[%s11243_s1 + $0xd04] ss:$16 sps:$4 sm:$0xff]   ;;  %v7986_v52 = vld [vmem:[%s11243_s1 + $0xd0c] ss:$16 sps:$4 sm:$0xff]  }
 0x16b   :  { %5171 = vmatpush1.bf16.msra.mxu0 %v7897_v15  ;;  %5704 = vmatpush1.bf16.msra.mxu1 %v7900_v16  ;;  %v7981_v15 = vld [vmem:[%s11243_s1 + $0xd00] ss:$16 sps:$4 sm:$0xff]   ;;  %v7984_v16 = vld [vmem:[%s11243_s1 + $0xd08] ss:$16 sps:$4 sm:$0xff]  }
 0x16c   :  { %5172 = vmatprep.subr.bf16.mxu0 %v7905_v17  ;;  %5705 = vmatprep.subr.bf16.mxu1 %v7908_v18  ;;  %v7989_v17 = vld [vmem:[%s11243_s1 + $0xd24] ss:$16 sps:$4 sm:$0xff]   ;;  %v7992_v18 = vld [vmem:[%s11243_s1 + $0xd2c] ss:$16 sps:$4 sm:$0xff]  }
 0x16f   :  { %5173 = vmatpush1.bf16.msra.mxu0 %v7903_v19  ;;  %5706 = vmatpush1.bf16.msra.mxu1 %v7906_v20  ;;  %v7987_v19 = vld [vmem:[%s11243_s1 + $0xd20] ss:$16 sps:$4 sm:$0xff]   ;;  %v7990_v20 = vld [vmem:[%s11243_s1 + $0xd28] ss:$16 sps:$4 sm:$0xff]  }
 0x170   :  { %5174 = vmatprep.subr.bf16.mxu0 %v7911_v22  ;;  %5707 = vmatprep.subr.bf16.mxu1 %v7914_v23  ;;  %v7995_v22 = vld [vmem:[%s11243_s1 + $0xd44] ss:$16 sps:$4 sm:$0xff]   ;;  %v7998_v23 = vld [vmem:[%s11243_s1 + $0xd4c] ss:$16 sps:$4 sm:$0xff]  }
 0x173   :  { %5175 = vmatpush1.bf16.msra.mxu0 %v7909_v24  ;;  %5708 = vmatpush1.bf16.msra.mxu1 %v7912_v13  ;;  %v7993_v24 = vld [vmem:[%s11243_s1 + $0xd40] ss:$16 sps:$4 sm:$0xff]   ;;  %v7996_v13 = vld [vmem:[%s11243_s1 + $0xd48] ss:$16 sps:$4 sm:$0xff]  }
 0x174   :  { %5176 = vmatprep.subr.bf16.mxu0 %v7917_v27  ;;  %5709 = vmatprep.subr.bf16.mxu1 %v7920_v28  ;;  %v8001_v27 = vld [vmem:[%s11243_s1 + $0xd64] ss:$16 sps:$4 sm:$0xff]   ;;  %v8004_v28 = vld [vmem:[%s11243_s1 + $0xd6c] ss:$16 sps:$4 sm:$0xff]  }
 0x177   :  { %5177 = vmatpush1.bf16.msra.mxu0 %v7915_v29  ;;  %5710 = vmatpush1.bf16.msra.mxu1 %v7918_v14  ;;  %v7999_v29 = vld [vmem:[%s11243_s1 + $0xd60] ss:$16 sps:$4 sm:$0xff]   ;;  %v8002_v14 = vld [vmem:[%s11243_s1 + $0xd68] ss:$16 sps:$4 sm:$0xff]  }
 0x178   :  { %5178 = vmatprep.subr.bf16.mxu0 %v7923_v30  ;;  %5711 = vmatprep.subr.bf16.mxu1 %v7926_v31  ;;  %v8007_v30 = vld [vmem:[%s11243_s1 + $0xd84] ss:$16 sps:$4 sm:$0xff]   ;;  %v8010_v31 = vld [vmem:[%s11243_s1 + $0xd8c] ss:$16 sps:$4 sm:$0xff]  }
 0x17b   :  { %5179 = vmatpush1.bf16.msra.mxu0 %v7921_v33  ;;  %5712 = vmatpush1.bf16.msra.mxu1 %v7924_v26  ;;  %v8013_v33 = vld [vmem:[%s11243_s1 + $0xda4] ss:$16 sps:$4 sm:$0xff]   ;;  %v8016_v26 = vld [vmem:[%s11243_s1 + $0xdac] ss:$16 sps:$4 sm:$0xff]  }
 0x17c   :  { %5180 = vmatprep.subr.bf16.mxu0 %v7929_v36  ;;  %5713 = vmatprep.subr.bf16.mxu1 %v7932_v37  ;;  %v8011_v36 = vld [vmem:[%s11243_s1 + $0xda0] ss:$16 sps:$4 sm:$0xff]   ;;  %v8014_v37 = vld [vmem:[%s11243_s1 + $0xda8] ss:$16 sps:$4 sm:$0xff]  }
 0x17f   :  { %5181 = vmatpush1.bf16.msra.mxu0 %v7927_v21  ;;  %5714 = vmatpush1.bf16.msra.mxu1 %v7930_v39  ;;  %v8019_v21 = vld [vmem:[%s11243_s1 + $0xdc4] ss:$16 sps:$4 sm:$0xff]   ;;  %v8022_v39 = vld [vmem:[%s11243_s1 + $0xdcc] ss:$16 sps:$4 sm:$0xff]  }
 0x180   :  { %5191 = vmatprep.subr.bf16.mxu0 %v7935_v40  ;;  %5724 = vmatprep.subr.bf16.mxu1 %v7938_v41  ;;  %v8017_v40 = vld [vmem:[%s11243_s1 + $0xdc0] ss:$16 sps:$4 sm:$0xff]   ;;  %v8020_v41 = vld [vmem:[%s11243_s1 + $0xdc8] ss:$16 sps:$4 sm:$0xff]  }
 0x182   :  { %5183 = vmatmul.mubr.bf16.vlgmr.msra.gmra.mrb[0].mxu0 %v930_v43  ;;  %5716 = vmatmul.mubr.bf16.vlgmr.msra.gmra.mrb[0].mxu1 %v930_v43  ;;  %v8028_v43 = vld [vmem:[%s11243_s1 + $0xdec] ss:$16 sps:$4 sm:$0xff]  }
 0x183   :  { %5192 = vmatpush1.bf16.msra.mxu0 %v7933_v44  ;;  %5725 = vmatpush1.bf16.msra.mxu1 %v7936_v45  ;;  %v8023_v44 = vld [vmem:[%s11243_s1 + $0xde0] ss:$16 sps:$4 sm:$0xff]   ;;  %v8026_v45 = vld [vmem:[%s11243_s1 + $0xde8] ss:$16 sps:$4 sm:$0xff]  }
 0x184   :  { %5193 = vmatprep.subr.bf16.mxu0 %v7941_v46  ;;  %5726 = vmatprep.subr.bf16.mxu1 %v7944_v35  ;;  %v8032_v46 = vld [vmem:[%s11243_s1 + $0xe04] ss:$16 sps:$4 sm:$0xff]   ;;  %v8035_v35 = vld [vmem:[%s11243_s1 + $0xe0c] ss:$16 sps:$4 sm:$0xff]  }
 0x185   :  { %5223 = vmatprep.mubr.bf16.mxu0 %v9873_v47  ;;  %5756 = vmatprep.mubr.bf16.mxu1 %v9873_v47 }
 0x187   :  { %5194 = vmatpush1.bf16.msra.mxu0 %v7939_v48  ;;  %5727 = vmatpush1.bf16.msra.mxu1 %v7942_v50  ;;  %v10059_v48 = vrot.slane %v9842_v38, %v8765_v49  ;;  %v8030_v50 = vld [vmem:[%s11243_s1 + $0xe00] ss:$16 sps:$4 sm:$0xff]   ;;  %v8041_v38 = vld [vmem:[%s11243_s1 + $0xe2c] ss:$16 sps:$4 sm:$0xff]  }
 0x188   :  { %5195 = vmatprep.subr.bf16.mxu0 %v7947_v51  ;;  %5728 = vmatprep.subr.bf16.mxu1 %v7950_v53  ;;  %v8033_v51 = vld [vmem:[%s11243_s1 + $0xe08] ss:$16 sps:$4 sm:$0xff]   ;;  %v8038_v53 = vld [vmem:[%s11243_s1 + $0xe24] ss:$16 sps:$4 sm:$0xff]  }
 0x18b   :  { %5196 = vmatpush1.bf16.msra.mxu0 %v7945_v54  ;;  %5729 = vmatpush1.bf16.msra.mxu1 %v7948_v55  ;;  %v933_v54 = vcombine.high %v9873_v47, %v9873_v47  ;;  %v8036_v55 = vld [vmem:[%s11243_s1 + $0xe20] ss:$16 sps:$4 sm:$0xff]   ;;  %v8044_v47 = vld [vmem:[%s11243_s1 + $0xe44] ss:$16 sps:$4 sm:$0xff]  }
 0x18c   :  { %5197 = vmatprep.subr.bf16.mxu0 %v7953_v56  ;;  %5730 = vmatprep.subr.bf16.mxu1 %v7956_v57  ;;  %v8039_v56 = vld [vmem:[%s11243_s1 + $0xe28] ss:$16 sps:$4 sm:$0xff]   ;;  %v8047_v57 = vld [vmem:[%s11243_s1 + $0xe4c] ss:$16 sps:$4 sm:$0xff]  }
 0x18f   :  { %5198 = vmatpush1.bf16.msra.mxu0 %v7951_v58  ;;  %5731 = vmatpush1.bf16.msra.mxu1 %v7954_v59  ;;  %v8042_v58 = vld [vmem:[%s11243_s1 + $0xe40] ss:$16 sps:$4 sm:$0xff]   ;;  %v8045_v59 = vld [vmem:[%s11243_s1 + $0xe48] ss:$16 sps:$4 sm:$0xff]  }
 0x190   :  { %5199 = vmatprep.subr.bf16.mxu0 %v7959_v60  ;;  %5732 = vmatprep.subr.bf16.mxu1 %v7962_v61  ;;  %v8050_v60 = vld [vmem:[%s11243_s1 + $0xe64] ss:$16 sps:$4 sm:$0xff]   ;;  %v8053_v61 = vld [vmem:[%s11243_s1 + $0xe6c] ss:$16 sps:$4 sm:$0xff]  }
 0x193   :  { %5200 = vmatpush1.bf16.msra.mxu0 %v7957_v62  ;;  %5733 = vmatpush1.bf16.msra.mxu1 %v7960_v63  ;;  %v8048_v62 = vld [vmem:[%s11243_s1 + $0xe60] ss:$16 sps:$4 sm:$0xff]   ;;  %v8051_v63 = vld [vmem:[%s11243_s1 + $0xe68] ss:$16 sps:$4 sm:$0xff]  }
 0x194   :  { %5201 = vmatprep.subr.bf16.mxu0 %v7965_v0  ;;  %5734 = vmatprep.subr.bf16.mxu1 %v7968_v1  ;;  %v8056_v0 = vld [vmem:[%s11243_s1 + $0xe84] ss:$16 sps:$4 sm:$0xff]   ;;  %v8059_v1 = vld [vmem:[%s11243_s1 + $0xe8c] ss:$16 sps:$4 sm:$0xff]  }
 0x197   :  { %5202 = vmatpush1.bf16.msra.mxu0 %v7963_v2  ;;  %5735 = vmatpush1.bf16.msra.mxu1 %v7966_v3  ;;  %v8054_v2 = vld [vmem:[%s11243_s1 + $0xe80] ss:$16 sps:$4 sm:$0xff]   ;;  %v8057_v3 = vld [vmem:[%s11243_s1 + $0xe88] ss:$16 sps:$4 sm:$0xff]  }
 0x198   :  { %5203 = vmatprep.subr.bf16.mxu0 %v7971_v4  ;;  %5736 = vmatprep.subr.bf16.mxu1 %v7974_v5  ;;  %v8062_v4 = vld [vmem:[%s11243_s1 + $0xea4] ss:$16 sps:$4 sm:$0xff]   ;;  %v8065_v5 = vld [vmem:[%s11243_s1 + $0xeac] ss:$16 sps:$4 sm:$0xff]  }
 0x19b   :  { %5204 = vmatpush1.bf16.msra.mxu0 %v7969_v6  ;;  %5737 = vmatpush1.bf16.msra.mxu1 %v7972_v7  ;;  %v8060_v6 = vld [vmem:[%s11243_s1 + $0xea0] ss:$16 sps:$4 sm:$0xff]   ;;  %v8063_v7 = vld [vmem:[%s11243_s1 + $0xea8] ss:$16 sps:$4 sm:$0xff]  }
 0x19c   :  { %5205 = vmatprep.subr.bf16.mxu0 %v7977_v8  ;;  %5738 = vmatprep.subr.bf16.mxu1 %v7980_v9  ;;  %v8068_v8 = vld [vmem:[%s11243_s1 + $0xec4] ss:$16 sps:$4 sm:$0xff]   ;;  %v8071_v9 = vld [vmem:[%s11243_s1 + $0xecc] ss:$16 sps:$4 sm:$0xff]  }
 0x19f   :  { %5206 = vmatpush1.bf16.msra.mxu0 %v7975_v10  ;;  %5739 = vmatpush1.bf16.msra.mxu1 %v7978_v11  ;;  %v8066_v10 = vld [vmem:[%s11243_s1 + $0xec0] ss:$16 sps:$4 sm:$0xff]   ;;  %v8069_v11 = vld [vmem:[%s11243_s1 + $0xec8] ss:$16 sps:$4 sm:$0xff]  }
 0x1a0   :  { %5207 = vmatprep.subr.bf16.mxu0 %v7983_v12  ;;  %5740 = vmatprep.subr.bf16.mxu1 %v7986_v52  ;;  %v8074_v12 = vld [vmem:[%s11243_s1 + $0xee4] ss:$16 sps:$4 sm:$0xff]   ;;  %v8077_v52 = vld [vmem:[%s11243_s1 + $0xeec] ss:$16 sps:$4 sm:$0xff]  }
 0x1a3   :  { %5208 = vmatpush1.bf16.msra.mxu0 %v7981_v15  ;;  %5741 = vmatpush1.bf16.msra.mxu1 %v7984_v16  ;;  %v8072_v15 = vld [vmem:[%s11243_s1 + $0xee0] ss:$16 sps:$4 sm:$0xff]   ;;  %v8075_v16 = vld [vmem:[%s11243_s1 + $0xee8] ss:$16 sps:$4 sm:$0xff]  }
 0x1a4   :  { %5209 = vmatprep.subr.bf16.mxu0 %v7989_v17  ;;  %5742 = vmatprep.subr.bf16.mxu1 %v7992_v18  ;;  %v8080_v17 = vld [vmem:[%s11243_s1 + $0xf04] ss:$16 sps:$4 sm:$0xff]   ;;  %v8083_v18 = vld [vmem:[%s11243_s1 + $0xf0c] ss:$16 sps:$4 sm:$0xff]  }
 0x1a7   :  { %5210 = vmatpush1.bf16.msra.mxu0 %v7987_v19  ;;  %5743 = vmatpush1.bf16.msra.mxu1 %v7990_v20  ;;  %v8078_v19 = vld [vmem:[%s11243_s1 + $0xf00] ss:$16 sps:$4 sm:$0xff]   ;;  %v8081_v20 = vld [vmem:[%s11243_s1 + $0xf08] ss:$16 sps:$4 sm:$0xff]  }
 0x1a8   :  { %5211 = vmatprep.subr.bf16.mxu0 %v7995_v22  ;;  %5744 = vmatprep.subr.bf16.mxu1 %v7998_v23  ;;  %v8086_v22 = vld [vmem:[%s11243_s1 + $0xf24] ss:$16 sps:$4 sm:$0xff]   ;;  %v8089_v23 = vld [vmem:[%s11243_s1 + $0xf2c] ss:$16 sps:$4 sm:$0xff]  }
 0x1ab   :  { %5212 = vmatpush1.bf16.msra.mxu0 %v7993_v24  ;;  %5745 = vmatpush1.bf16.msra.mxu1 %v7996_v13  ;;  %v8084_v24 = vld [vmem:[%s11243_s1 + $0xf20] ss:$16 sps:$4 sm:$0xff]   ;;  %v8087_v13 = vld [vmem:[%s11243_s1 + $0xf28] ss:$16 sps:$4 sm:$0xff]  }
 0x1ac   :  { %5213 = vmatprep.subr.bf16.mxu0 %v8001_v27  ;;  %5746 = vmatprep.subr.bf16.mxu1 %v8004_v28  ;;  %v8092_v27 = vld [vmem:[%s11243_s1 + $0xf44] ss:$16 sps:$4 sm:$0xff]   ;;  %v8095_v28 = vld [vmem:[%s11243_s1 + $0xf4c] ss:$16 sps:$4 sm:$0xff]  }
 0x1af   :  { %5214 = vmatpush1.bf16.msra.mxu0 %v7999_v29  ;;  %5747 = vmatpush1.bf16.msra.mxu1 %v8002_v14  ;;  %v8090_v29 = vld [vmem:[%s11243_s1 + $0xf40] ss:$16 sps:$4 sm:$0xff]   ;;  %v8093_v14 = vld [vmem:[%s11243_s1 + $0xf48] ss:$16 sps:$4 sm:$0xff]  }
 0x1b0   :  { %5215 = vmatprep.subr.bf16.mxu0 %v8007_v30  ;;  %5748 = vmatprep.subr.bf16.mxu1 %v8010_v31  ;;  %v8098_v30 = vld [vmem:[%s11243_s1 + $0xf64] ss:$16 sps:$4 sm:$0xff]   ;;  %v8101_v31 = vld [vmem:[%s11243_s1 + $0xf6c] ss:$16 sps:$4 sm:$0xff]  }
 0x1b3   :  { %5216 = vmatpush1.bf16.msra.mxu0 %v8005_v25  ;;  %5749 = vmatpush1.bf16.msra.mxu1 %v8008_v32 }
 0x1b4   :  { %5217 = vmatprep.subr.bf16.mxu0 %v8013_v33  ;;  %5750 = vmatprep.subr.bf16.mxu1 %v8016_v26 }
 0x1b7   :  { %5218 = vmatpush1.bf16.msra.mxu0 %v8011_v36  ;;  %5751 = vmatpush1.bf16.msra.mxu1 %v8014_v37 }
 0x1b8   :  { %5219 = vmatprep.subr.bf16.mxu0 %v8019_v21  ;;  %5752 = vmatprep.subr.bf16.mxu1 %v8022_v39 }
 0x1bb   :  { %5220 = vmatpush1.bf16.msra.mxu0 %v8017_v40  ;;  %5753 = vmatpush1.bf16.msra.mxu1 %v8020_v41 }
 0x1bc   :  { %5221 = vmatprep.subr.bf16.mxu0 %v8025_v34  ;;  %5754 = vmatprep.subr.bf16.mxu1 %v8028_v43 }
 0x1bf   :  { %5222 = vmatpush1.bf16.msra.mxu0 %v8023_v44  ;;  %5755 = vmatpush1.bf16.msra.mxu1 %v8026_v45 }
 0x1c0   :  { %5232 = vmatprep.subr.bf16.mxu0 %v8032_v46  ;;  %5765 = vmatprep.subr.bf16.mxu1 %v8035_v35 }
 0x1c2   :  { %5224 = vmatmul.mubr.bf16.vlgmr.msra.gmra.mrb[0].mxu0 %v10059_v48  ;;  %5757 = vmatmul.mubr.bf16.vlgmr.msra.gmra.mrb[0].mxu1 %v10059_v48 }
 0x1c3   :  { %5233 = vmatpush1.bf16.msra.mxu0 %v8030_v50  ;;  %5766 = vmatpush1.bf16.msra.mxu1 %v8033_v51 }
 0x1c4   :  { %5234 = vmatprep.subr.bf16.mxu0 %v8038_v53  ;;  %5767 = vmatprep.subr.bf16.mxu1 %v8041_v38 }
 0x1c5   :  { %5264 = vmatprep.mubr.bf16.mxu0 %v933_v54  ;;  %5797 = vmatprep.mubr.bf16.mxu1 %v933_v54 }
 0x1c7   :  { %5235 = vmatpush1.bf16.msra.mxu0 %v8036_v55  ;;  %5768 = vmatpush1.bf16.msra.mxu1 %v8039_v56 }
 0x1c8   :  { %5236 = vmatprep.subr.bf16.mxu0 %v8044_v47  ;;  %5769 = vmatprep.subr.bf16.mxu1 %v8047_v57 }
 0x1cb   :  { %5237 = vmatpush1.bf16.msra.mxu0 %v8042_v58  ;;  %5770 = vmatpush1.bf16.msra.mxu1 %v8045_v59 }
 0x1cc   :  { %5238 = vmatprep.subr.bf16.mxu0 %v8050_v60  ;;  %5771 = vmatprep.subr.bf16.mxu1 %v8053_v61 }
 0x1cf   :  { %5239 = vmatpush1.bf16.msra.mxu0 %v8048_v62  ;;  %5772 = vmatpush1.bf16.msra.mxu1 %v8051_v63 }
 0x1d0   :  { %5240 = vmatprep.subr.bf16.mxu0 %v8056_v0  ;;  %5773 = vmatprep.subr.bf16.mxu1 %v8059_v1 }
 0x1d3   :  { %5241 = vmatpush1.bf16.msra.mxu0 %v8054_v2  ;;  %5774 = vmatpush1.bf16.msra.mxu1 %v8057_v3 }
 0x1d4   :  { %5242 = vmatprep.subr.bf16.mxu0 %v8062_v4  ;;  %5775 = vmatprep.subr.bf16.mxu1 %v8065_v5 }
 0x1d7   :  { %5243 = vmatpush1.bf16.msra.mxu0 %v8060_v6  ;;  %5776 = vmatpush1.bf16.msra.mxu1 %v8063_v7 }
 0x1d8   :  { %5244 = vmatprep.subr.bf16.mxu0 %v8068_v8  ;;  %5777 = vmatprep.subr.bf16.mxu1 %v8071_v9 }
 0x1db   :  { %5245 = vmatpush1.bf16.msra.mxu0 %v8066_v10  ;;  %5778 = vmatpush1.bf16.msra.mxu1 %v8069_v11 }
 0x1dc   :  { %5246 = vmatprep.subr.bf16.mxu0 %v8074_v12  ;;  %5779 = vmatprep.subr.bf16.mxu1 %v8077_v52 }
 0x1df   :  { %5247 = vmatpush1.bf16.msra.mxu0 %v8072_v15  ;;  %5780 = vmatpush1.bf16.msra.mxu1 %v8075_v16 }
 0x1e0   :  { %5248 = vmatprep.subr.bf16.mxu0 %v8080_v17  ;;  %5781 = vmatprep.subr.bf16.mxu1 %v8083_v18 }
 0x1e3   :  { %5249 = vmatpush1.bf16.msra.mxu0 %v8078_v19  ;;  %5782 = vmatpush1.bf16.msra.mxu1 %v8081_v20 }
 0x1e4   :  { %5250 = vmatprep.subr.bf16.mxu0 %v8086_v22  ;;  %5783 = vmatprep.subr.bf16.mxu1 %v8089_v23 }
 0x1e7   :  { %5251 = vmatpush1.bf16.msra.mxu0 %v8084_v24  ;;  %5784 = vmatpush1.bf16.msra.mxu1 %v8087_v13 }
 0x1e8   :  { %5252 = vmatprep.subr.bf16.mxu0 %v8092_v27  ;;  %5785 = vmatprep.subr.bf16.mxu1 %v8095_v28 }
 0x1e9   :  { %10 = vsyncpa [#allocation3], 0  ;;  %v8096_v25 = vld [vmem:[%s11243_s1 + $0xf60] ss:$16 sps:$4 sm:$0xff]   ;;  %v8099_v32 = vld [vmem:[%s11243_s1 + $0xf68] ss:$16 sps:$4 sm:$0xff]   ;;  %v931_v47 = vcombine.high %v10059_v48, %v10059_v48 }
 0x1ea   :  { %v8104_v33 = vld [vmem:[%s11243_s1 + $0xf84] ss:$16 sps:$4 sm:$0xff]   ;;  %v8107_v26 = vld [vmem:[%s11243_s1 + $0xf8c] ss:$16 sps:$4 sm:$0xff]   ;;  %v8102_v36 = vld [vmem:[%s11243_s1 + $0xf80] ss:$16 sps:$4 sm:$0xff]  }
 0x1eb   :  { %5253 = vmatpush1.bf16.msra.mxu0 %v8090_v29  ;;  %5786 = vmatpush1.bf16.msra.mxu1 %v8093_v14  ;;  %v8105_v37 = vld [vmem:[%s11243_s1 + $0xf88] ss:$16 sps:$4 sm:$0xff]   ;;  %v8110_v21 = vld [vmem:[%s11243_s1 + $0xfa4] ss:$16 sps:$4 sm:$0xff]   ;;  %v8113_v39 = vld [vmem:[%s11243_s1 + $0xfac] ss:$16 sps:$4 sm:$0xff]  }
 0x1ec   :  { %5254 = vmatprep.subr.bf16.mxu0 %v8098_v30  ;;  %5787 = vmatprep.subr.bf16.mxu1 %v8101_v31  ;;  %v8108_v40 = vld [vmem:[%s11243_s1 + $0xfa0] ss:$16 sps:$4 sm:$0xff]   ;;  %v8111_v41 = vld [vmem:[%s11243_s1 + $0xfa8] ss:$16 sps:$4 sm:$0xff]   ;;  %v8116_v34 = vld [vmem:[%s11243_s1 + $0xfc4] ss:$16 sps:$4 sm:$0xff]  }
 0x1ed   :  { %v8119_v43 = vld [vmem:[%s11243_s1 + $0xfcc] ss:$16 sps:$4 sm:$0xff]   ;;  %v10236_v44 = vld [vmem:[%s11242_s0 + $0x10] sm:$0xff]  ;;  %v8117_v46 = vld [vmem:[%s11243_s1 + $0xfc8] ss:$16 sps:$4 sm:$0xff]   ;;  %vm4941_vm0 = vcmask 523264  }
 0x1ee   :  { %v8114_v45 = vld [vmem:[%s11243_s1 + $0xfc0] ss:$16 sps:$4 sm:$0xff]   ;;  %v8122_v35 = vld [vmem:[%s11243_s1 + $0xfe4] ss:$16 sps:$4 sm:$0xff]   ;;  %v8125_v50 = vld [vmem:[%s11243_s1 + $0xfec] ss:$16 sps:$4 sm:$0xff]   ;;  %v10252_v51 = vrot.slane %v10236_v44, %v8765_v49 }
 0x1ef   :  { %5255 = vmatpush1.bf16.msra.mxu0 %v8096_v25  ;;  %5788 = vmatpush1.bf16.msra.mxu1 %v8099_v32  ;;  %v8120_v53 = vld [vmem:[%s11243_s1 + $0xfe0] ss:$16 sps:$4 sm:$0xff]   ;;  %v8123_v38 = vld [vmem:[%s11243_s1 + $0xfe8] ss:$16 sps:$4 sm:$0xff]   ;;  %v8128_v54 = vld [vmem:[%s11243_s1 + $0x1004] ss:$16 sps:$4 sm:$0xff]  }
 0x1f0   :  { %5256 = vmatprep.subr.bf16.mxu0 %v8104_v33  ;;  %5789 = vmatprep.subr.bf16.mxu1 %v8107_v26  ;;  %v8131_v55 = vld [vmem:[%s11243_s1 + $0x100c] ss:$16 sps:$4 sm:$0xff]   ;;  %v949_v56 = vcombine.high %v10252_v51, %v10252_v51  ;;  %v8126_v57 = vld [vmem:[%s11243_s1 + $0x1000] ss:$16 sps:$4 sm:$0xff]   ;;  %v8129_v58 = vld [vmem:[%s11243_s1 + $0x1008] ss:$16 sps:$4 sm:$0xff]  }
 0x1f1   :  { %v8134_v59 = vld [vmem:[%s11243_s1 + $0x1024] ss:$16 sps:$4 sm:$0xff]   ;;  %v8137_v48 = vld [vmem:[%s11243_s1 + $0x102c] ss:$16 sps:$4 sm:$0xff]   ;;  %v8132_v61 = vld [vmem:[%s11243_s1 + $0x1020] ss:$16 sps:$4 sm:$0xff]  }
 0x1f2   :  { %v10283_v60 = vrot.slane %v949_v56, %v8765_v49  ;;  %v8135_v62 = vld [vmem:[%s11243_s1 + $0x1028] ss:$16 sps:$4 sm:$0xff]   ;;  %v8140_v63 = vld [vmem:[%s11243_s1 + $0x1044] ss:$16 sps:$4 sm:$0xff]   ;;  %v8143_v0 = vld [vmem:[%s11243_s1 + $0x104c] ss:$16 sps:$4 sm:$0xff]  }
 0x1f3   :  { %5257 = vmatpush1.bf16.msra.mxu0 %v8102_v36  ;;  %5790 = vmatpush1.bf16.msra.mxu1 %v8105_v37  ;;  %v8138_v1 = vld [vmem:[%s11243_s1 + $0x1040] ss:$16 sps:$4 sm:$0xff]   ;;  %v8141_v2 = vld [vmem:[%s11243_s1 + $0x1048] ss:$16 sps:$4 sm:$0xff]   ;;  %v8146_v3 = vld [vmem:[%s11243_s1 + $0x1064] ss:$16 sps:$4 sm:$0xff]  }
 0x1f4   :  { %5258 = vmatprep.subr.bf16.mxu0 %v8110_v21  ;;  %5791 = vmatprep.subr.bf16.mxu1 %v8113_v39  ;;  %v8149_v4 = vld [vmem:[%s11243_s1 + $0x106c] ss:$16 sps:$4 sm:$0xff]   ;;  %v8144_v5 = vld [vmem:[%s11243_s1 + $0x1060] ss:$16 sps:$4 sm:$0xff]   ;;  %v8147_v6 = vld [vmem:[%s11243_s1 + $0x1068] ss:$16 sps:$4 sm:$0xff]  }
 0x1f5   :  { %v8152_v7 = vld [vmem:[%s11243_s1 + $0x1084] ss:$16 sps:$4 sm:$0xff]   ;;  %v8155_v8 = vld [vmem:[%s11243_s1 + $0x108c] ss:$16 sps:$4 sm:$0xff]   ;;  %v8150_v9 = vld [vmem:[%s11243_s1 + $0x1080] ss:$16 sps:$4 sm:$0xff]  }
 0x1f6   :  { %v8153_v10 = vld [vmem:[%s11243_s1 + $0x1088] ss:$16 sps:$4 sm:$0xff]   ;;  %v8158_v11 = vld [vmem:[%s11243_s1 + $0x10a4] ss:$16 sps:$4 sm:$0xff]   ;;  %v8161_v12 = vld [vmem:[%s11243_s1 + $0x10ac] ss:$16 sps:$4 sm:$0xff]  }
 0x1f7   :  { %5259 = vmatpush1.bf16.msra.mxu0 %v8108_v40  ;;  %5792 = vmatpush1.bf16.msra.mxu1 %v8111_v41  ;;  %v8156_v52 = vld [vmem:[%s11243_s1 + $0x10a0] ss:$16 sps:$4 sm:$0xff]   ;;  %v8159_v15 = vld [vmem:[%s11243_s1 + $0x10a8] ss:$16 sps:$4 sm:$0xff]   ;;  %v8164_v16 = vld [vmem:[%s11243_s1 + $0x10c4] ss:$16 sps:$4 sm:$0xff]  }
 0x1f8   :  { %5260 = vmatprep.subr.bf16.mxu0 %v8116_v34  ;;  %5793 = vmatprep.subr.bf16.mxu1 %v8119_v43  ;;  %v8167_v17 = vld [vmem:[%s11243_s1 + $0x10cc] ss:$16 sps:$4 sm:$0xff]   ;;  %v8162_v18 = vld [vmem:[%s11243_s1 + $0x10c0] ss:$16 sps:$4 sm:$0xff]   ;;  %v8165_v19 = vld [vmem:[%s11243_s1 + $0x10c8] ss:$16 sps:$4 sm:$0xff]  }
 0x1f9   :  { %v8170_v20 = vld [vmem:[%s11243_s1 + $0x10e4] ss:$16 sps:$4 sm:$0xff]   ;;  %v8173_v22 = vld [vmem:[%s11243_s1 + $0x10ec] ss:$16 sps:$4 sm:$0xff]   ;;  %v8168_v23 = vld [vmem:[%s11243_s1 + $0x10e0] ss:$16 sps:$4 sm:$0xff]  }
 0x1fa   :  { %v8171_v24 = vld [vmem:[%s11243_s1 + $0x10e8] ss:$16 sps:$4 sm:$0xff]   ;;  %v8176_v13 = vld [vmem:[%s11243_s1 + $0x1104] ss:$16 sps:$4 sm:$0xff]   ;;  %v8179_v27 = vld [vmem:[%s11243_s1 + $0x110c] ss:$16 sps:$4 sm:$0xff]  }
 0x1fb   :  { %5261 = vmatpush1.bf16.msra.mxu0 %v8114_v45  ;;  %5794 = vmatpush1.bf16.msra.mxu1 %v8117_v46  ;;  %v8174_v28 = vld [vmem:[%s11243_s1 + $0x1100] ss:$16 sps:$4 sm:$0xff]   ;;  %v8177_v29 = vld [vmem:[%s11243_s1 + $0x1108] ss:$16 sps:$4 sm:$0xff]   ;;  %v8182_v14 = vld [vmem:[%s11243_s1 + $0x1124] ss:$16 sps:$4 sm:$0xff]  }
 0x1fc   :  { %5262 = vmatprep.subr.bf16.mxu0 %v8122_v35  ;;  %5795 = vmatprep.subr.bf16.mxu1 %v8125_v50  ;;  %v8185_v30 = vld [vmem:[%s11243_s1 + $0x112c] ss:$16 sps:$4 sm:$0xff]   ;;  %v8180_v31 = vld [vmem:[%s11243_s1 + $0x1120] ss:$16 sps:$4 sm:$0xff]   ;;  %v8183_v25 = vld [vmem:[%s11243_s1 + $0x1128] ss:$16 sps:$4 sm:$0xff]  }
 0x1fd   :  { %v8188_v32 = vld [vmem:[%s11243_s1 + $0x1144] ss:$16 sps:$4 sm:$0xff]   ;;  %v8191_v33 = vld [vmem:[%s11243_s1 + $0x114c] ss:$16 sps:$4 sm:$0xff]   ;;  %v8186_v26 = vld [vmem:[%s11243_s1 + $0x1140] ss:$16 sps:$4 sm:$0xff]  }
 0x1fe   :  { %v8189_v36 = vld [vmem:[%s11243_s1 + $0x1148] ss:$16 sps:$4 sm:$0xff]   ;;  %v8194_v37 = vld [vmem:[%s11243_s1 + $0x1164] ss:$16 sps:$4 sm:$0xff]   ;;  %v8197_v21 = vld [vmem:[%s11243_s1 + $0x116c] ss:$16 sps:$4 sm:$0xff]  }
 0x1ff   :  { %5263 = vmatpush1.bf16.msra.mxu0 %v8120_v53  ;;  %5796 = vmatpush1.bf16.msra.mxu1 %v8123_v38  ;;  %v8192_v39 = vld [vmem:[%s11243_s1 + $0x1160] ss:$16 sps:$4 sm:$0xff]   ;;  %v8195_v40 = vld [vmem:[%s11243_s1 + $0x1168] ss:$16 sps:$4 sm:$0xff]   ;;  %v8200_v41 = vld [vmem:[%s11243_s1 + $0x1184] ss:$16 sps:$4 sm:$0xff]  }
 0x200   :  { %5273 = vmatprep.subr.bf16.mxu0 %v8128_v54  ;;  %5806 = vmatprep.subr.bf16.mxu1 %v8131_v55  ;;  %v8203_v34 = vld [vmem:[%s11243_s1 + $0x118c] ss:$16 sps:$4 sm:$0xff]   ;;  %v8198_v43 = vld [vmem:[%s11243_s1 + $0x1180] ss:$16 sps:$4 sm:$0xff]   ;;  %v8201_v45 = vld [vmem:[%s11243_s1 + $0x1188] ss:$16 sps:$4 sm:$0xff]  }
 0x201   :  { %v8206_v46 = vld [vmem:[%s11243_s1 + $0x11a4] ss:$16 sps:$4 sm:$0xff]   ;;  %v8209_v35 = vld [vmem:[%s11243_s1 + $0x11ac] ss:$16 sps:$4 sm:$0xff]   ;;  %v8204_v50 = vld [vmem:[%s11243_s1 + $0x11a0] ss:$16 sps:$4 sm:$0xff]  }
 0x202   :  { %5265 = vmatmul.mubr.bf16.vlgmr.msra.gmra.mrb[0].mxu0 %v931_v47  ;;  %5798 = vmatmul.mubr.bf16.vlgmr.msra.gmra.mrb[0].mxu1 %v931_v47  ;;  %v8207_v53 = vld [vmem:[%s11243_s1 + $0x11a8] ss:$16 sps:$4 sm:$0xff]   ;;  %v8212_v38 = vld [vmem:[%s11243_s1 + $0x11c4] ss:$16 sps:$4 sm:$0xff]   ;;  %v8215_v54 = vld [vmem:[%s11243_s1 + $0x11cc] ss:$16 sps:$4 sm:$0xff]  }
 0x203   :  { %5274 = vmatpush1.bf16.msra.mxu0 %v8126_v57  ;;  %5807 = vmatpush1.bf16.msra.mxu1 %v8129_v58  ;;  %v8210_v55 = vld [vmem:[%s11243_s1 + $0x11c0] ss:$16 sps:$4 sm:$0xff]   ;;  %v8213_v56 = vld [vmem:[%s11243_s1 + $0x11c8] ss:$16 sps:$4 sm:$0xff]   ;;  %v8218_v47 = vld [vmem:[%s11243_s1 + $0x11e4] ss:$16 sps:$4 sm:$0xff]  }
 0x204   :  { %5275 = vmatprep.subr.bf16.mxu0 %v8134_v59  ;;  %5808 = vmatprep.subr.bf16.mxu1 %v8137_v48  ;;  %v8221_v57 = vld [vmem:[%s11243_s1 + $0x11ec] ss:$16 sps:$4 sm:$0xff]   ;;  %v8216_v58 = vld [vmem:[%s11243_s1 + $0x11e0] ss:$16 sps:$4 sm:$0xff]   ;;  %v8219_v59 = vld [vmem:[%s11243_s1 + $0x11e8] ss:$16 sps:$4 sm:$0xff]  }
 0x205   :  { %5305 = vmatprep.mubr.bf16.mxu0 %v10283_v60  ;;  %5838 = vmatprep.mubr.bf16.mxu1 %v10283_v60  ;;  %v8224_v48 = vld [vmem:[%s11243_s1 + $0x1204] ss:$16 sps:$4 sm:$0xff]   ;;  %vm6362_vm1 = vcmask 140288  }
 0x207   :  { %5276 = vmatpush1.bf16.msra.mxu0 %v8132_v61  ;;  %5809 = vmatpush1.bf16.msra.mxu1 %v8135_v62  ;;  %v8227_v61 = vld [vmem:[%s11243_s1 + $0x120c] ss:$16 sps:$4 sm:$0xff]   ;;  %v10469_v62 = vrot.slane %v10252_v51, %v8765_v49 }
 0x208   :  { %5277 = vmatprep.subr.bf16.mxu0 %v8140_v63  ;;  %5810 = vmatprep.subr.bf16.mxu1 %v8143_v0  ;;  %v8222_v63 = vld [vmem:[%s11243_s1 + $0x1200] ss:$16 sps:$4 sm:$0xff]   ;;  %v8225_v0 = vld [vmem:[%s11243_s1 + $0x1208] ss:$16 sps:$4 sm:$0xff]   ;;  %v8233_v51 = vld [vmem:[%s11243_s1 + $0x122c] ss:$16 sps:$4 sm:$0xff]  }
 0x20b   :  { %5278 = vmatpush1.bf16.msra.mxu0 %v8138_v1  ;;  %5811 = vmatpush1.bf16.msra.mxu1 %v8141_v2  ;;  %v8230_v1 = vld [vmem:[%s11243_s1 + $0x1224] ss:$16 sps:$4 sm:$0xff]   ;;  %v981_v2 = vcombine.high %v10283_v60, %v10283_v60 }
 0x20c   :  { %5279 = vmatprep.subr.bf16.mxu0 %v8146_v3  ;;  %5812 = vmatprep.subr.bf16.mxu1 %v8149_v4  ;;  %v8228_v3 = vld [vmem:[%s11243_s1 + $0x1220] ss:$16 sps:$4 sm:$0xff]   ;;  %v8231_v4 = vld [vmem:[%s11243_s1 + $0x1228] ss:$16 sps:$4 sm:$0xff]   ;;  %v8236_v60 = vld [vmem:[%s11243_s1 + $0x1244] ss:$16 sps:$4 sm:$0xff]  }
 0x20f   :  { %5280 = vmatpush1.bf16.msra.mxu0 %v8144_v5  ;;  %5813 = vmatpush1.bf16.msra.mxu1 %v8147_v6  ;;  %v8239_v5 = vld [vmem:[%s11243_s1 + $0x124c] ss:$16 sps:$4 sm:$0xff]   ;;  %v8234_v6 = vld [vmem:[%s11243_s1 + $0x1240] ss:$16 sps:$4 sm:$0xff]  }
 0x210   :  { %5281 = vmatprep.subr.bf16.mxu0 %v8152_v7  ;;  %5814 = vmatprep.subr.bf16.mxu1 %v8155_v8  ;;  %v8237_v7 = vld [vmem:[%s11243_s1 + $0x1248] ss:$16 sps:$4 sm:$0xff]   ;;  %v8242_v8 = vld [vmem:[%s11243_s1 + $0x1264] ss:$16 sps:$4 sm:$0xff]  }
 0x213   :  { %5282 = vmatpush1.bf16.msra.mxu0 %v8150_v9  ;;  %5815 = vmatpush1.bf16.msra.mxu1 %v8153_v10  ;;  %v8245_v9 = vld [vmem:[%s11243_s1 + $0x126c] ss:$16 sps:$4 sm:$0xff]   ;;  %v8240_v10 = vld [vmem:[%s11243_s1 + $0x1260] ss:$16 sps:$4 sm:$0xff]  }
 0x214   :  { %5283 = vmatprep.subr.bf16.mxu0 %v8158_v11  ;;  %5816 = vmatprep.subr.bf16.mxu1 %v8161_v12  ;;  %v8243_v11 = vld [vmem:[%s11243_s1 + $0x1268] ss:$16 sps:$4 sm:$0xff]   ;;  %v8248_v12 = vld [vmem:[%s11243_s1 + $0x1284] ss:$16 sps:$4 sm:$0xff]  }
 0x217   :  { %5284 = vmatpush1.bf16.msra.mxu0 %v8156_v52  ;;  %5817 = vmatpush1.bf16.msra.mxu1 %v8159_v15  ;;  %v8251_v52 = vld [vmem:[%s11243_s1 + $0x128c] ss:$16 sps:$4 sm:$0xff]   ;;  %v8246_v15 = vld [vmem:[%s11243_s1 + $0x1280] ss:$16 sps:$4 sm:$0xff]  }
 0x218   :  { %5285 = vmatprep.subr.bf16.mxu0 %v8164_v16  ;;  %5818 = vmatprep.subr.bf16.mxu1 %v8167_v17  ;;  %v8249_v16 = vld [vmem:[%s11243_s1 + $0x1288] ss:$16 sps:$4 sm:$0xff]   ;;  %v8254_v17 = vld [vmem:[%s11243_s1 + $0x12a4] ss:$16 sps:$4 sm:$0xff]  }
 0x21b   :  { %5286 = vmatpush1.bf16.msra.mxu0 %v8162_v18  ;;  %5819 = vmatpush1.bf16.msra.mxu1 %v8165_v19  ;;  %v8257_v18 = vld [vmem:[%s11243_s1 + $0x12ac] ss:$16 sps:$4 sm:$0xff]   ;;  %v8252_v19 = vld [vmem:[%s11243_s1 + $0x12a0] ss:$16 sps:$4 sm:$0xff]  }
 0x21c   :  { %5287 = vmatprep.subr.bf16.mxu0 %v8170_v20  ;;  %5820 = vmatprep.subr.bf16.mxu1 %v8173_v22  ;;  %v8255_v20 = vld [vmem:[%s11243_s1 + $0x12a8] ss:$16 sps:$4 sm:$0xff]   ;;  %v8260_v22 = vld [vmem:[%s11243_s1 + $0x12c4] ss:$16 sps:$4 sm:$0xff]  }
 0x21f   :  { %5288 = vmatpush1.bf16.msra.mxu0 %v8168_v23  ;;  %5821 = vmatpush1.bf16.msra.mxu1 %v8171_v24  ;;  %v8263_v23 = vld [vmem:[%s11243_s1 + $0x12cc] ss:$16 sps:$4 sm:$0xff]   ;;  %v8258_v24 = vld [vmem:[%s11243_s1 + $0x12c0] ss:$16 sps:$4 sm:$0xff]  }
 0x220   :  { %5289 = vmatprep.subr.bf16.mxu0 %v8176_v13  ;;  %5822 = vmatprep.subr.bf16.mxu1 %v8179_v27  ;;  %v8261_v13 = vld [vmem:[%s11243_s1 + $0x12c8] ss:$16 sps:$4 sm:$0xff]   ;;  %v8266_v27 = vld [vmem:[%s11243_s1 + $0x12e4] ss:$16 sps:$4 sm:$0xff]  }
 0x223   :  { %5290 = vmatpush1.bf16.msra.mxu0 %v8174_v28  ;;  %5823 = vmatpush1.bf16.msra.mxu1 %v8177_v29  ;;  %v8269_v28 = vld [vmem:[%s11243_s1 + $0x12ec] ss:$16 sps:$4 sm:$0xff]   ;;  %v8264_v29 = vld [vmem:[%s11243_s1 + $0x12e0] ss:$16 sps:$4 sm:$0xff]  }
 0x224   :  { %5291 = vmatprep.subr.bf16.mxu0 %v8182_v14  ;;  %5824 = vmatprep.subr.bf16.mxu1 %v8185_v30  ;;  %v8267_v14 = vld [vmem:[%s11243_s1 + $0x12e8] ss:$16 sps:$4 sm:$0xff]   ;;  %v8272_v30 = vld [vmem:[%s11243_s1 + $0x1304] ss:$16 sps:$4 sm:$0xff]  }
 0x227   :  { %5292 = vmatpush1.bf16.msra.mxu0 %v8180_v31  ;;  %5825 = vmatpush1.bf16.msra.mxu1 %v8183_v25  ;;  %v8275_v31 = vld [vmem:[%s11243_s1 + $0x130c] ss:$16 sps:$4 sm:$0xff]   ;;  %v8270_v25 = vld [vmem:[%s11243_s1 + $0x1300] ss:$16 sps:$4 sm:$0xff]  }
 0x228   :  { %5293 = vmatprep.subr.bf16.mxu0 %v8188_v32  ;;  %5826 = vmatprep.subr.bf16.mxu1 %v8191_v33  ;;  %v8273_v32 = vld [vmem:[%s11243_s1 + $0x1308] ss:$16 sps:$4 sm:$0xff]   ;;  %v8278_v33 = vld [vmem:[%s11243_s1 + $0x1324] ss:$16 sps:$4 sm:$0xff]  }
 0x22b   :  { %5294 = vmatpush1.bf16.msra.mxu0 %v8186_v26  ;;  %5827 = vmatpush1.bf16.msra.mxu1 %v8189_v36  ;;  %v8281_v26 = vld [vmem:[%s11243_s1 + $0x132c] ss:$16 sps:$4 sm:$0xff]   ;;  %v8276_v36 = vld [vmem:[%s11243_s1 + $0x1320] ss:$16 sps:$4 sm:$0xff]  }
 0x22c   :  { %5295 = vmatprep.subr.bf16.mxu0 %v8194_v37  ;;  %5828 = vmatprep.subr.bf16.mxu1 %v8197_v21  ;;  %v8279_v37 = vld [vmem:[%s11243_s1 + $0x1328] ss:$16 sps:$4 sm:$0xff]   ;;  %v8284_v21 = vld [vmem:[%s11243_s1 + $0x1344] ss:$16 sps:$4 sm:$0xff]  }
 0x22f   :  { %5296 = vmatpush1.bf16.msra.mxu0 %v8192_v39  ;;  %5829 = vmatpush1.bf16.msra.mxu1 %v8195_v40  ;;  %v8287_v39 = vld [vmem:[%s11243_s1 + $0x134c] ss:$16 sps:$4 sm:$0xff]   ;;  %v8282_v40 = vld [vmem:[%s11243_s1 + $0x1340] ss:$16 sps:$4 sm:$0xff]  }
 0x230   :  { %5297 = vmatprep.subr.bf16.mxu0 %v8200_v41  ;;  %5830 = vmatprep.subr.bf16.mxu1 %v8203_v34  ;;  %v8285_v41 = vld [vmem:[%s11243_s1 + $0x1348] ss:$16 sps:$4 sm:$0xff]   ;;  %v8290_v34 = vld [vmem:[%s11243_s1 + $0x1364] ss:$16 sps:$4 sm:$0xff]  }
 0x233   :  { %5298 = vmatpush1.bf16.msra.mxu0 %v8198_v43  ;;  %5831 = vmatpush1.bf16.msra.mxu1 %v8201_v45  ;;  %v8293_v43 = vld [vmem:[%s11243_s1 + $0x136c] ss:$16 sps:$4 sm:$0xff]   ;;  %v8288_v45 = vld [vmem:[%s11243_s1 + $0x1360] ss:$16 sps:$4 sm:$0xff]  }
 0x234   :  { %5299 = vmatprep.subr.bf16.mxu0 %v8206_v46  ;;  %5832 = vmatprep.subr.bf16.mxu1 %v8209_v35  ;;  %v8291_v46 = vld [vmem:[%s11243_s1 + $0x1368] ss:$16 sps:$4 sm:$0xff]   ;;  %v8296_v35 = vld [vmem:[%s11243_s1 + $0x1384] ss:$16 sps:$4 sm:$0xff]  }
 0x237   :  { %5300 = vmatpush1.bf16.msra.mxu0 %v8204_v50  ;;  %5833 = vmatpush1.bf16.msra.mxu1 %v8207_v53  ;;  %v8299_v50 = vld [vmem:[%s11243_s1 + $0x138c] ss:$16 sps:$4 sm:$0xff]   ;;  %v8294_v53 = vld [vmem:[%s11243_s1 + $0x1380] ss:$16 sps:$4 sm:$0xff]  }
 0x238   :  { %5301 = vmatprep.subr.bf16.mxu0 %v8212_v38  ;;  %5834 = vmatprep.subr.bf16.mxu1 %v8215_v54  ;;  %v8297_v38 = vld [vmem:[%s11243_s1 + $0x1388] ss:$16 sps:$4 sm:$0xff]   ;;  %v8302_v54 = vld [vmem:[%s11243_s1 + $0x13a4] ss:$16 sps:$4 sm:$0xff]  }
 0x23b   :  { %5302 = vmatpush1.bf16.msra.mxu0 %v8210_v55  ;;  %5835 = vmatpush1.bf16.msra.mxu1 %v8213_v56  ;;  %v8305_v55 = vld [vmem:[%s11243_s1 + $0x13ac] ss:$16 sps:$4 sm:$0xff]   ;;  %v8300_v56 = vld [vmem:[%s11243_s1 + $0x13a0] ss:$16 sps:$4 sm:$0xff]  }
 0x23c   :  { %5303 = vmatprep.subr.bf16.mxu0 %v8218_v47  ;;  %5836 = vmatprep.subr.bf16.mxu1 %v8221_v57  ;;  %v8303_v47 = vld [vmem:[%s11243_s1 + $0x13a8] ss:$16 sps:$4 sm:$0xff]   ;;  %v8308_v57 = vld [vmem:[%s11243_s1 + $0x13c4] ss:$16 sps:$4 sm:$0xff]  }
 0x23f   :  { %5304 = vmatpush1.bf16.msra.mxu0 %v8216_v58  ;;  %5837 = vmatpush1.bf16.msra.mxu1 %v8219_v59  ;;  %v8311_v58 = vld [vmem:[%s11243_s1 + $0x13cc] ss:$16 sps:$4 sm:$0xff]   ;;  %v934_v59 = vcombine.high %v10236_v44, %v10236_v44 }
 0x240   :  { %5314 = vmatprep.subr.bf16.mxu0 %v8224_v48  ;;  %5847 = vmatprep.subr.bf16.mxu1 %v8227_v61  ;;  %v8306_v48 = vld [vmem:[%s11243_s1 + $0x13c0] ss:$16 sps:$4 sm:$0xff]   ;;  %v8309_v61 = vld [vmem:[%s11243_s1 + $0x13c8] ss:$16 sps:$4 sm:$0xff]   ;;  %v8317_v44 = vld [vmem:[%s11243_s1 + $0x13ec] ss:$16 sps:$4 sm:$0xff]  }
 0x242   :  { %5306 = vmatmul.mubr.bf16.vlgmr.msra.gmra.mrb[0].mxu0 %v10469_v62  ;;  %5839 = vmatmul.mubr.bf16.vlgmr.msra.gmra.mrb[0].mxu1 %v10469_v62 }
 0x243   :  { %5315 = vmatpush1.bf16.msra.mxu0 %v8222_v63  ;;  %5848 = vmatpush1.bf16.msra.mxu1 %v8225_v0  ;;  %v8314_v63 = vld [vmem:[%s11243_s1 + $0x13e4] ss:$16 sps:$4 sm:$0xff]   ;;  %v10658_v0 = vrot.slane %v934_v59, %v8765_v49  ;;  %v8393_v59 = vld [vmem:[%s11243_s1 + $0x1588] ss:$16 sps:$4 sm:$0xff]  }
 0x244   :  { %5316 = vmatprep.subr.bf16.mxu0 %v8230_v1  ;;  %5849 = vmatprep.subr.bf16.mxu1 %v8233_v51  ;;  %v8312_v1 = vld [vmem:[%s11243_s1 + $0x13e0] ss:$16 sps:$4 sm:$0xff]   ;;  %v8315_v51 = vld [vmem:[%s11243_s1 + $0x13e8] ss:$16 sps:$4 sm:$0xff]  }
 0x245   :  { %5346 = vmatprep.mubr.bf16.mxu0 %v981_v2  ;;  %5879 = vmatprep.mubr.bf16.mxu1 %v981_v2  ;;  %v8320_v2 = vld [vmem:[%s11243_s1 + $0x1404] ss:$16 sps:$4 sm:$0xff]  }
 0x247   :  { %5317 = vmatpush1.bf16.msra.mxu0 %v8228_v3  ;;  %5850 = vmatpush1.bf16.msra.mxu1 %v8231_v4  ;;  %v8323_v3 = vld [vmem:[%s11243_s1 + $0x140c] ss:$16 sps:$4 sm:$0xff]   ;;  %v950_v4 = vcombine.high %v10658_v0, %v10658_v0 }
 0x248   :  { %5318 = vmatprep.subr.bf16.mxu0 %v8236_v60  ;;  %5851 = vmatprep.subr.bf16.mxu1 %v8239_v5  ;;  %v979_v60 = vcombine.high %v10469_v62, %v10469_v62  ;;  %v8318_v5 = vld [vmem:[%s11243_s1 + $0x1400] ss:$16 sps:$4 sm:$0xff]   ;;  %v8329_v62 = vld [vmem:[%s11243_s1 + $0x142c] ss:$16 sps:$4 sm:$0xff]  }
 0x24b   :  { %5319 = vmatpush1.bf16.msra.mxu0 %v8234_v6  ;;  %5852 = vmatpush1.bf16.msra.mxu1 %v8237_v7  ;;  %v8321_v6 = vld [vmem:[%s11243_s1 + $0x1408] ss:$16 sps:$4 sm:$0xff]   ;;  %v8326_v7 = vld [vmem:[%s11243_s1 + $0x1424] ss:$16 sps:$4 sm:$0xff]  }
 0x24c   :  { %5320 = vmatprep.subr.bf16.mxu0 %v8242_v8  ;;  %5853 = vmatprep.subr.bf16.mxu1 %v8245_v9  ;;  %v10689_v8 = vrot.slane %v950_v4, %v8765_v49  ;;  %v8324_v9 = vld [vmem:[%s11243_s1 + $0x1420] ss:$16 sps:$4 sm:$0xff]   ;;  %v8410_v4 = vld [vmem:[%s11243_s1 + $0x15e4] ss:$16 sps:$4 sm:$0xff]  }
 0x24f   :  { %5321 = vmatpush1.bf16.msra.mxu0 %v8240_v10  ;;  %5854 = vmatpush1.bf16.msra.mxu1 %v8243_v11  ;;  %v8327_v10 = vld [vmem:[%s11243_s1 + $0x1428] ss:$16 sps:$4 sm:$0xff]   ;;  %v8332_v11 = vld [vmem:[%s11243_s1 + $0x1444] ss:$16 sps:$4 sm:$0xff]  }
 0x250   :  { %5322 = vmatprep.subr.bf16.mxu0 %v8248_v12  ;;  %5855 = vmatprep.subr.bf16.mxu1 %v8251_v52  ;;  %v8335_v12 = vld [vmem:[%s11243_s1 + $0x144c] ss:$16 sps:$4 sm:$0xff]   ;;  %v8330_v52 = vld [vmem:[%s11243_s1 + $0x1440] ss:$16 sps:$4 sm:$0xff]  }
 0x253   :  { %5323 = vmatpush1.bf16.msra.mxu0 %v8246_v15  ;;  %5856 = vmatpush1.bf16.msra.mxu1 %v8249_v16  ;;  %v8333_v15 = vld [vmem:[%s11243_s1 + $0x1448] ss:$16 sps:$4 sm:$0xff]   ;;  %v8338_v16 = vld [vmem:[%s11243_s1 + $0x1464] ss:$16 sps:$4 sm:$0xff]  }
 0x254   :  { %5324 = vmatprep.subr.bf16.mxu0 %v8254_v17  ;;  %5857 = vmatprep.subr.bf16.mxu1 %v8257_v18  ;;  %v8341_v17 = vld [vmem:[%s11243_s1 + $0x146c] ss:$16 sps:$4 sm:$0xff]   ;;  %v8336_v18 = vld [vmem:[%s11243_s1 + $0x1460] ss:$16 sps:$4 sm:$0xff]  }
 0x257   :  { %5325 = vmatpush1.bf16.msra.mxu0 %v8252_v19  ;;  %5858 = vmatpush1.bf16.msra.mxu1 %v8255_v20  ;;  %v8339_v19 = vld [vmem:[%s11243_s1 + $0x1468] ss:$16 sps:$4 sm:$0xff]   ;;  %v8344_v20 = vld [vmem:[%s11243_s1 + $0x1484] ss:$16 sps:$4 sm:$0xff]  }
 0x258   :  { %5326 = vmatprep.subr.bf16.mxu0 %v8260_v22  ;;  %5859 = vmatprep.subr.bf16.mxu1 %v8263_v23  ;;  %v8347_v22 = vld [vmem:[%s11243_s1 + $0x148c] ss:$16 sps:$4 sm:$0xff]   ;;  %v8342_v23 = vld [vmem:[%s11243_s1 + $0x1480] ss:$16 sps:$4 sm:$0xff]  }
 0x25b   :  { %5327 = vmatpush1.bf16.msra.mxu0 %v8258_v24  ;;  %5860 = vmatpush1.bf16.msra.mxu1 %v8261_v13  ;;  %v8345_v24 = vld [vmem:[%s11243_s1 + $0x1488] ss:$16 sps:$4 sm:$0xff]   ;;  %v8350_v13 = vld [vmem:[%s11243_s1 + $0x14a4] ss:$16 sps:$4 sm:$0xff]  }
 0x25c   :  { %5328 = vmatprep.subr.bf16.mxu0 %v8266_v27  ;;  %5861 = vmatprep.subr.bf16.mxu1 %v8269_v28  ;;  %v8353_v27 = vld [vmem:[%s11243_s1 + $0x14ac] ss:$16 sps:$4 sm:$0xff]   ;;  %v8348_v28 = vld [vmem:[%s11243_s1 + $0x14a0] ss:$16 sps:$4 sm:$0xff]  }
 0x25f   :  { %5329 = vmatpush1.bf16.msra.mxu0 %v8264_v29  ;;  %5862 = vmatpush1.bf16.msra.mxu1 %v8267_v14  ;;  %v8351_v29 = vld [vmem:[%s11243_s1 + $0x14a8] ss:$16 sps:$4 sm:$0xff]   ;;  %v8356_v14 = vld [vmem:[%s11243_s1 + $0x14c4] ss:$16 sps:$4 sm:$0xff]  }
 0x260   :  { %5330 = vmatprep.subr.bf16.mxu0 %v8272_v30  ;;  %5863 = vmatprep.subr.bf16.mxu1 %v8275_v31  ;;  %v8359_v30 = vld [vmem:[%s11243_s1 + $0x14cc] ss:$16 sps:$4 sm:$0xff]   ;;  %v8354_v31 = vld [vmem:[%s11243_s1 + $0x14c0] ss:$16 sps:$4 sm:$0xff]  }
 0x263   :  { %5331 = vmatpush1.bf16.msra.mxu0 %v8270_v25  ;;  %5864 = vmatpush1.bf16.msra.mxu1 %v8273_v32  ;;  %v8357_v25 = vld [vmem:[%s11243_s1 + $0x14c8] ss:$16 sps:$4 sm:$0xff]   ;;  %v8362_v32 = vld [vmem:[%s11243_s1 + $0x14e4] ss:$16 sps:$4 sm:$0xff]  }
 0x264   :  { %5332 = vmatprep.subr.bf16.mxu0 %v8278_v33  ;;  %5865 = vmatprep.subr.bf16.mxu1 %v8281_v26  ;;  %v8365_v33 = vld [vmem:[%s11243_s1 + $0x14ec] ss:$16 sps:$4 sm:$0xff]   ;;  %v8360_v26 = vld [vmem:[%s11243_s1 + $0x14e0] ss:$16 sps:$4 sm:$0xff]  }
 0x267   :  { %5333 = vmatpush1.bf16.msra.mxu0 %v8276_v36  ;;  %5866 = vmatpush1.bf16.msra.mxu1 %v8279_v37  ;;  %v8363_v36 = vld [vmem:[%s11243_s1 + $0x14e8] ss:$16 sps:$4 sm:$0xff]   ;;  %v8368_v37 = vld [vmem:[%s11243_s1 + $0x1504] ss:$16 sps:$4 sm:$0xff]  }
 0x268   :  { %5334 = vmatprep.subr.bf16.mxu0 %v8284_v21  ;;  %5867 = vmatprep.subr.bf16.mxu1 %v8287_v39  ;;  %v8371_v21 = vld [vmem:[%s11243_s1 + $0x150c] ss:$16 sps:$4 sm:$0xff]   ;;  %v8366_v39 = vld [vmem:[%s11243_s1 + $0x1500] ss:$16 sps:$4 sm:$0xff]  }
 0x26b   :  { %5335 = vmatpush1.bf16.msra.mxu0 %v8282_v40  ;;  %5868 = vmatpush1.bf16.msra.mxu1 %v8285_v41  ;;  %v8369_v40 = vld [vmem:[%s11243_s1 + $0x1508] ss:$16 sps:$4 sm:$0xff]   ;;  %v8374_v41 = vld [vmem:[%s11243_s1 + $0x1524] ss:$16 sps:$4 sm:$0xff]  }
 0x26c   :  { %5336 = vmatprep.subr.bf16.mxu0 %v8290_v34  ;;  %5869 = vmatprep.subr.bf16.mxu1 %v8293_v43  ;;  %v8377_v34 = vld [vmem:[%s11243_s1 + $0x152c] ss:$16 sps:$4 sm:$0xff]   ;;  %v8372_v43 = vld [vmem:[%s11243_s1 + $0x1520] ss:$16 sps:$4 sm:$0xff]  }
 0x26f   :  { %5337 = vmatpush1.bf16.msra.mxu0 %v8288_v45  ;;  %5870 = vmatpush1.bf16.msra.mxu1 %v8291_v46  ;;  %v8375_v45 = vld [vmem:[%s11243_s1 + $0x1528] ss:$16 sps:$4 sm:$0xff]   ;;  %v8380_v46 = vld [vmem:[%s11243_s1 + $0x1544] ss:$16 sps:$4 sm:$0xff]  }
 0x270   :  { %5338 = vmatprep.subr.bf16.mxu0 %v8296_v35  ;;  %5871 = vmatprep.subr.bf16.mxu1 %v8299_v50  ;;  %v8383_v35 = vld [vmem:[%s11243_s1 + $0x154c] ss:$16 sps:$4 sm:$0xff]   ;;  %v8378_v50 = vld [vmem:[%s11243_s1 + $0x1540] ss:$16 sps:$4 sm:$0xff]  }
 0x273   :  { %5339 = vmatpush1.bf16.msra.mxu0 %v8294_v53  ;;  %5872 = vmatpush1.bf16.msra.mxu1 %v8297_v38  ;;  %v8381_v53 = vld [vmem:[%s11243_s1 + $0x1548] ss:$16 sps:$4 sm:$0xff]   ;;  %v8386_v38 = vld [vmem:[%s11243_s1 + $0x1564] ss:$16 sps:$4 sm:$0xff]  }
 0x274   :  { %5340 = vmatprep.subr.bf16.mxu0 %v8302_v54  ;;  %5873 = vmatprep.subr.bf16.mxu1 %v8305_v55  ;;  %v8389_v54 = vld [vmem:[%s11243_s1 + $0x156c] ss:$16 sps:$4 sm:$0xff]   ;;  %v8384_v55 = vld [vmem:[%s11243_s1 + $0x1560] ss:$16 sps:$4 sm:$0xff]  }
 0x277   :  { %5341 = vmatpush1.bf16.msra.mxu0 %v8300_v56  ;;  %5874 = vmatpush1.bf16.msra.mxu1 %v8303_v47  ;;  %v8387_v56 = vld [vmem:[%s11243_s1 + $0x1568] ss:$16 sps:$4 sm:$0xff]   ;;  %v8392_v47 = vld [vmem:[%s11243_s1 + $0x1584] ss:$16 sps:$4 sm:$0xff]  }
 0x278   :  { %5342 = vmatprep.subr.bf16.mxu0 %v8308_v57  ;;  %5875 = vmatprep.subr.bf16.mxu1 %v8311_v58  ;;  %v8395_v57 = vld [vmem:[%s11243_s1 + $0x158c] ss:$16 sps:$4 sm:$0xff]   ;;  %v8390_v58 = vld [vmem:[%s11243_s1 + $0x1580] ss:$16 sps:$4 sm:$0xff]  }
 0x27b   :  { %5343 = vmatpush1.bf16.msra.mxu0 %v8306_v48  ;;  %5876 = vmatpush1.bf16.msra.mxu1 %v8309_v61  ;;  %v8398_v48 = vld [vmem:[%s11243_s1 + $0x15a4] ss:$16 sps:$4 sm:$0xff]   ;;  %v8401_v61 = vld [vmem:[%s11243_s1 + $0x15ac] ss:$16 sps:$4 sm:$0xff]  }
 0x27c   :  { %5344 = vmatprep.subr.bf16.mxu0 %v8314_v63  ;;  %5877 = vmatprep.subr.bf16.mxu1 %v8317_v44  ;;  %v8396_v63 = vld [vmem:[%s11243_s1 + $0x15a0] ss:$16 sps:$4 sm:$0xff]   ;;  %v8399_v44 = vld [vmem:[%s11243_s1 + $0x15a8] ss:$16 sps:$4 sm:$0xff]  }
 0x27f   :  { %5345 = vmatpush1.bf16.msra.mxu0 %v8312_v1  ;;  %5878 = vmatpush1.bf16.msra.mxu1 %v8315_v51  ;;  %v8404_v1 = vld [vmem:[%s11243_s1 + $0x15c4] ss:$16 sps:$4 sm:$0xff]   ;;  %v8407_v51 = vld [vmem:[%s11243_s1 + $0x15cc] ss:$16 sps:$4 sm:$0xff]  }
 0x280   :  { %5355 = vmatprep.subr.bf16.mxu0 %v8320_v2  ;;  %5888 = vmatprep.subr.bf16.mxu1 %v8323_v3  ;;  %v8402_v2 = vld [vmem:[%s11243_s1 + $0x15c0] ss:$16 sps:$4 sm:$0xff]   ;;  %v8405_v3 = vld [vmem:[%s11243_s1 + $0x15c8] ss:$16 sps:$4 sm:$0xff]  }
 0x282   :  { %5347 = vmatmul.mubr.bf16.vlgmr.msra.gmra.mrb[0].mxu0 %v979_v60  ;;  %5880 = vmatmul.mubr.bf16.vlgmr.msra.gmra.mrb[0].mxu1 %v979_v60  ;;  %v8413_v60 = vld [vmem:[%s11243_s1 + $0x15ec] ss:$16 sps:$4 sm:$0xff]  }
 0x283   :  { %5356 = vmatpush1.bf16.msra.mxu0 %v8318_v5  ;;  %5889 = vmatpush1.bf16.msra.mxu1 %v8321_v6  ;;  %v8408_v5 = vld [vmem:[%s11243_s1 + $0x15e0] ss:$16 sps:$4 sm:$0xff]   ;;  %v8411_v6 = vld [vmem:[%s11243_s1 + $0x15e8] ss:$16 sps:$4 sm:$0xff]  }
 0x284   :  { %5357 = vmatprep.subr.bf16.mxu0 %v8326_v7  ;;  %5890 = vmatprep.subr.bf16.mxu1 %v8329_v62  ;;  %v8417_v7 = vld [vmem:[%s11243_s1 + $0x1604] ss:$16 sps:$4 sm:$0xff]   ;;  %v8420_v62 = vld [vmem:[%s11243_s1 + $0x160c] ss:$16 sps:$4 sm:$0xff]  }
 0x285   :  { %5387 = vmatprep.mubr.bf16.mxu0 %v10689_v8  ;;  %5920 = vmatprep.mubr.bf16.mxu1 %v10689_v8 }
 0x287   :  { %5358 = vmatpush1.bf16.msra.mxu0 %v8324_v9  ;;  %5891 = vmatpush1.bf16.msra.mxu1 %v8327_v10  ;;  %v10875_v9 = vrot.slane %v10658_v0, %v8765_v49  ;;  %v8415_v10 = vld [vmem:[%s11243_s1 + $0x1600] ss:$16 sps:$4 sm:$0xff]   ;;  %v8426_v0 = vld [vmem:[%s11243_s1 + $0x162c] ss:$16 sps:$4 sm:$0xff]  }
 0x288   :  { %5359 = vmatprep.subr.bf16.mxu0 %v8332_v11  ;;  %5892 = vmatprep.subr.bf16.mxu1 %v8335_v12  ;;  %v8418_v11 = vld [vmem:[%s11243_s1 + $0x1608] ss:$16 sps:$4 sm:$0xff]   ;;  %v8423_v12 = vld [vmem:[%s11243_s1 + $0x1624] ss:$16 sps:$4 sm:$0xff]  }
 0x28b   :  { %5360 = vmatpush1.bf16.msra.mxu0 %v8330_v52  ;;  %5893 = vmatpush1.bf16.msra.mxu1 %v8333_v15  ;;  %v982_v52 = vcombine.high %v10689_v8, %v10689_v8  ;;  %v8421_v15 = vld [vmem:[%s11243_s1 + $0x1620] ss:$16 sps:$4 sm:$0xff]   ;;  %v8429_v8 = vld [vmem:[%s11243_s1 + $0x1644] ss:$16 sps:$4 sm:$0xff]  }
 0x28c   :  { %5361 = vmatprep.subr.bf16.mxu0 %v8338_v16  ;;  %5894 = vmatprep.subr.bf16.mxu1 %v8341_v17  ;;  %v8424_v16 = vld [vmem:[%s11243_s1 + $0x1628] ss:$16 sps:$4 sm:$0xff]   ;;  %v8432_v17 = vld [vmem:[%s11243_s1 + $0x164c] ss:$16 sps:$4 sm:$0xff]  }
 0x28f   :  { %5362 = vmatpush1.bf16.msra.mxu0 %v8336_v18  ;;  %5895 = vmatpush1.bf16.msra.mxu1 %v8339_v19  ;;  %v8427_v18 = vld [vmem:[%s11243_s1 + $0x1640] ss:$16 sps:$4 sm:$0xff]   ;;  %v8430_v19 = vld [vmem:[%s11243_s1 + $0x1648] ss:$16 sps:$4 sm:$0xff]  }
 0x290   :  { %5363 = vmatprep.subr.bf16.mxu0 %v8344_v20  ;;  %5896 = vmatprep.subr.bf16.mxu1 %v8347_v22  ;;  %v8435_v20 = vld [vmem:[%s11243_s1 + $0x1664] ss:$16 sps:$4 sm:$0xff]   ;;  %v8438_v22 = vld [vmem:[%s11243_s1 + $0x166c] ss:$16 sps:$4 sm:$0xff]  }
 0x293   :  { %5364 = vmatpush1.bf16.msra.mxu0 %v8342_v23  ;;  %5897 = vmatpush1.bf16.msra.mxu1 %v8345_v24  ;;  %v8433_v23 = vld [vmem:[%s11243_s1 + $0x1660] ss:$16 sps:$4 sm:$0xff]   ;;  %v8436_v24 = vld [vmem:[%s11243_s1 + $0x1668] ss:$16 sps:$4 sm:$0xff]  }
 0x294   :  { %5365 = vmatprep.subr.bf16.mxu0 %v8350_v13  ;;  %5898 = vmatprep.subr.bf16.mxu1 %v8353_v27  ;;  %v8441_v13 = vld [vmem:[%s11243_s1 + $0x1684] ss:$16 sps:$4 sm:$0xff]   ;;  %v8444_v27 = vld [vmem:[%s11243_s1 + $0x168c] ss:$16 sps:$4 sm:$0xff]  }
 0x297   :  { %5366 = vmatpush1.bf16.msra.mxu0 %v8348_v28  ;;  %5899 = vmatpush1.bf16.msra.mxu1 %v8351_v29  ;;  %v8439_v28 = vld [vmem:[%s11243_s1 + $0x1680] ss:$16 sps:$4 sm:$0xff]   ;;  %v8442_v29 = vld [vmem:[%s11243_s1 + $0x1688] ss:$16 sps:$4 sm:$0xff]  }
 0x298   :  { %5367 = vmatprep.subr.bf16.mxu0 %v8356_v14  ;;  %5900 = vmatprep.subr.bf16.mxu1 %v8359_v30  ;;  %v8447_v14 = vld [vmem:[%s11243_s1 + $0x16a4] ss:$16 sps:$4 sm:$0xff]   ;;  %v8450_v30 = vld [vmem:[%s11243_s1 + $0x16ac] ss:$16 sps:$4 sm:$0xff]  }
 0x29b   :  { %5368 = vmatpush1.bf16.msra.mxu0 %v8354_v31  ;;  %5901 = vmatpush1.bf16.msra.mxu1 %v8357_v25  ;;  %v8445_v31 = vld [vmem:[%s11243_s1 + $0x16a0] ss:$16 sps:$4 sm:$0xff]   ;;  %v8448_v25 = vld [vmem:[%s11243_s1 + $0x16a8] ss:$16 sps:$4 sm:$0xff]  }
 0x29c   :  { %5369 = vmatprep.subr.bf16.mxu0 %v8362_v32  ;;  %5902 = vmatprep.subr.bf16.mxu1 %v8365_v33  ;;  %v8453_v32 = vld [vmem:[%s11243_s1 + $0x16c4] ss:$16 sps:$4 sm:$0xff]   ;;  %v8456_v33 = vld [vmem:[%s11243_s1 + $0x16cc] ss:$16 sps:$4 sm:$0xff]  }
 0x29f   :  { %5370 = vmatpush1.bf16.msra.mxu0 %v8360_v26  ;;  %5903 = vmatpush1.bf16.msra.mxu1 %v8363_v36  ;;  %v8451_v26 = vld [vmem:[%s11243_s1 + $0x16c0] ss:$16 sps:$4 sm:$0xff]   ;;  %v8454_v36 = vld [vmem:[%s11243_s1 + $0x16c8] ss:$16 sps:$4 sm:$0xff]  }
 0x2a0   :  { %5371 = vmatprep.subr.bf16.mxu0 %v8368_v37  ;;  %5904 = vmatprep.subr.bf16.mxu1 %v8371_v21  ;;  %v8459_v37 = vld [vmem:[%s11243_s1 + $0x16e4] ss:$16 sps:$4 sm:$0xff]   ;;  %v8462_v21 = vld [vmem:[%s11243_s1 + $0x16ec] ss:$16 sps:$4 sm:$0xff]  }
 0x2a3   :  { %5372 = vmatpush1.bf16.msra.mxu0 %v8366_v39  ;;  %5905 = vmatpush1.bf16.msra.mxu1 %v8369_v40  ;;  %v8457_v39 = vld [vmem:[%s11243_s1 + $0x16e0] ss:$16 sps:$4 sm:$0xff]   ;;  %v8460_v40 = vld [vmem:[%s11243_s1 + $0x16e8] ss:$16 sps:$4 sm:$0xff]  }
 0x2a4   :  { %5373 = vmatprep.subr.bf16.mxu0 %v8374_v41  ;;  %5906 = vmatprep.subr.bf16.mxu1 %v8377_v34  ;;  %v8465_v41 = vld [vmem:[%s11243_s1 + $0x1704] ss:$16 sps:$4 sm:$0xff]   ;;  %v8468_v34 = vld [vmem:[%s11243_s1 + $0x170c] ss:$16 sps:$4 sm:$0xff]  }
 0x2a7   :  { %5374 = vmatpush1.bf16.msra.mxu0 %v8372_v43  ;;  %5907 = vmatpush1.bf16.msra.mxu1 %v8375_v45  ;;  %v8463_v43 = vld [vmem:[%s11243_s1 + $0x1700] ss:$16 sps:$4 sm:$0xff]   ;;  %v8466_v45 = vld [vmem:[%s11243_s1 + $0x1708] ss:$16 sps:$4 sm:$0xff]  }
 0x2a8   :  { %5375 = vmatprep.subr.bf16.mxu0 %v8380_v46  ;;  %5908 = vmatprep.subr.bf16.mxu1 %v8383_v35  ;;  %v8471_v46 = vld [vmem:[%s11243_s1 + $0x1724] ss:$16 sps:$4 sm:$0xff]   ;;  %v8474_v35 = vld [vmem:[%s11243_s1 + $0x172c] ss:$16 sps:$4 sm:$0xff]  }
 0x2ab   :  { %5376 = vmatpush1.bf16.msra.mxu0 %v8378_v50  ;;  %5909 = vmatpush1.bf16.msra.mxu1 %v8381_v53  ;;  %v8469_v50 = vld [vmem:[%s11243_s1 + $0x1720] ss:$16 sps:$4 sm:$0xff]   ;;  %v8472_v53 = vld [vmem:[%s11243_s1 + $0x1728] ss:$16 sps:$4 sm:$0xff]  }
 0x2ac   :  { %5377 = vmatprep.subr.bf16.mxu0 %v8386_v38  ;;  %5910 = vmatprep.subr.bf16.mxu1 %v8389_v54  ;;  %v8477_v38 = vld [vmem:[%s11243_s1 + $0x1744] ss:$16 sps:$4 sm:$0xff]   ;;  %v8480_v54 = vld [vmem:[%s11243_s1 + $0x174c] ss:$16 sps:$4 sm:$0xff]  }
 0x2af   :  { %5378 = vmatpush1.bf16.msra.mxu0 %v8384_v55  ;;  %5911 = vmatpush1.bf16.msra.mxu1 %v8387_v56  ;;  %v8475_v55 = vld [vmem:[%s11243_s1 + $0x1740] ss:$16 sps:$4 sm:$0xff]   ;;  %v8478_v56 = vld [vmem:[%s11243_s1 + $0x1748] ss:$16 sps:$4 sm:$0xff]  }
 0x2b0   :  { %5379 = vmatprep.subr.bf16.mxu0 %v8392_v47  ;;  %5912 = vmatprep.subr.bf16.mxu1 %v8395_v57  ;;  %v8483_v47 = vld [vmem:[%s11243_s1 + $0x1764] ss:$16 sps:$4 sm:$0xff]   ;;  %v8486_v57 = vld [vmem:[%s11243_s1 + $0x176c] ss:$16 sps:$4 sm:$0xff]  }
 0x2b3   :  { %5380 = vmatpush1.bf16.msra.mxu0 %v8390_v58  ;;  %5913 = vmatpush1.bf16.msra.mxu1 %v8393_v59  ;;  %v8481_v58 = vld [vmem:[%s11243_s1 + $0x1760] ss:$16 sps:$4 sm:$0xff]   ;;  %v8484_v59 = vld [vmem:[%s11243_s1 + $0x1768] ss:$16 sps:$4 sm:$0xff]  }
 0x2b4   :  { %5381 = vmatprep.subr.bf16.mxu0 %v8398_v48  ;;  %5914 = vmatprep.subr.bf16.mxu1 %v8401_v61  ;;  %v8489_v48 = vld [vmem:[%s11243_s1 + $0x1784] ss:$16 sps:$4 sm:$0xff]   ;;  %v8492_v61 = vld [vmem:[%s11243_s1 + $0x178c] ss:$16 sps:$4 sm:$0xff]  }
 0x2b7   :  { %5382 = vmatpush1.bf16.msra.mxu0 %v8396_v63  ;;  %5915 = vmatpush1.bf16.msra.mxu1 %v8399_v44  ;;  %v8487_v63 = vld [vmem:[%s11243_s1 + $0x1780] ss:$16 sps:$4 sm:$0xff]   ;;  %v8490_v44 = vld [vmem:[%s11243_s1 + $0x1788] ss:$16 sps:$4 sm:$0xff]  }
 0x2b8   :  { %5383 = vmatprep.subr.bf16.mxu0 %v8404_v1  ;;  %5916 = vmatprep.subr.bf16.mxu1 %v8407_v51  ;;  %v8495_v1 = vld [vmem:[%s11243_s1 + $0x17a4] ss:$16 sps:$4 sm:$0xff]   ;;  %v8498_v51 = vld [vmem:[%s11243_s1 + $0x17ac] ss:$16 sps:$4 sm:$0xff]  }
 0x2bb   :  { %5384 = vmatpush1.bf16.msra.mxu0 %v8402_v2  ;;  %5917 = vmatpush1.bf16.msra.mxu1 %v8405_v3  ;;  %v8493_v2 = vld [vmem:[%s11243_s1 + $0x17a0] ss:$16 sps:$4 sm:$0xff]   ;;  %v8496_v3 = vld [vmem:[%s11243_s1 + $0x17a8] ss:$16 sps:$4 sm:$0xff]  }
 0x2bc   :  { %5385 = vmatprep.subr.bf16.mxu0 %v8410_v4  ;;  %5918 = vmatprep.subr.bf16.mxu1 %v8413_v60  ;;  %v8501_v4 = vld [vmem:[%s11243_s1 + $0x17c4] ss:$16 sps:$4 sm:$0xff]   ;;  %v8504_v60 = vld [vmem:[%s11243_s1 + $0x17cc] ss:$16 sps:$4 sm:$0xff]  }
 0x2bf   :  { %5386 = vmatpush1.bf16.msra.mxu0 %v8408_v5  ;;  %5919 = vmatpush1.bf16.msra.mxu1 %v8411_v6  ;;  %v8499_v5 = vld [vmem:[%s11243_s1 + $0x17c0] ss:$16 sps:$4 sm:$0xff]   ;;  %v8502_v6 = vld [vmem:[%s11243_s1 + $0x17c8] ss:$16 sps:$4 sm:$0xff]  }
 0x2c0   :  { %5396 = vmatprep.subr.bf16.mxu0 %v8417_v7  ;;  %5929 = vmatprep.subr.bf16.mxu1 %v8420_v62  ;;  %v8507_v7 = vld [vmem:[%s11243_s1 + $0x17e4] ss:$16 sps:$4 sm:$0xff]   ;;  %v8510_v62 = vld [vmem:[%s11243_s1 + $0x17ec] ss:$16 sps:$4 sm:$0xff]  }
 0x2c2   :  { %5388 = vmatmul.mubr.bf16.vlgmr.msra.gmra.mrb[0].mxu0 %v10875_v9  ;;  %5921 = vmatmul.mubr.bf16.vlgmr.msra.gmra.mrb[0].mxu1 %v10875_v9 }
 0x2c3   :  { %5397 = vmatpush1.bf16.msra.mxu0 %v8415_v10  ;;  %5930 = vmatpush1.bf16.msra.mxu1 %v8418_v11  ;;  %v8505_v10 = vld [vmem:[%s11243_s1 + $0x17e0] ss:$16 sps:$4 sm:$0xff]   ;;  %v8508_v11 = vld [vmem:[%s11243_s1 + $0x17e8] ss:$16 sps:$4 sm:$0xff]  }
 0x2c4   :  { %5398 = vmatprep.subr.bf16.mxu0 %v8423_v12  ;;  %5931 = vmatprep.subr.bf16.mxu1 %v8426_v0  ;;  %v8513_v12 = vld [vmem:[%s11243_s1 + $0x1804] ss:$16 sps:$4 sm:$0xff]   ;;  %v8516_v0 = vld [vmem:[%s11243_s1 + $0x180c] ss:$16 sps:$4 sm:$0xff]  }
 0x2c5   :  { %5428 = vmatprep.mubr.bf16.mxu0 %v982_v52  ;;  %5961 = vmatprep.mubr.bf16.mxu1 %v982_v52  ;;  %v980_v52 = vcombine.high %v10875_v9, %v10875_v9  ;;  %v8522_v9 = vld [vmem:[%s11243_s1 + $0x182c] ss:$16 sps:$4 sm:$0xff]  }
 0x2c7   :  { %5399 = vmatpush1.bf16.msra.mxu0 %v8421_v15  ;;  %5932 = vmatpush1.bf16.msra.mxu1 %v8424_v16  ;;  %v8511_v15 = vld [vmem:[%s11243_s1 + $0x1800] ss:$16 sps:$4 sm:$0xff]   ;;  %v8514_v16 = vld [vmem:[%s11243_s1 + $0x1808] ss:$16 sps:$4 sm:$0xff]  }
 0x2c8   :  { %5400 = vmatprep.subr.bf16.mxu0 %v8429_v8  ;;  %5933 = vmatprep.subr.bf16.mxu1 %v8432_v17  ;;  %v8519_v8 = vld [vmem:[%s11243_s1 + $0x1824] ss:$16 sps:$4 sm:$0xff]   ;;  %v8517_v17 = vld [vmem:[%s11243_s1 + $0x1820] ss:$16 sps:$4 sm:$0xff]  }
 0x2cb   :  { %5401 = vmatpush1.bf16.msra.mxu0 %v8427_v18  ;;  %5934 = vmatpush1.bf16.msra.mxu1 %v8430_v19  ;;  %v8520_v18 = vld [vmem:[%s11243_s1 + $0x1828] ss:$16 sps:$4 sm:$0xff]   ;;  %v8525_v19 = vld [vmem:[%s11243_s1 + $0x1844] ss:$16 sps:$4 sm:$0xff]  }
 0x2cc   :  { %5402 = vmatprep.subr.bf16.mxu0 %v8435_v20  ;;  %5935 = vmatprep.subr.bf16.mxu1 %v8438_v22  ;;  %v8528_v20 = vld [vmem:[%s11243_s1 + $0x184c] ss:$16 sps:$4 sm:$0xff]   ;;  %v8598_v22 = vmov 0  }
 0x2cf   :  { %5403 = vmatpush1.bf16.msra.mxu0 %v8433_v23  ;;  %5936 = vmatpush1.bf16.msra.mxu1 %v8436_v24  ;;  %v8523_v23 = vld [vmem:[%s11243_s1 + $0x1840] ss:$16 sps:$4 sm:$0xff]   ;;  %v8526_v24 = vld [vmem:[%s11243_s1 + $0x1848] ss:$16 sps:$4 sm:$0xff]  }
 0x2d0   :  { %5404 = vmatprep.subr.bf16.mxu0 %v8441_v13  ;;  %5937 = vmatprep.subr.bf16.mxu1 %v8444_v27  ;;  %v8531_v13 = vld [vmem:[%s11243_s1 + $0x1864] ss:$16 sps:$4 sm:$0xff]   ;;  %v8534_v27 = vld [vmem:[%s11243_s1 + $0x186c] ss:$16 sps:$4 sm:$0xff]  }
 0x2d3   :  { %5405 = vmatpush1.bf16.msra.mxu0 %v8439_v28  ;;  %5938 = vmatpush1.bf16.msra.mxu1 %v8442_v29  ;;  %v8529_v28 = vld [vmem:[%s11243_s1 + $0x1860] ss:$16 sps:$4 sm:$0xff]   ;;  %v8532_v29 = vld [vmem:[%s11243_s1 + $0x1868] ss:$16 sps:$4 sm:$0xff]  }
 0x2d4   :  { %5406 = vmatprep.subr.bf16.mxu0 %v8447_v14  ;;  %5939 = vmatprep.subr.bf16.mxu1 %v8450_v30  ;;  %v6389_v14 = vld.sshfl [vmem:[%s11242_s0 + $0x18] sm:$0x1 pattern:$0x75316420]  ;;  %v8535_v30 = vld [vmem:[%s11245_s3 + $0x40] sm:$0xff]  }
 0x2d7   :  { %5407 = vmatpush1.bf16.msra.mxu0 %v8445_v31  ;;  %5940 = vmatpush1.bf16.msra.mxu1 %v8448_v25  ;;  %v8536_v31 = vld [vmem:[%s11245_s3 + $0xc0] sm:$0xff]   ;;  %v996_v25 = vrot.slane %v6389_v14, %v8765_v49  ;;  %v8540_v49 = vld [vmem:[%s11245_s3 + $0xc8] sm:$0xff]  }
 0x2d8   :  { %5408 = vmatprep.subr.bf16.mxu0 %v8453_v32  ;;  %5941 = vmatprep.subr.bf16.mxu1 %v8456_v33  ;;  %v8537_v32 = vld [vmem:[%s11245_s3] sm:$0xff]  }
 0x2d9   :  { %v8538_v33 = vld [vmem:[%s11245_s3 + $0x80] sm:$0xff]  }
 0x2db   :  { %5409 = vmatpush1.bf16.msra.mxu0 %v8451_v26  ;;  %5942 = vmatpush1.bf16.msra.mxu1 %v8454_v36  ;;  %v8539_v26 = vld [vmem:[%s11245_s3 + $0x48] sm:$0xff]  }
 0x2dc   :  { %5410 = vmatprep.subr.bf16.mxu0 %v8459_v37  ;;  %5943 = vmatprep.subr.bf16.mxu1 %v8462_v21  ;;  %v8541_v36 = vld [vmem:[%s11245_s3 + $0x8] sm:$0xff]   ;;  %v8543_v21 = vld [vmem:[%s11245_s3 + $0x50] sm:$0xff]  }
 0x2dd   :  { %v8542_v37 = vld [vmem:[%s11245_s3 + $0x88] sm:$0xff]  }
 0x2df   :  { %5411 = vmatpush1.bf16.msra.mxu0 %v8457_v39  ;;  %5944 = vmatpush1.bf16.msra.mxu1 %v8460_v40  ;;  %v8544_v39 = vld [vmem:[%s11245_s3 + $0xd0] sm:$0xff]  }
 0x2e0   :  { %5412 = vmatprep.subr.bf16.mxu0 %v8465_v41  ;;  %5945 = vmatprep.subr.bf16.mxu1 %v8468_v34  ;;  %v8545_v40 = vld [vmem:[%s11245_s3 + $0x10] sm:$0xff]   ;;  %v8547_v34 = vld [vmem:[%s11245_s3 + $0x58] sm:$0xff]  }
 0x2e1   :  { %v8546_v41 = vld [vmem:[%s11245_s3 + $0x90] sm:$0xff]  }
 0x2e3   :  { %5413 = vmatpush1.bf16.msra.mxu0 %v8463_v43  ;;  %5946 = vmatpush1.bf16.msra.mxu1 %v8466_v45  ;;  %v8548_v43 = vld [vmem:[%s11245_s3 + $0xd8] sm:$0xff]  }
 0x2e4   :  { %5414 = vmatprep.subr.bf16.mxu0 %v8471_v46  ;;  %5947 = vmatprep.subr.bf16.mxu1 %v8474_v35  ;;  %v8549_v45 = vld [vmem:[%s11245_s3 + $0x18] sm:$0xff]   ;;  %v8551_v35 = vld [vmem:[%s11245_s3 + $0x60] sm:$0xff]  }
 0x2e5   :  { %v8550_v46 = vld [vmem:[%s11245_s3 + $0x98] sm:$0xff]  }
 0x2e7   :  { %5415 = vmatpush1.bf16.msra.mxu0 %v8469_v50  ;;  %5948 = vmatpush1.bf16.msra.mxu1 %v8472_v53  ;;  %v8552_v50 = vld [vmem:[%s11245_s3 + $0xe0] sm:$0xff]  }
 0x2e8   :  { %5416 = vmatprep.subr.bf16.mxu0 %v8477_v38  ;;  %5949 = vmatprep.subr.bf16.mxu1 %v8480_v54  ;;  %v8553_v53 = vld [vmem:[%s11245_s3 + $0x20] sm:$0xff]   ;;  %v8555_v54 = vld [vmem:[%s11245_s3 + $0x68] sm:$0xff]  }
 0x2e9   :  { %v8554_v38 = vld [vmem:[%s11245_s3 + $0xa0] sm:$0xff]  }
 0x2eb   :  { %5417 = vmatpush1.bf16.msra.mxu0 %v8475_v55  ;;  %5950 = vmatpush1.bf16.msra.mxu1 %v8478_v56  ;;  %v8556_v55 = vld [vmem:[%s11245_s3 + $0xe8] sm:$0xff]  }
 0x2ec   :  { %5418 = vmatprep.subr.bf16.mxu0 %v8483_v47  ;;  %5951 = vmatprep.subr.bf16.mxu1 %v8486_v57  ;;  %v8557_v56 = vld [vmem:[%s11245_s3 + $0x28] sm:$0xff]   ;;  %v8559_v57 = vld [vmem:[%s11245_s3 + $0x70] sm:$0xff]  }
 0x2ed   :  { %v8558_v47 = vld [vmem:[%s11245_s3 + $0xa8] sm:$0xff]  }
 0x2ef   :  { %5419 = vmatpush1.bf16.msra.mxu0 %v8481_v58  ;;  %5952 = vmatpush1.bf16.msra.mxu1 %v8484_v59  ;;  %v8560_v58 = vld [vmem:[%s11245_s3 + $0xf0] sm:$0xff]  }
 0x2f0   :  { %5420 = vmatprep.subr.bf16.mxu0 %v8489_v48  ;;  %5953 = vmatprep.subr.bf16.mxu1 %v8492_v61  ;;  %v8561_v59 = vld [vmem:[%s11245_s3 + $0x30] sm:$0xff]   ;;  %v8563_v61 = vld [vmem:[%s11245_s3 + $0x78] sm:$0xff]  }
 0x2f1   :  { %v8562_v48 = vld [vmem:[%s11245_s3 + $0xb0] sm:$0xff]  }
 0x2f3   :  { %5421 = vmatpush1.bf16.msra.mxu0 %v8487_v63  ;;  %5954 = vmatpush1.bf16.msra.mxu1 %v8490_v44  ;;  %v8564_v63 = vld [vmem:[%s11245_s3 + $0xf8] sm:$0xff]  }
 0x2f4   :  { %5422 = vmatprep.subr.bf16.mxu0 %v8495_v1  ;;  %5955 = vmatprep.subr.bf16.mxu1 %v8498_v51  ;;  %v8565_v44 = vld [vmem:[%s11245_s3 + $0x38] sm:$0xff]   ;;  %v814_v51 = vsub.s32 0, %v8747_v42 }
 0x2f5   :  { %v8566_v1 = vld [vmem:[%s11245_s3 + $0xb8] sm:$0xff]  }
 0x2f7   :  { %5423 = vmatpush1.bf16.msra.mxu0 %v8493_v2  ;;  %5956 = vmatpush1.bf16.msra.mxu1 %v8496_v3  ;;  %v822_v2 = vsub.s32 2, %v8747_v42  ;;  %v810_v3 = vld [vmem:[%s11244_s2] sm:$0xf] }
 0x2f8   :  { %5424 = vmatprep.subr.bf16.mxu0 %v8501_v4  ;;  %5957 = vmatprep.subr.bf16.mxu1 %v8504_v60  ;;  %v818_v4 = vsub.s32 1, %v8747_v42  ;;  %v826_v60 = vsub.s32 3, %v8747_v42 }
 0x2fb   :  { %5425 = vmatpush1.bf16.msra.mxu0 %v8499_v5  ;;  %5958 = vmatpush1.bf16.msra.mxu1 %v8502_v6  ;;  %v815_v5 = vrot.slane %v810_v3, %v814_v51  ;;  %v823_v6 = vrot.slane %v810_v3, %v822_v2 }
 0x2fc   :  { %5426 = vmatprep.subr.bf16.mxu0 %v8507_v7  ;;  %5959 = vmatprep.subr.bf16.mxu1 %v8510_v62  ;;  %v819_v7 = vrot.slane %v810_v3, %v818_v4  ;;  %v827_v62 = vrot.slane %v810_v3, %v826_v60 }
 0x2ff   :  { %5427 = vmatpush1.bf16.msra.mxu0 %v8505_v10  ;;  %5960 = vmatpush1.bf16.msra.mxu1 %v8508_v11 }
 0x300   :  { %5437 = vmatprep.subr.bf16.mxu0 %v8513_v12  ;;  %5970 = vmatprep.subr.bf16.mxu1 %v8516_v0 }
 0x302   :  { %5429 = vmatmul.mubr.bf16.vlgmr.msra.gmra.mrb[0].mxu0 %v980_v52  ;;  %5962 = vmatmul.mubr.bf16.vlgmr.msra.gmra.mrb[0].mxu1 %v980_v52 }
 0x303   :  { %5438 = vmatpush1.bf16.msra.mxu0 %v8511_v15  ;;  %5971 = vmatpush1.bf16.msra.mxu1 %v8514_v16 }
 0x304   :  { %5439 = vmatprep.subr.bf16.mxu0 %v8519_v8  ;;  %5972 = vmatprep.subr.bf16.mxu1 %v8522_v9 }
 0x305   :  { %5469 = vmatprep.mubr.bf16.mxu0 %v8598_v22  ;;  %6002 = vmatprep.mubr.bf16.mxu1 %v8598_v22 }
 0x307   :  { %5440 = vmatpush1.bf16.msra.mxu0 %v8517_v17  ;;  %5973 = vmatpush1.bf16.msra.mxu1 %v8520_v18 }
 0x308   :  { %5441 = vmatprep.subr.bf16.mxu0 %v8525_v19  ;;  %5974 = vmatprep.subr.bf16.mxu1 %v8528_v20 }
 0x30b   :  { %5442 = vmatpush1.bf16.msra.mxu0 %v8523_v23  ;;  %5975 = vmatpush1.bf16.msra.mxu1 %v8526_v24 }
 0x30c   :  { %5443 = vmatprep.subr.bf16.mxu0 %v8531_v13  ;;  %5976 = vmatprep.subr.bf16.mxu1 %v8534_v27 }
 0x30f   :  { %5444 = vmatpush1.bf16.msra.mxu0 %v8529_v28  ;;  %5977 = vmatpush1.bf16.msra.mxu1 %v8532_v29 }
 0x310   :  { %7209 = vmatprep.subr.bf16.mxu0 %v8535_v30  ;;  %7231 = vmatprep.subr.bf16.mxu1 %v8536_v31  ;;  %v7176_v30 = vld [vmem:[%s11246_s4] ss:$0 sm:$0xff]  ;;  %s8599_s4 = smov [#allocation2]  }
 0x311   :  { %s6381_s6 = sshll.u32 %s8599_s4, 4  ;;  %s6382_s6 = int_to_ptr.vmem [resolvable:$true] %s6381_s6 }
 0x312   :  { %7174 = vmatmul.mubr.msk.bf16.vlgmr.msra.gmra.mrb[0].mxu0 %vm4941_vm0, %v996_v25  ;;  %7175 = vmatmul.mubr.msk.bf16.vlgmr.msra.gmra.mrb[0].mxu1 %vm4941_vm0, %v996_v25  ;;  %s8573_s7 = scalar_lea.vmem %s6382_s6, 32  ;;  %p8578_p1 = scmp.lt.s32.totalorder %s6382_s6, %s6382_s6 }
 0x313   :  { %7210 = vmatpush3.bf16.msra.mxu0 %v8537_v32  ;;  %7232 = vmatpush3.bf16.msra.mxu1 %v8538_v33  ;;  %p8574_p0 = scmp.ne.s32.totalorder %s6382_s6, %s8573_s7  ;;  %p8579_p2 = scmp.lt.s32.totalorder %s8573_s7, %s8573_s7 }
 0x314   :  { %7211 = vmatprep.subr.bf16.mxu0 %v8539_v26  ;;  %7233 = vmatprep.subr.bf16.mxu1 %v8540_v49 }
 0x315   :  { %p8580_p3 = por %p8579_p2, %p8578_p1 }
 0x317   :  { %7212 = vmatpush3.bf16.msra.mxu0 %v8541_v36  ;;  %7234 = vmatpush3.bf16.msra.mxu1 %v8542_v37  ;;  %p8581_p4 = pnand %p8580_p3, %p8574_p0 }
 0x318   :  { %7213 = vmatprep.subr.bf16.mxu0 %v8543_v21  ;;  %7235 = vmatprep.subr.bf16.mxu1 %v8544_v39 }
 0x31b   :  { %7214 = vmatpush3.bf16.msra.mxu0 %v8545_v40  ;;  %7236 = vmatpush3.bf16.msra.mxu1 %v8546_v41 }
 0x31c   :  { %7215 = vmatprep.subr.bf16.mxu0 %v8547_v34  ;;  %7237 = vmatprep.subr.bf16.mxu1 %v8548_v43 }
 0x31f   :  { %7216 = vmatpush3.bf16.msra.mxu0 %v8549_v45  ;;  %7238 = vmatpush3.bf16.msra.mxu1 %v8550_v46 }
 0x320   :  { %7217 = vmatprep.subr.bf16.mxu0 %v8551_v35  ;;  %7239 = vmatprep.subr.bf16.mxu1 %v8552_v50 }
 0x323   :  { %7218 = vmatpush3.bf16.msra.mxu0 %v8553_v53  ;;  %7240 = vmatpush3.bf16.msra.mxu1 %v8554_v38 }
 0x324   :  { %7219 = vmatprep.subr.bf16.mxu0 %v8555_v54  ;;  %7241 = vmatprep.subr.bf16.mxu1 %v8556_v55 }
 0x327   :  { %7220 = vmatpush3.bf16.msra.mxu0 %v8557_v56  ;;  %7242 = vmatpush3.bf16.msra.mxu1 %v8558_v47 }
 0x328   :  { %7221 = vmatprep.subr.bf16.mxu0 %v8559_v57  ;;  %7243 = vmatprep.subr.bf16.mxu1 %v8560_v58 }
 0x32b   :  { %7222 = vmatpush3.bf16.msra.mxu0 %v8561_v59  ;;  %7244 = vmatpush3.bf16.msra.mxu1 %v8562_v48 }
 0x32c   :  { %7223 = vmatprep.subr.bf16.mxu0 %v8563_v61  ;;  %7245 = vmatprep.subr.bf16.mxu1 %v8564_v63 }
 0x32f   :  { %7224 = vmatpush3.bf16.msra.mxu0 %v8565_v44  ;;  %7246 = vmatpush3.bf16.msra.mxu1 %v8566_v1 }
 0x3e5   :  { %v5471_v10 = vpop.f32.mrb[0].mxu0  ;;  %v6004_v11 = vpop.f32.mrb[0].mxu1 }
 0x3e6   :  { %v7253_v12 = vadd.f32 %v5471_v10, %v815_v5  ;;  %v7255_v0 = vadd.f32 %v6004_v11, %v823_v6  ;;  %v5473_v52 = vpop.f32.mrb[1].mxu0  ;;  %v6006_v15 = vpop.f32.mrb[1].mxu1 }
 0x3e7   :  { %v7254_v16 = vadd.f32 %v5473_v52, %v819_v7  ;;  %v7256_v8 = vadd.f32 %v6006_v15, %v827_v62  ;;  %v5475_v9 = vpop.f32.mrb[2].mxu0  ;;  %v6008_v17 = vpop.f32.mrb[2].mxu1 }
 0x3e8   :  { %v6011_v18 = vmax.f32 %v7253_v12, 0.0  ;;  %v6013_v19 = vmax.f32 %v7255_v0, 0.0  ;;  %v5476_v20 = vpop.f32.mrb[3].mxu0  ;;  %v6009_v22 = vpop.f32.mrb[3].mxu1 }
 0x3e9   :  { %v6012_v23 = vmax.f32 %v7254_v16, 0.0  ;;  %v6014_v42 = vmax.f32 %v7256_v8, 0.0 }
 0x3ea   :  { %v6015_v27 = vpack.c.bf16 %v6011_v18, %v6011_v18  ;;  %v6017_v28 = vpack.c.bf16 %v6013_v19, %v6013_v19 }
 0x3eb   :  { %v6016_v24 = vpack.c.bf16 %v6012_v23, %v6012_v23  ;;  %v6018_v13 = vpack.c.bf16 %v6014_v42, %v6014_v42 }
 0x3ed   :  { %6314 = vmatprep.mubr.bf16.mxu0 %v6016_v24  ;;  %6354 = vmatprep.mubr.bf16.mxu1 %v6018_v13 }
 0x3ee   :  { %6315 = vmatmul.mubr.bf16.vlgmr.msra.gmra.mrb[4].mxu0 %v6015_v27  ;;  %6355 = vmatmul.mubr.bf16.vlgmr.msra.gmra.mrb[4].mxu1 %v6017_v28 }
 0x4c1   :  { %v7225_v29 = vpop.f32.mrb[4].mxu0  ;;  %v7247_v14 = vpop.f32.mrb[4].mxu1 }
 0x4c2   :  { %v7226_v31 = vpop.f32.mrb[5].mxu0  ;;  %v7248_v25 = vpop.f32.mrb[5].mxu1 }
 0x4c3   :  { %v7227_v32 = vadd.f32 %v7226_v31, %v7225_v29  ;;  %v7249_v33 = vadd.f32 %v7248_v25, %v7247_v14  ;;  %v7228_v26 = vpop.f32.mrb[6].mxu0  ;;  %v7250_v49 = vpop.f32.mrb[6].mxu1 }
 0x4c4   :  { %v7229_v36 = vpop.f32.mrb[7].mxu0  ;;  %v7251_v37 = vpop.f32.mrb[7].mxu1 }
 0x4c5   :  { %v6317_v21 = vadd.f32 %v7227_v32, %v7176_v30 }
 0x4c7   :  { %v6357_v39 = vadd.f32 %v7249_v33, %v6317_v21 }
 0x4c9   :  { %v6363_v40 = vsel %vm6362_vm1, %v6357_v39, -inf }
 0x4ca   :  { %6364 = vmax.xlane.f32.xlu0 %v6363_v40 }
 0x557   :  { %v6365_v41 = vpop.xlane.xlu0 %6364 }
 0x558   :  { %v6366_v34 = vsub.f32 %v6357_v39, %v6365_v41 }
 0x55a   :  { %v6367_v43 = vmul.f32 1.442695, %v6366_v34 }
 0x55c   :  { %8567 = vpow2.f32 %v6367_v43 }
 0x566   :  { %v8568_v45 = vpop.eup %8567 }
 0x567   :  { %v6369_v46 = vsel %vm6362_vm1, %v8568_v45, 0.0 }
 0x568   :  { %6370 = vadd.xlane.f32.xlu0 %v6369_v46 }
 0x5f5   :  { %v6371_v35 = vpop.xlane.xlu0 %6370 }
 0x5f6   :  { %8569 = vrcp.f32 %v6371_v35 }
 0x600   :  { %v8570_v50 = vpop.eup %8569 }
 0x601   :  { %v6373_v53 = vmul.f32 %v8570_v50, %v8568_v45 }
 0x603   :  { %6374 = vst.msk [vmem:[#allocation2] sm:$0x3] %vm6362_vm1, %v6373_v53 }
 0x604   :  { %8584 = shalt.err (!%p8581_p4)
}
 0x605   :  { %s8585_s10 = scalar_lea.hbm %s11247_s5, 32 }
 0x606   :  { %p8586_p5 = scmp.ne.s32.totalorder %s11247_s5, %s8585_s10  ;;  %p8589_p6 = scmp.lt.u32.totalorder %s8585_s10, %s11247_s5 }
 0x608   :  { %p8591_p7 = pnand %p8589_p6, %p8586_p5 }
 0x60a   :  { %8594 = shalt.err (!%p8591_p7)
}
 0x60b   :  { %6384 = dma.vmem_to_hbm [thread:$0]  %s6382_s6, 32, %s11247_s5, [#allocation3]  }
 0x60c   :  { %8595 = dma.done.wait [#allocation3], 32  }
 0x60d   :  { %8596 = vsyncadd [#allocation3], 4294967264 }
 0x60e   :  { %6388 = vsyncpa [#allocation3], 1 }

</bundles_post_ra>
